<compile_context>
chip_gen: v7x
topology: tpu7x:2x2x1
jax: 0.10.0
libtpu: 0.0.40
codegen_flags: <defaults>
</compile_context>

<pallas_src>
import numpy as np
import jax
import jax.numpy as jnp
from jax.experimental import pallas as pl
from jax.experimental.pallas import tpu as pltpu


# -----------------------------------------------------------------------------
# In-kernel helpers (traced inside the Pallas kernel body)
# -----------------------------------------------------------------------------
def _maxpool_w_pairs(m2d):
    """Rows (2i, 2i+1) of m2d form one horizontal pooling pair -> row i of the output.

    Implemented as two 0/1 row-selection matmuls (MXU) + elementwise max, which avoids
    strided sublane loads and minor-dim reshapes.
    """
    n2, _ = m2d.shape
    n = n2 // 2
    rows = jax.lax.broadcasted_iota(jnp.int32, (n, n2), 0)
    cols = jax.lax.broadcasted_iota(jnp.int32, (n, n2), 1)
    sel_even = (cols == 2 * rows).astype(m2d.dtype)
    sel_odd = (cols == 2 * rows + 1).astype(m2d.dtype)
    even = jnp.dot(sel_even, m2d, preferred_element_type=jnp.float32)
    odd = jnp.dot(sel_odd, m2d, preferred_element_type=jnp.float32)
    return jnp.maximum(even, odd)


def _conv3x3_relu_pool(xpad, w_taps, bias):
    """Conv2d(k=3, s=1, p=1) + bias -> ReLU -> MaxPool2d(2) on one padded NHWC tile.

    xpad   : (1, H+2, W+2, Cin)  padded input (zeros on the 1-pixel border)
    w_taps : (3, 3, Cin, Cout)   conv weight, tap-major layout
    bias   : (1, Cout)
    returns: (H//2 * W//2, Cout) pooled activation, rows ordered (h, w)
    """
    nb, hp2, wp2, cin = xpad.shape
    h, w = hp2 - 2, wp2 - 2
    cout = w_taps.shape[-1]

    # conv as 9 accumulated tap matmuls (in-register, no im2col materialization)
    acc = jnp.zeros((h * w, cout), jnp.float32)
    for kh in range(3):
        for kw in range(3):
            x_t = xpad[:, kh:kh + h, kw:kw + w, :].reshape(h * w, cin)
            acc = acc + jnp.dot(x_t, w_taps[kh, kw],
                                preferred_element_type=jnp.float32)
    acc = jnp.maximum(acc + bias, 0.0)  # ReLU (relu_param == 0)
    # TODO(synk): Dropout(p=0.1) is identity in eval/inference mode; training-mode RNG mask
    #             not implemented.

    # 2x2 non-overlapping max pool, entirely in registers.
    # H direction: split the (major) H axis and take the pairwise max.
    y = acc.reshape(nb, h // 2, 2, w, cout)
    m = jnp.maximum(y[:, :, 0, :, :], y[:, :, 1, :, :])          # (1, H//2, W, Cout)
    # W direction: adjacent rows of the flattened map are the horizontal pool pair.
    m2d = m.reshape((h // 2) * w, cout)
    return _maxpool_w_pairs(m2d)                                  # (H//2 * W//2, Cout)


# -----------------------------------------------------------------------------
# Fused forward kernel (one batch element per grid step)
# -----------------------------------------------------------------------------
def neuralnet_kernel(xp_ref, cw1_ref, cb1_ref, cw2_ref, cb2_ref,
                     fw1_ref, fb1_ref, fw2_ref, fb2_ref,
                     fw3_ref, fb3_ref, fwo_ref, fbo_ref,
                     o_ref, xpad2_scr):
    # ---- conv block 1: Conv3x3(pad 1) + ReLU + MaxPool2 -------------------------------
    p1 = _conv3x3_relu_pool(xp_ref[...], cw1_ref[...], cb1_ref[...])   # (H2*W2, C1)

    # ---- zero-pad the pooled map for conv block 2 (VMEM scratch, no HBM traffic) ------
    nb, hs, ws, c1 = xpad2_scr.shape
    h2, w2 = hs - 2, ws - 2
    xpad2_scr[...] = jnp.zeros_like(xpad2_scr)
    xpad2_scr[:, 1:1 + h2, 1:1 + w2, :] = p1.reshape(nb, h2, w2, c1)

    # ---- conv block 2 -----------------------------------------------------------------
    p2 = _conv3x3_relu_pool(xpad2_scr[...], cw2_ref[...], cb2_ref[...])  # (H4*W4, C2)

    # ---- FC stack: (Linear->Tanh) x3 -> Linear ------------------------------------------
    # PyTorch's NCHW flatten is folded into fw1's row ordering (rows = (h, w, c), i.e. the
    # natural order of p2).  fc1 is contracted per pooled position to avoid an activation
    # reshape that merges rows into lanes.
    fw1 = fw1_ref[...]
    npos, c2 = p2.shape
    n1 = fw1.shape[1]
    hfc = jnp.zeros((1, n1), jnp.float32)
    for p in range(npos):
        hfc = hfc + jnp.dot(p2[p:p + 1, :], fw1[p * c2:(p + 1) * c2, :],
                            preferred_element_type=jnp.float32)
    hfc = jnp.tanh(hfc + fb1_ref[...])
    hfc = jnp.tanh(jnp.dot(hfc, fw2_ref[...],
                           preferred_element_type=jnp.float32) + fb2_ref[...])
    hfc = jnp.tanh(jnp.dot(hfc, fw3_ref[...],
                           preferred_element_type=jnp.float32) + fb3_ref[...])
    y = jnp.dot(hfc, fwo_ref[...], preferred_element_type=jnp.float32) + fbo_ref[...]
    o_ref[...] = y.reshape(o_ref.shape)


# -----------------------------------------------------------------------------
# Wrapper: parameter re-layout + single pallas_call
# -----------------------------------------------------------------------------
def _replicated_spec(shape):
    zeros = (0,) * len(shape)
    return pl.BlockSpec(shape, lambda b: zeros)


def neuralnet_forward(x_nchw, params):
    """Forward pass equivalent to NeuralNet.forward (eval mode)."""
    B, Cin, H, W = x_nchw.shape
    assert H % 4 == 0 and W % 4 == 0, "two 2x2 pools require H, W divisible by 4"
    C1 = params['conv1_w'].shape[0]
    C2 = params['conv2_w'].shape[0]
    K = params['out_w'].shape[0]
    H2, W2 = H // 2, W // 2
    H4, W4 = H // 4, W // 4

    # NCHW -> NHWC + zero padding for conv1 (tiny, fused XLA prep on an 8 KiB tensor)
    x_nhwc = jnp.transpose(x_nchw, (0, 2, 3, 1))
    x_pad = jnp.pad(x_nhwc, ((0, 0), (1, 1), (1, 1), (0, 0)))

    # conv weights in tap-major (kh, kw, cin, cout) layout
    cw1 = jnp.transpose(params['conv1_w'], (2, 3, 1, 0))
    cb1 = params['conv1_b'].reshape(1, C1)
    cw2 = jnp.transpose(params['conv2_w'], (2, 3, 1, 0))
    cb2 = params['conv2_b'].reshape(1, C2)

    # Fold PyTorch's NCHW flatten (c, h, w) into fc1's weight: reorder its columns so it
    # consumes the NHWC-ordered (h, w, c) activation the kernel produces.
    n1 = params['fc1_w'].shape[0]
    fw1 = params['fc1_w'].reshape(n1, C2, H4, W4)
    fw1 = jnp.transpose(fw1, (0, 2, 3, 1)).reshape(n1, H4 * W4 * C2).T    # (H4*W4*C2, n1)
    fb1 = params['fc1_b'].reshape(1, -1)
    fw2 = params['fc2_w'].T
    fb2 = params['fc2_b'].reshape(1, -1)
    fw3 = params['fc3_w'].T
    fb3 = params['fc3_b'].reshape(1, -1)
    fwo = params['out_w'].T
    fbo = params['out_b'].reshape(1, -1)

    out = pl.pallas_call(
        neuralnet_kernel,
        out_shape=jax.ShapeDtypeStruct((B, 1, K), jnp.float32),
        grid=(B,),
        in_specs=[
            pl.BlockSpec((1, H + 2, W + 2, Cin), lambda b: (b, 0, 0, 0)),
            _replicated_spec(cw1.shape), _replicated_spec(cb1.shape),
            _replicated_spec(cw2.shape), _replicated_spec(cb2.shape),
            _replicated_spec(fw1.shape), _replicated_spec(fb1.shape),
            _replicated_spec(fw2.shape), _replicated_spec(fb2.shape),
            _replicated_spec(fw3.shape), _replicated_spec(fb3.shape),
            _replicated_spec(fwo.shape), _replicated_spec(fbo.shape),
        ],
        out_specs=pl.BlockSpec((1, 1, K), lambda b: (b, 0, 0)),
        scratch_shapes=[pltpu.VMEM((1, H2 + 2, W2 + 2, C1), jnp.float32)],
        compiler_params=pltpu.CompilerParams(
            dimension_semantics=("parallel",)),
    )(x_pad, cw1, cb1, cw2, cb2, fw1, fb1, fw2, fb2, fw3, fb3, fwo, fbo)
    return out.reshape(B, K)


# -----------------------------------------------------------------------------
# Pure-JAX reference (for a loose numerical self-check)
# -----------------------------------------------------------------------------
def reference_forward(x, params):
    dn = ('NCHW', 'OIHW', 'NCHW')

    def block(y, wk, bk):
        y = jax.lax.conv_general_dilated(y, wk, window_strides=(1, 1),
                                         padding=((1, 1), (1, 1)),
                                         dimension_numbers=dn)
        y = jnp.maximum(y + bk[None, :, None, None], 0.0)
        b, c, h, w = y.shape
        return y.reshape(b, c, h // 2, 2, w // 2, 2).max(axis=(3, 5))

    y = block(x, params['conv1_w'], params['conv1_b'])
    y = block(y, params['conv2_w'], params['conv2_b'])
    y = y.reshape(y.shape[0], -1)
    y = jnp.tanh(y @ params['fc1_w'].T + params['fc1_b'])
    y = jnp.tanh(y @ params['fc2_w'].T + params['fc2_b'])
    y = jnp.tanh(y @ params['fc3_w'].T + params['fc3_b'])
    return y @ params['out_w'].T + params['out_b']


# -----------------------------------------------------------------------------
# Deterministic parameter construction (synthetic, PyTorch-shaped)
# -----------------------------------------------------------------------------
def init_params(key, C1, H1, W1, K, widths):
    ks = jax.random.split(key, 12)

    def u(k, shape, fan_in):
        bound = 1.0 / np.sqrt(fan_in)
        return jax.random.uniform(k, shape, jnp.float32, -bound, bound)

    flat_feats = int(H1 // 4 * (W1 // 4) * widths[1])
    return {
        'conv1_w': u(ks[0], (widths[1], widths[0], 3, 3), widths[0] * 9),
        'conv1_b': u(ks[1], (widths[1],), widths[0] * 9),
        'conv2_w': u(ks[2], (widths[1], widths[1], 3, 3), widths[1] * 9),
        'conv2_b': u(ks[3], (widths[1],), widths[1] * 9),
        'fc1_w':   u(ks[4], (widths[2], flat_feats), flat_feats),
        'fc1_b':   u(ks[5], (widths[2],), flat_feats),
        'fc2_w':   u(ks[6], (widths[3], widths[2]), widths[2]),
        'fc2_b':   u(ks[7], (widths[3],), widths[2]),
        'fc3_w':   u(ks[8], (widths[4], widths[3]), widths[3]),
        'fc3_b':   u(ks[9], (widths[4],), widths[3]),
        'out_w':   u(ks[10], (K, widths[4]), widths[4]),
        'out_b':   u(ks[11], (K,), widths[4]),
    }


# -----------------------------------------------------------------------------
if __name__ == "__main__":
    B, C1, H1, W1, K = 2, 4, 16, 16, 10
    widths = [C1, 32, 32, 16, 16]

    key = jax.random.PRNGKey(0)
    k_x, k_p = jax.random.split(key)
    x = jax.random.normal(k_x, (B, C1, H1, W1), dtype=jnp.float32)  # NCHW like PyTorch
    params = init_params(k_p, C1, H1, W1, K, widths)

    fwd = jax.jit(lambda xx: neuralnet_forward(xx, params))
    out = fwd(x)
    jax.block_until_ready(out)
    assert out.shape == (B, K) and out.dtype == jnp.float32

    ref = reference_forward(x, params)
    err = np.abs(np.asarray(out) - np.asarray(ref)).max()
    assert np.allclose(np.asarray(out), np.asarray(ref), rtol=5e-2, atol=5e-2), err

    print("KERNEL_OK")
</pallas_src>

<mosaic_0001>
module attributes {stable_mosaic.version = 11 : i64} {
  func.func @neuralnet_kernel(%arg0: i32, %arg1: memref<1x18x18x4xf32, #tpu.memory_space<vmem>>, %arg2: memref<3x3x4x32xf32, #tpu.memory_space<vmem>>, %arg3: memref<1x32xf32, #tpu.memory_space<vmem>>, %arg4: memref<3x3x32x32xf32, #tpu.memory_space<vmem>>, %arg5: memref<1x32xf32, #tpu.memory_space<vmem>>, %arg6: memref<512x32xf32, #tpu.memory_space<vmem>>, %arg7: memref<1x32xf32, #tpu.memory_space<vmem>>, %arg8: memref<32x16xf32, #tpu.memory_space<vmem>>, %arg9: memref<1x16xf32, #tpu.memory_space<vmem>>, %arg10: memref<16x16xf32, #tpu.memory_space<vmem>>, %arg11: memref<1x16xf32, #tpu.memory_space<vmem>>, %arg12: memref<16x10xf32, #tpu.memory_space<vmem>>, %arg13: memref<1x10xf32, #tpu.memory_space<vmem>>, %arg14: memref<1x1x10xf32, #tpu.memory_space<vmem>>, %arg15: memref<1x10x10x32xf32, #tpu.memory_space<vmem>>) attributes {dimension_semantics = [#tpu.dimension_semantics<parallel>], iteration_bounds = array<i64: 2>, scalar_prefetch = 0 : i64, scratch_operands = 1 : i64, tpu.core_type = #tpu.core_type<tc>, window_params = [{transform_indices = @transform_0, window_bounds = array<i64: 1, 18, 18, 4>}, {pipeline_mode = #tpu.pipeline_mode<synchronous>, transform_indices = @transform_1, window_bounds = array<i64: 3, 3, 4, 32>}, {pipeline_mode = #tpu.pipeline_mode<synchronous>, transform_indices = @transform_2, window_bounds = array<i64: 1, 32>}, {pipeline_mode = #tpu.pipeline_mode<synchronous>, transform_indices = @transform_3, window_bounds = array<i64: 3, 3, 32, 32>}, {pipeline_mode = #tpu.pipeline_mode<synchronous>, transform_indices = @transform_4, window_bounds = array<i64: 1, 32>}, {pipeline_mode = #tpu.pipeline_mode<synchronous>, transform_indices = @transform_5, window_bounds = array<i64: 512, 32>}, {pipeline_mode = #tpu.pipeline_mode<synchronous>, transform_indices = @transform_6, window_bounds = array<i64: 1, 32>}, {pipeline_mode = #tpu.pipeline_mode<synchronous>, transform_indices = @transform_7, window_bounds = array<i64: 32, 16>}, {pipeline_mode = #tpu.pipeline_mode<synchronous>, transform_indices = @transform_8, window_bounds = array<i64: 1, 16>}, {pipeline_mode = #tpu.pipeline_mode<synchronous>, transform_indices = @transform_9, window_bounds = array<i64: 16, 16>}, {pipeline_mode = #tpu.pipeline_mode<synchronous>, transform_indices = @transform_10, window_bounds = array<i64: 1, 16>}, {pipeline_mode = #tpu.pipeline_mode<synchronous>, transform_indices = @transform_11, window_bounds = array<i64: 16, 10>}, {pipeline_mode = #tpu.pipeline_mode<synchronous>, transform_indices = @transform_12, window_bounds = array<i64: 1, 10>}, {transform_indices = @transform_13, window_bounds = array<i64: 1, 1, 10>}]} {
    %c0 = arith.constant 0 : index
    %c0_0 = arith.constant 0 : index
    %c0_1 = arith.constant 0 : index
    %c0_2 = arith.constant 0 : index
    %0 = vector.load %arg1[%c0, %c0_0, %c0_1, %c0_2] : memref<1x18x18x4xf32, #tpu.memory_space<vmem>>, vector<1x18x18x4xf32>
    %c0_3 = arith.constant 0 : index
    %c0_4 = arith.constant 0 : index
    %c0_5 = arith.constant 0 : index
    %c0_6 = arith.constant 0 : index
    %1 = vector.load %arg2[%c0_3, %c0_4, %c0_5, %c0_6] : memref<3x3x4x32xf32, #tpu.memory_space<vmem>>, vector<3x3x4x32xf32>
    %c0_7 = arith.constant 0 : index
    %c0_8 = arith.constant 0 : index
    %2 = vector.load %arg3[%c0_7, %c0_8] : memref<1x32xf32, #tpu.memory_space<vmem>>, vector<1x32xf32>
    %cst = arith.constant 0.000000e+00 : f32
    %3 = vector.broadcast %cst : f32 to vector<256x32xf32>
    %4 = vector.extract_strided_slice %0 {offsets = [0, 0, 0, 0], sizes = [1, 16, 16, 4], strides = [1, 1, 1, 1]} : vector<1x18x18x4xf32> to vector<1x16x16x4xf32>
    %5 = vector.shape_cast %4 : vector<1x16x16x4xf32> to vector<256x4xf32>
    %6 = vector.extract_strided_slice %1 {offsets = [0, 0, 0, 0], sizes = [1, 1, 4, 32], strides = [1, 1, 1, 1]} : vector<3x3x4x32xf32> to vector<1x1x4x32xf32>
    %7 = vector.shape_cast %6 : vector<1x1x4x32xf32> to vector<4x32xf32>
    %cst_9 = arith.constant dense<0.000000e+00> : vector<256x32xf32>
    %8 = tpu.matmul %5, %7, %cst_9 {dimension_numbers = #tpu.dot_dimension_numbers<[1], [0], [0], [1], [0, 0, 1, 1], [], []>} : vector<256x4xf32>, vector<4x32xf32>, vector<256x32xf32> -> vector<256x32xf32>
    %9 = arith.addf %3, %8 : vector<256x32xf32>
    %10 = vector.extract_strided_slice %0 {offsets = [0, 0, 1, 0], sizes = [1, 16, 16, 4], strides = [1, 1, 1, 1]} : vector<1x18x18x4xf32> to vector<1x16x16x4xf32>
    %11 = vector.shape_cast %10 : vector<1x16x16x4xf32> to vector<256x4xf32>
    %12 = vector.extract_strided_slice %1 {offsets = [0, 1, 0, 0], sizes = [1, 1, 4, 32], strides = [1, 1, 1, 1]} : vector<3x3x4x32xf32> to vector<1x1x4x32xf32>
    %13 = vector.shape_cast %12 : vector<1x1x4x32xf32> to vector<4x32xf32>
    %cst_10 = arith.constant dense<0.000000e+00> : vector<256x32xf32>
    %14 = tpu.matmul %11, %13, %cst_10 {dimension_numbers = #tpu.dot_dimension_numbers<[1], [0], [0], [1], [0, 0, 1, 1], [], []>} : vector<256x4xf32>, vector<4x32xf32>, vector<256x32xf32> -> vector<256x32xf32>
    %15 = arith.addf %9, %14 : vector<256x32xf32>
    %16 = vector.extract_strided_slice %0 {offsets = [0, 0, 2, 0], sizes = [1, 16, 16, 4], strides = [1, 1, 1, 1]} : vector<1x18x18x4xf32> to vector<1x16x16x4xf32>
    %17 = vector.shape_cast %16 : vector<1x16x16x4xf32> to vector<256x4xf32>
    %18 = vector.extract_strided_slice %1 {offsets = [0, 2, 0, 0], sizes = [1, 1, 4, 32], strides = [1, 1, 1, 1]} : vector<3x3x4x32xf32> to vector<1x1x4x32xf32>
    %19 = vector.shape_cast %18 : vector<1x1x4x32xf32> to vector<4x32xf32>
    %cst_11 = arith.constant dense<0.000000e+00> : vector<256x32xf32>
    %20 = tpu.matmul %17, %19, %cst_11 {dimension_numbers = #tpu.dot_dimension_numbers<[1], [0], [0], [1], [0, 0, 1, 1], [], []>} : vector<256x4xf32>, vector<4x32xf32>, vector<256x32xf32> -> vector<256x32xf32>
    %21 = arith.addf %15, %20 : vector<256x32xf32>
    %22 = vector.extract_strided_slice %0 {offsets = [0, 1, 0, 0], sizes = [1, 16, 16, 4], strides = [1, 1, 1, 1]} : vector<1x18x18x4xf32> to vector<1x16x16x4xf32>
    %23 = vector.shape_cast %22 : vector<1x16x16x4xf32> to vector<256x4xf32>
    %24 = vector.extract_strided_slice %1 {offsets = [1, 0, 0, 0], sizes = [1, 1, 4, 32], strides = [1, 1, 1, 1]} : vector<3x3x4x32xf32> to vector<1x1x4x32xf32>
    %25 = vector.shape_cast %24 : vector<1x1x4x32xf32> to vector<4x32xf32>
    %cst_12 = arith.constant dense<0.000000e+00> : vector<256x32xf32>
    %26 = tpu.matmul %23, %25, %cst_12 {dimension_numbers = #tpu.dot_dimension_numbers<[1], [0], [0], [1], [0, 0, 1, 1], [], []>} : vector<256x4xf32>, vector<4x32xf32>, vector<256x32xf32> -> vector<256x32xf32>
    %27 = arith.addf %21, %26 : vector<256x32xf32>
    %28 = vector.extract_strided_slice %0 {offsets = [0, 1, 1, 0], sizes = [1, 16, 16, 4], strides = [1, 1, 1, 1]} : vector<1x18x18x4xf32> to vector<1x16x16x4xf32>
    %29 = vector.shape_cast %28 : vector<1x16x16x4xf32> to vector<256x4xf32>
    %30 = vector.extract_strided_slice %1 {offsets = [1, 1, 0, 0], sizes = [1, 1, 4, 32], strides = [1, 1, 1, 1]} : vector<3x3x4x32xf32> to vector<1x1x4x32xf32>
    %31 = vector.shape_cast %30 : vector<1x1x4x32xf32> to vector<4x32xf32>
    %cst_13 = arith.constant dense<0.000000e+00> : vector<256x32xf32>
    %32 = tpu.matmul %29, %31, %cst_13 {dimension_numbers = #tpu.dot_dimension_numbers<[1], [0], [0], [1], [0, 0, 1, 1], [], []>} : vector<256x4xf32>, vector<4x32xf32>, vector<256x32xf32> -> vector<256x32xf32>
    %33 = arith.addf %27, %32 : vector<256x32xf32>
    %34 = vector.extract_strided_slice %0 {offsets = [0, 1, 2, 0], sizes = [1, 16, 16, 4], strides = [1, 1, 1, 1]} : vector<1x18x18x4xf32> to vector<1x16x16x4xf32>
    %35 = vector.shape_cast %34 : vector<1x16x16x4xf32> to vector<256x4xf32>
    %36 = vector.extract_strided_slice %1 {offsets = [1, 2, 0, 0], sizes = [1, 1, 4, 32], strides = [1, 1, 1, 1]} : vector<3x3x4x32xf32> to vector<1x1x4x32xf32>
    %37 = vector.shape_cast %36 : vector<1x1x4x32xf32> to vector<4x32xf32>
    %cst_14 = arith.constant dense<0.000000e+00> : vector<256x32xf32>
    %38 = tpu.matmul %35, %37, %cst_14 {dimension_numbers = #tpu.dot_dimension_numbers<[1], [0], [0], [1], [0, 0, 1, 1], [], []>} : vector<256x4xf32>, vector<4x32xf32>, vector<256x32xf32> -> vector<256x32xf32>
    %39 = arith.addf %33, %38 : vector<256x32xf32>
    %40 = vector.extract_strided_slice %0 {offsets = [0, 2, 0, 0], sizes = [1, 16, 16, 4], strides = [1, 1, 1, 1]} : vector<1x18x18x4xf32> to vector<1x16x16x4xf32>
    %41 = vector.shape_cast %40 : vector<1x16x16x4xf32> to vector<256x4xf32>
    %42 = vector.extract_strided_slice %1 {offsets = [2, 0, 0, 0], sizes = [1, 1, 4, 32], strides = [1, 1, 1, 1]} : vector<3x3x4x32xf32> to vector<1x1x4x32xf32>
    %43 = vector.shape_cast %42 : vector<1x1x4x32xf32> to vector<4x32xf32>
    %cst_15 = arith.constant dense<0.000000e+00> : vector<256x32xf32>
    %44 = tpu.matmul %41, %43, %cst_15 {dimension_numbers = #tpu.dot_dimension_numbers<[1], [0], [0], [1], [0, 0, 1, 1], [], []>} : vector<256x4xf32>, vector<4x32xf32>, vector<256x32xf32> -> vector<256x32xf32>
    %45 = arith.addf %39, %44 : vector<256x32xf32>
    %46 = vector.extract_strided_slice %0 {offsets = [0, 2, 1, 0], sizes = [1, 16, 16, 4], strides = [1, 1, 1, 1]} : vector<1x18x18x4xf32> to vector<1x16x16x4xf32>
    %47 = vector.shape_cast %46 : vector<1x16x16x4xf32> to vector<256x4xf32>
    %48 = vector.extract_strided_slice %1 {offsets = [2, 1, 0, 0], sizes = [1, 1, 4, 32], strides = [1, 1, 1, 1]} : vector<3x3x4x32xf32> to vector<1x1x4x32xf32>
    %49 = vector.shape_cast %48 : vector<1x1x4x32xf32> to vector<4x32xf32>
    %cst_16 = arith.constant dense<0.000000e+00> : vector<256x32xf32>
    %50 = tpu.matmul %47, %49, %cst_16 {dimension_numbers = #tpu.dot_dimension_numbers<[1], [0], [0], [1], [0, 0, 1, 1], [], []>} : vector<256x4xf32>, vector<4x32xf32>, vector<256x32xf32> -> vector<256x32xf32>
    %51 = arith.addf %45, %50 : vector<256x32xf32>
    %52 = vector.extract_strided_slice %0 {offsets = [0, 2, 2, 0], sizes = [1, 16, 16, 4], strides = [1, 1, 1, 1]} : vector<1x18x18x4xf32> to vector<1x16x16x4xf32>
    %53 = vector.shape_cast %52 : vector<1x16x16x4xf32> to vector<256x4xf32>
    %54 = vector.extract_strided_slice %1 {offsets = [2, 2, 0, 0], sizes = [1, 1, 4, 32], strides = [1, 1, 1, 1]} : vector<3x3x4x32xf32> to vector<1x1x4x32xf32>
    %55 = vector.shape_cast %54 : vector<1x1x4x32xf32> to vector<4x32xf32>
    %cst_17 = arith.constant dense<0.000000e+00> : vector<256x32xf32>
    %56 = tpu.matmul %53, %55, %cst_17 {dimension_numbers = #tpu.dot_dimension_numbers<[1], [0], [0], [1], [0, 0, 1, 1], [], []>} : vector<256x4xf32>, vector<4x32xf32>, vector<256x32xf32> -> vector<256x32xf32>
    %57 = arith.addf %51, %56 : vector<256x32xf32>
    %58 = vector.broadcast %2 : vector<1x32xf32> to vector<256x32xf32>
    %59 = arith.addf %57, %58 : vector<256x32xf32>
    %cst_18 = arith.constant 0.000000e+00 : f32
    %60 = vector.broadcast %cst_18 : f32 to vector<256x32xf32>
    %61 = arith.maximumf %59, %60 : vector<256x32xf32>
    %62 = vector.shape_cast %61 : vector<256x32xf32> to vector<1x8x2x16x32xf32>
    %63 = vector.extract_strided_slice %62 {offsets = [0, 0, 0, 0, 0], sizes = [1, 8, 1, 16, 32], strides = [1, 1, 1, 1, 1]} : vector<1x8x2x16x32xf32> to vector<1x8x1x16x32xf32>
    %64 = vector.shape_cast %63 : vector<1x8x1x16x32xf32> to vector<1x8x16x32xf32>
    %65 = vector.extract_strided_slice %62 {offsets = [0, 0, 1, 0, 0], sizes = [1, 8, 1, 16, 32], strides = [1, 1, 1, 1, 1]} : vector<1x8x2x16x32xf32> to vector<1x8x1x16x32xf32>
    %66 = vector.shape_cast %65 : vector<1x8x1x16x32xf32> to vector<1x8x16x32xf32>
    %67 = arith.maximumf %64, %66 : vector<1x8x16x32xf32>
    %68 = vector.shape_cast %67 : vector<1x8x16x32xf32> to vector<128x32xf32>
    %69 = tpu.iota {dimensions = array<i32: 0>} : vector<64x128xi32>
    %70 = tpu.iota {dimensions = array<i32: 1>} : vector<64x128xi32>
    %c2_i32 = arith.constant 2 : i32
    %71 = vector.broadcast %c2_i32 : i32 to vector<64x128xi32>
    %72 = arith.muli %71, %69 : vector<64x128xi32>
    %73 = arith.cmpi eq, %70, %72 : vector<64x128xi32>
    %74 = arith.extui %73 : vector<64x128xi1> to vector<64x128xi32>
    %75 = arith.sitofp %74 : vector<64x128xi32> to vector<64x128xf32>
    %c2_i32_19 = arith.constant 2 : i32
    %76 = vector.broadcast %c2_i32_19 : i32 to vector<64x128xi32>
    %77 = arith.muli %76, %69 : vector<64x128xi32>
    %c1_i32 = arith.constant 1 : i32
    %78 = vector.broadcast %c1_i32 : i32 to vector<64x128xi32>
    %79 = arith.addi %77, %78 : vector<64x128xi32>
    %80 = arith.cmpi eq, %70, %79 : vector<64x128xi32>
    %81 = arith.extui %80 : vector<64x128xi1> to vector<64x128xi32>
    %82 = arith.sitofp %81 : vector<64x128xi32> to vector<64x128xf32>
    %cst_20 = arith.constant dense<0.000000e+00> : vector<64x32xf32>
    %83 = tpu.matmul %75, %68, %cst_20 {dimension_numbers = #tpu.dot_dimension_numbers<[1], [0], [0], [1], [0, 0, 1, 1], [], []>} : vector<64x128xf32>, vector<128x32xf32>, vector<64x32xf32> -> vector<64x32xf32>
    %cst_21 = arith.constant dense<0.000000e+00> : vector<64x32xf32>
    %84 = tpu.matmul %82, %68, %cst_21 {dimension_numbers = #tpu.dot_dimension_numbers<[1], [0], [0], [1], [0, 0, 1, 1], [], []>} : vector<64x128xf32>, vector<128x32xf32>, vector<64x32xf32> -> vector<64x32xf32>
    %85 = arith.maximumf %83, %84 : vector<64x32xf32>
    %cst_22 = arith.constant 0.000000e+00 : f32
    %86 = vector.broadcast %cst_22 : f32 to vector<1x10x10x32xf32>
    %c0_23 = arith.constant 0 : index
    %c0_24 = arith.constant 0 : index
    %c0_25 = arith.constant 0 : index
    %c0_26 = arith.constant 0 : index
    %87 = vector.load %arg15[%c0_23, %c0_24, %c0_25, %c0_26] : memref<1x10x10x32xf32, #tpu.memory_space<vmem>>, vector<1x10x10x32xf32>
    tpu.vector_store %arg15[%c0_23, %c0_24, %c0_25, %c0_26], %86 {strides = array<i32>} : memref<1x10x10x32xf32, #tpu.memory_space<vmem>>, vector<1x10x10x32xf32>,
    %88 = vector.shape_cast %85 : vector<64x32xf32> to vector<1x8x8x32xf32>
    %c0_27 = arith.constant 0 : index
    %c1 = arith.constant 1 : index
    %c1_28 = arith.constant 1 : index
    %c0_29 = arith.constant 0 : index
    %89 = vector.load %arg15[%c0_27, %c1, %c1_28, %c0_29] : memref<1x10x10x32xf32, #tpu.memory_space<vmem>>, vector<1x8x8x32xf32>
    tpu.vector_store %arg15[%c0_27, %c1, %c1_28, %c0_29], %88 {strides = array<i32>} : memref<1x10x10x32xf32, #tpu.memory_space<vmem>>, vector<1x8x8x32xf32>,
    %c0_30 = arith.constant 0 : index
    %c0_31 = arith.constant 0 : index
    %c0_32 = arith.constant 0 : index
    %c0_33 = arith.constant 0 : index
    %90 = vector.load %arg15[%c0_30, %c0_31, %c0_32, %c0_33] : memref<1x10x10x32xf32, #tpu.memory_space<vmem>>, vector<1x10x10x32xf32>
    %c0_34 = arith.constant 0 : index
    %c0_35 = arith.constant 0 : index
    %c0_36 = arith.constant 0 : index
    %c0_37 = arith.constant 0 : index
    %91 = vector.load %arg4[%c0_34, %c0_35, %c0_36, %c0_37] : memref<3x3x32x32xf32, #tpu.memory_space<vmem>>, vector<3x3x32x32xf32>
    %c0_38 = arith.constant 0 : index
    %c0_39 = arith.constant 0 : index
    %92 = vector.load %arg5[%c0_38, %c0_39] : memref<1x32xf32, #tpu.memory_space<vmem>>, vector<1x32xf32>
    %cst_40 = arith.constant 0.000000e+00 : f32
    %93 = vector.broadcast %cst_40 : f32 to vector<64x32xf32>
    %94 = vector.extract_strided_slice %90 {offsets = [0, 0, 0, 0], sizes = [1, 8, 8, 32], strides = [1, 1, 1, 1]} : vector<1x10x10x32xf32> to vector<1x8x8x32xf32>
    %95 = vector.shape_cast %94 : vector<1x8x8x32xf32> to vector<64x32xf32>
    %96 = vector.extract_strided_slice %91 {offsets = [0, 0, 0, 0], sizes = [1, 1, 32, 32], strides = [1, 1, 1, 1]} : vector<3x3x32x32xf32> to vector<1x1x32x32xf32>
    %97 = vector.shape_cast %96 : vector<1x1x32x32xf32> to vector<32x32xf32>
    %cst_41 = arith.constant dense<0.000000e+00> : vector<64x32xf32>
    %98 = tpu.matmul %95, %97, %cst_41 {dimension_numbers = #tpu.dot_dimension_numbers<[1], [0], [0], [1], [0, 0, 1, 1], [], []>} : vector<64x32xf32>, vector<32x32xf32>, vector<64x32xf32> -> vector<64x32xf32>
    %99 = arith.addf %93, %98 : vector<64x32xf32>
    %100 = vector.extract_strided_slice %90 {offsets = [0, 0, 1, 0], sizes = [1, 8, 8, 32], strides = [1, 1, 1, 1]} : vector<1x10x10x32xf32> to vector<1x8x8x32xf32>
    %101 = vector.shape_cast %100 : vector<1x8x8x32xf32> to vector<64x32xf32>
    %102 = vector.extract_strided_slice %91 {offsets = [0, 1, 0, 0], sizes = [1, 1, 32, 32], strides = [1, 1, 1, 1]} : vector<3x3x32x32xf32> to vector<1x1x32x32xf32>
    %103 = vector.shape_cast %102 : vector<1x1x32x32xf32> to vector<32x32xf32>
    %cst_42 = arith.constant dense<0.000000e+00> : vector<64x32xf32>
    %104 = tpu.matmul %101, %103, %cst_42 {dimension_numbers = #tpu.dot_dimension_numbers<[1], [0], [0], [1], [0, 0, 1, 1], [], []>} : vector<64x32xf32>, vector<32x32xf32>, vector<64x32xf32> -> vector<64x32xf32>
    %105 = arith.addf %99, %104 : vector<64x32xf32>
    %106 = vector.extract_strided_slice %90 {offsets = [0, 0, 2, 0], sizes = [1, 8, 8, 32], strides = [1, 1, 1, 1]} : vector<1x10x10x32xf32> to vector<1x8x8x32xf32>
    %107 = vector.shape_cast %106 : vector<1x8x8x32xf32> to vector<64x32xf32>
    %108 = vector.extract_strided_slice %91 {offsets = [0, 2, 0, 0], sizes = [1, 1, 32, 32], strides = [1, 1, 1, 1]} : vector<3x3x32x32xf32> to vector<1x1x32x32xf32>
    %109 = vector.shape_cast %108 : vector<1x1x32x32xf32> to vector<32x32xf32>
    %cst_43 = arith.constant dense<0.000000e+00> : vector<64x32xf32>
    %110 = tpu.matmul %107, %109, %cst_43 {dimension_numbers = #tpu.dot_dimension_numbers<[1], [0], [0], [1], [0, 0, 1, 1], [], []>} : vector<64x32xf32>, vector<32x32xf32>, vector<64x32xf32> -> vector<64x32xf32>
    %111 = arith.addf %105, %110 : vector<64x32xf32>
    %112 = vector.extract_strided_slice %90 {offsets = [0, 1, 0, 0], sizes = [1, 8, 8, 32], strides = [1, 1, 1, 1]} : vector<1x10x10x32xf32> to vector<1x8x8x32xf32>
    %113 = vector.shape_cast %112 : vector<1x8x8x32xf32> to vector<64x32xf32>
    %114 = vector.extract_strided_slice %91 {offsets = [1, 0, 0, 0], sizes = [1, 1, 32, 32], strides = [1, 1, 1, 1]} : vector<3x3x32x32xf32> to vector<1x1x32x32xf32>
    %115 = vector.shape_cast %114 : vector<1x1x32x32xf32> to vector<32x32xf32>
    %cst_44 = arith.constant dense<0.000000e+00> : vector<64x32xf32>
    %116 = tpu.matmul %113, %115, %cst_44 {dimension_numbers = #tpu.dot_dimension_numbers<[1], [0], [0], [1], [0, 0, 1, 1], [], []>} : vector<64x32xf32>, vector<32x32xf32>, vector<64x32xf32> -> vector<64x32xf32>
    %117 = arith.addf %111, %116 : vector<64x32xf32>
    %118 = vector.extract_strided_slice %90 {offsets = [0, 1, 1, 0], sizes = [1, 8, 8, 32], strides = [1, 1, 1, 1]} : vector<1x10x10x32xf32> to vector<1x8x8x32xf32>
    %119 = vector.shape_cast %118 : vector<1x8x8x32xf32> to vector<64x32xf32>
    %120 = vector.extract_strided_slice %91 {offsets = [1, 1, 0, 0], sizes = [1, 1, 32, 32], strides = [1, 1, 1, 1]} : vector<3x3x32x32xf32> to vector<1x1x32x32xf32>
    %121 = vector.shape_cast %120 : vector<1x1x32x32xf32> to vector<32x32xf32>
    %cst_45 = arith.constant dense<0.000000e+00> : vector<64x32xf32>
    %122 = tpu.matmul %119, %121, %cst_45 {dimension_numbers = #tpu.dot_dimension_numbers<[1], [0], [0], [1], [0, 0, 1, 1], [], []>} : vector<64x32xf32>, vector<32x32xf32>, vector<64x32xf32> -> vector<64x32xf32>
    %123 = arith.addf %117, %122 : vector<64x32xf32>
    %124 = vector.extract_strided_slice %90 {offsets = [0, 1, 2, 0], sizes = [1, 8, 8, 32], strides = [1, 1, 1, 1]} : vector<1x10x10x32xf32> to vector<1x8x8x32xf32>
    %125 = vector.shape_cast %124 : vector<1x8x8x32xf32> to vector<64x32xf32>
    %126 = vector.extract_strided_slice %91 {offsets = [1, 2, 0, 0], sizes = [1, 1, 32, 32], strides = [1, 1, 1, 1]} : vector<3x3x32x32xf32> to vector<1x1x32x32xf32>
    %127 = vector.shape_cast %126 : vector<1x1x32x32xf32> to vector<32x32xf32>
    %cst_46 = arith.constant dense<0.000000e+00> : vector<64x32xf32>
    %128 = tpu.matmul %125, %127, %cst_46 {dimension_numbers = #tpu.dot_dimension_numbers<[1], [0], [0], [1], [0, 0, 1, 1], [], []>} : vector<64x32xf32>, vector<32x32xf32>, vector<64x32xf32> -> vector<64x32xf32>
    %129 = arith.addf %123, %128 : vector<64x32xf32>
    %130 = vector.extract_strided_slice %90 {offsets = [0, 2, 0, 0], sizes = [1, 8, 8, 32], strides = [1, 1, 1, 1]} : vector<1x10x10x32xf32> to vector<1x8x8x32xf32>
    %131 = vector.shape_cast %130 : vector<1x8x8x32xf32> to vector<64x32xf32>
    %132 = vector.extract_strided_slice %91 {offsets = [2, 0, 0, 0], sizes = [1, 1, 32, 32], strides = [1, 1, 1, 1]} : vector<3x3x32x32xf32> to vector<1x1x32x32xf32>
    %133 = vector.shape_cast %132 : vector<1x1x32x32xf32> to vector<32x32xf32>
    %cst_47 = arith.constant dense<0.000000e+00> : vector<64x32xf32>
    %134 = tpu.matmul %131, %133, %cst_47 {dimension_numbers = #tpu.dot_dimension_numbers<[1], [0], [0], [1], [0, 0, 1, 1], [], []>} : vector<64x32xf32>, vector<32x32xf32>, vector<64x32xf32> -> vector<64x32xf32>
    %135 = arith.addf %129, %134 : vector<64x32xf32>
    %136 = vector.extract_strided_slice %90 {offsets = [0, 2, 1, 0], sizes = [1, 8, 8, 32], strides = [1, 1, 1, 1]} : vector<1x10x10x32xf32> to vector<1x8x8x32xf32>
    %137 = vector.shape_cast %136 : vector<1x8x8x32xf32> to vector<64x32xf32>
    %138 = vector.extract_strided_slice %91 {offsets = [2, 1, 0, 0], sizes = [1, 1, 32, 32], strides = [1, 1, 1, 1]} : vector<3x3x32x32xf32> to vector<1x1x32x32xf32>
    %139 = vector.shape_cast %138 : vector<1x1x32x32xf32> to vector<32x32xf32>
    %cst_48 = arith.constant dense<0.000000e+00> : vector<64x32xf32>
    %140 = tpu.matmul %137, %139, %cst_48 {dimension_numbers = #tpu.dot_dimension_numbers<[1], [0], [0], [1], [0, 0, 1, 1], [], []>} : vector<64x32xf32>, vector<32x32xf32>, vector<64x32xf32> -> vector<64x32xf32>
    %141 = arith.addf %135, %140 : vector<64x32xf32>
    %142 = vector.extract_strided_slice %90 {offsets = [0, 2, 2, 0], sizes = [1, 8, 8, 32], strides = [1, 1, 1, 1]} : vector<1x10x10x32xf32> to vector<1x8x8x32xf32>
    %143 = vector.shape_cast %142 : vector<1x8x8x32xf32> to vector<64x32xf32>
    %144 = vector.extract_strided_slice %91 {offsets = [2, 2, 0, 0], sizes = [1, 1, 32, 32], strides = [1, 1, 1, 1]} : vector<3x3x32x32xf32> to vector<1x1x32x32xf32>
    %145 = vector.shape_cast %144 : vector<1x1x32x32xf32> to vector<32x32xf32>
    %cst_49 = arith.constant dense<0.000000e+00> : vector<64x32xf32>
    %146 = tpu.matmul %143, %145, %cst_49 {dimension_numbers = #tpu.dot_dimension_numbers<[1], [0], [0], [1], [0, 0, 1, 1], [], []>} : vector<64x32xf32>, vector<32x32xf32>, vector<64x32xf32> -> vector<64x32xf32>
    %147 = arith.addf %141, %146 : vector<64x32xf32>
    %148 = vector.broadcast %92 : vector<1x32xf32> to vector<64x32xf32>
    %149 = arith.addf %147, %148 : vector<64x32xf32>
    %cst_50 = arith.constant 0.000000e+00 : f32
    %150 = vector.broadcast %cst_50 : f32 to vector<64x32xf32>
    %151 = arith.maximumf %149, %150 : vector<64x32xf32>
    %152 = vector.shape_cast %151 : vector<64x32xf32> to vector<1x4x2x8x32xf32>
    %153 = vector.extract_strided_slice %152 {offsets = [0, 0, 0, 0, 0], sizes = [1, 4, 1, 8, 32], strides = [1, 1, 1, 1, 1]} : vector<1x4x2x8x32xf32> to vector<1x4x1x8x32xf32>
    %154 = vector.shape_cast %153 : vector<1x4x1x8x32xf32> to vector<1x4x8x32xf32>
    %155 = vector.extract_strided_slice %152 {offsets = [0, 0, 1, 0, 0], sizes = [1, 4, 1, 8, 32], strides = [1, 1, 1, 1, 1]} : vector<1x4x2x8x32xf32> to vector<1x4x1x8x32xf32>
    %156 = vector.shape_cast %155 : vector<1x4x1x8x32xf32> to vector<1x4x8x32xf32>
    %157 = arith.maximumf %154, %156 : vector<1x4x8x32xf32>
    %158 = vector.shape_cast %157 : vector<1x4x8x32xf32> to vector<32x32xf32>
    %159 = tpu.iota {dimensions = array<i32: 0>} : vector<16x32xi32>
    %160 = tpu.iota {dimensions = array<i32: 1>} : vector<16x32xi32>
    %c2_i32_51 = arith.constant 2 : i32
    %161 = vector.broadcast %c2_i32_51 : i32 to vector<16x32xi32>
    %162 = arith.muli %161, %159 : vector<16x32xi32>
    %163 = arith.cmpi eq, %160, %162 : vector<16x32xi32>
    %164 = arith.extui %163 : vector<16x32xi1> to vector<16x32xi32>
    %165 = arith.sitofp %164 : vector<16x32xi32> to vector<16x32xf32>
    %c2_i32_52 = arith.constant 2 : i32
    %166 = vector.broadcast %c2_i32_52 : i32 to vector<16x32xi32>
    %167 = arith.muli %166, %159 : vector<16x32xi32>
    %c1_i32_53 = arith.constant 1 : i32
    %168 = vector.broadcast %c1_i32_53 : i32 to vector<16x32xi32>
    %169 = arith.addi %167, %168 : vector<16x32xi32>
    %170 = arith.cmpi eq, %160, %169 : vector<16x32xi32>
    %171 = arith.extui %170 : vector<16x32xi1> to vector<16x32xi32>
    %172 = arith.sitofp %171 : vector<16x32xi32> to vector<16x32xf32>
    %cst_54 = arith.constant dense<0.000000e+00> : vector<16x32xf32>
    %173 = tpu.matmul %165, %158, %cst_54 {dimension_numbers = #tpu.dot_dimension_numbers<[1], [0], [0], [1], [0, 0, 1, 1], [], []>} : vector<16x32xf32>, vector<32x32xf32>, vector<16x32xf32> -> vector<16x32xf32>
    %cst_55 = arith.constant dense<0.000000e+00> : vector<16x32xf32>
    %174 = tpu.matmul %172, %158, %cst_55 {dimension_numbers = #tpu.dot_dimension_numbers<[1], [0], [0], [1], [0, 0, 1, 1], [], []>} : vector<16x32xf32>, vector<32x32xf32>, vector<16x32xf32> -> vector<16x32xf32>
    %175 = arith.maximumf %173, %174 : vector<16x32xf32>
    %c0_56 = arith.constant 0 : index
    %c0_57 = arith.constant 0 : index
    %176 = vector.load %arg6[%c0_56, %c0_57] : memref<512x32xf32, #tpu.memory_space<vmem>>, vector<512x32xf32>
    %cst_58 = arith.constant 0.000000e+00 : f32
    %177 = vector.broadcast %cst_58 : f32 to vector<1x32xf32>
    %178 = vector.extract_strided_slice %175 {offsets = [0, 0], sizes = [1, 32], strides = [1, 1]} : vector<16x32xf32> to vector<1x32xf32>
    %179 = vector.extract_strided_slice %176 {offsets = [0, 0], sizes = [32, 32], strides = [1, 1]} : vector<512x32xf32> to vector<32x32xf32>
    %cst_59 = arith.constant dense<0.000000e+00> : vector<1x32xf32>
    %180 = tpu.matmul %178, %179, %cst_59 {dimension_numbers = #tpu.dot_dimension_numbers<[1], [0], [0], [1], [0, 0, 1, 1], [], []>} : vector<1x32xf32>, vector<32x32xf32>, vector<1x32xf32> -> vector<1x32xf32>
    %181 = arith.addf %177, %180 : vector<1x32xf32>
    %182 = vector.extract_strided_slice %175 {offsets = [1, 0], sizes = [1, 32], strides = [1, 1]} : vector<16x32xf32> to vector<1x32xf32>
    %183 = vector.extract_strided_slice %176 {offsets = [32, 0], sizes = [32, 32], strides = [1, 1]} : vector<512x32xf32> to vector<32x32xf32>
    %cst_60 = arith.constant dense<0.000000e+00> : vector<1x32xf32>
    %184 = tpu.matmul %182, %183, %cst_60 {dimension_numbers = #tpu.dot_dimension_numbers<[1], [0], [0], [1], [0, 0, 1, 1], [], []>} : vector<1x32xf32>, vector<32x32xf32>, vector<1x32xf32> -> vector<1x32xf32>
    %185 = arith.addf %181, %184 : vector<1x32xf32>
    %186 = vector.extract_strided_slice %175 {offsets = [2, 0], sizes = [1, 32], strides = [1, 1]} : vector<16x32xf32> to vector<1x32xf32>
    %187 = vector.extract_strided_slice %176 {offsets = [64, 0], sizes = [32, 32], strides = [1, 1]} : vector<512x32xf32> to vector<32x32xf32>
    %cst_61 = arith.constant dense<0.000000e+00> : vector<1x32xf32>
    %188 = tpu.matmul %186, %187, %cst_61 {dimension_numbers = #tpu.dot_dimension_numbers<[1], [0], [0], [1], [0, 0, 1, 1], [], []>} : vector<1x32xf32>, vector<32x32xf32>, vector<1x32xf32> -> vector<1x32xf32>
    %189 = arith.addf %185, %188 : vector<1x32xf32>
    %190 = vector.extract_strided_slice %175 {offsets = [3, 0], sizes = [1, 32], strides = [1, 1]} : vector<16x32xf32> to vector<1x32xf32>
    %191 = vector.extract_strided_slice %176 {offsets = [96, 0], sizes = [32, 32], strides = [1, 1]} : vector<512x32xf32> to vector<32x32xf32>
    %cst_62 = arith.constant dense<0.000000e+00> : vector<1x32xf32>
    %192 = tpu.matmul %190, %191, %cst_62 {dimension_numbers = #tpu.dot_dimension_numbers<[1], [0], [0], [1], [0, 0, 1, 1], [], []>} : vector<1x32xf32>, vector<32x32xf32>, vector<1x32xf32> -> vector<1x32xf32>
    %193 = arith.addf %189, %192 : vector<1x32xf32>
    %194 = vector.extract_strided_slice %175 {offsets = [4, 0], sizes = [1, 32], strides = [1, 1]} : vector<16x32xf32> to vector<1x32xf32>
    %195 = vector.extract_strided_slice %176 {offsets = [128, 0], sizes = [32, 32], strides = [1, 1]} : vector<512x32xf32> to vector<32x32xf32>
    %cst_63 = arith.constant dense<0.000000e+00> : vector<1x32xf32>
    %196 = tpu.matmul %194, %195, %cst_63 {dimension_numbers = #tpu.dot_dimension_numbers<[1], [0], [0], [1], [0, 0, 1, 1], [], []>} : vector<1x32xf32>, vector<32x32xf32>, vector<1x32xf32> -> vector<1x32xf32>
    %197 = arith.addf %193, %196 : vector<1x32xf32>
    %198 = vector.extract_strided_slice %175 {offsets = [5, 0], sizes = [1, 32], strides = [1, 1]} : vector<16x32xf32> to vector<1x32xf32>
    %199 = vector.extract_strided_slice %176 {offsets = [160, 0], sizes = [32, 32], strides = [1, 1]} : vector<512x32xf32> to vector<32x32xf32>
    %cst_64 = arith.constant dense<0.000000e+00> : vector<1x32xf32>
    %200 = tpu.matmul %198, %199, %cst_64 {dimension_numbers = #tpu.dot_dimension_numbers<[1], [0], [0], [1], [0, 0, 1, 1], [], []>} : vector<1x32xf32>, vector<32x32xf32>, vector<1x32xf32> -> vector<1x32xf32>
    %201 = arith.addf %197, %200 : vector<1x32xf32>
    %202 = vector.extract_strided_slice %175 {offsets = [6, 0], sizes = [1, 32], strides = [1, 1]} : vector<16x32xf32> to vector<1x32xf32>
    %203 = vector.extract_strided_slice %176 {offsets = [192, 0], sizes = [32, 32], strides = [1, 1]} : vector<512x32xf32> to vector<32x32xf32>
    %cst_65 = arith.constant dense<0.000000e+00> : vector<1x32xf32>
    %204 = tpu.matmul %202, %203, %cst_65 {dimension_numbers = #tpu.dot_dimension_numbers<[1], [0], [0], [1], [0, 0, 1, 1], [], []>} : vector<1x32xf32>, vector<32x32xf32>, vector<1x32xf32> -> vector<1x32xf32>
    %205 = arith.addf %201, %204 : vector<1x32xf32>
    %206 = vector.extract_strided_slice %175 {offsets = [7, 0], sizes = [1, 32], strides = [1, 1]} : vector<16x32xf32> to vector<1x32xf32>
    %207 = vector.extract_strided_slice %176 {offsets = [224, 0], sizes = [32, 32], strides = [1, 1]} : vector<512x32xf32> to vector<32x32xf32>
    %cst_66 = arith.constant dense<0.000000e+00> : vector<1x32xf32>
    %208 = tpu.matmul %206, %207, %cst_66 {dimension_numbers = #tpu.dot_dimension_numbers<[1], [0], [0], [1], [0, 0, 1, 1], [], []>} : vector<1x32xf32>, vector<32x32xf32>, vector<1x32xf32> -> vector<1x32xf32>
    %209 = arith.addf %205, %208 : vector<1x32xf32>
    %210 = vector.extract_strided_slice %175 {offsets = [8, 0], sizes = [1, 32], strides = [1, 1]} : vector<16x32xf32> to vector<1x32xf32>
    %211 = vector.extract_strided_slice %176 {offsets = [256, 0], sizes = [32, 32], strides = [1, 1]} : vector<512x32xf32> to vector<32x32xf32>
    %cst_67 = arith.constant dense<0.000000e+00> : vector<1x32xf32>
    %212 = tpu.matmul %210, %211, %cst_67 {dimension_numbers = #tpu.dot_dimension_numbers<[1], [0], [0], [1], [0, 0, 1, 1], [], []>} : vector<1x32xf32>, vector<32x32xf32>, vector<1x32xf32> -> vector<1x32xf32>
    %213 = arith.addf %209, %212 : vector<1x32xf32>
    %214 = vector.extract_strided_slice %175 {offsets = [9, 0], sizes = [1, 32], strides = [1, 1]} : vector<16x32xf32> to vector<1x32xf32>
    %215 = vector.extract_strided_slice %176 {offsets = [288, 0], sizes = [32, 32], strides = [1, 1]} : vector<512x32xf32> to vector<32x32xf32>
    %cst_68 = arith.constant dense<0.000000e+00> : vector<1x32xf32>
    %216 = tpu.matmul %214, %215, %cst_68 {dimension_numbers = #tpu.dot_dimension_numbers<[1], [0], [0], [1], [0, 0, 1, 1], [], []>} : vector<1x32xf32>, vector<32x32xf32>, vector<1x32xf32> -> vector<1x32xf32>
    %217 = arith.addf %213, %216 : vector<1x32xf32>
    %218 = vector.extract_strided_slice %175 {offsets = [10, 0], sizes = [1, 32], strides = [1, 1]} : vector<16x32xf32> to vector<1x32xf32>
    %219 = vector.extract_strided_slice %176 {offsets = [320, 0], sizes = [32, 32], strides = [1, 1]} : vector<512x32xf32> to vector<32x32xf32>
    %cst_69 = arith.constant dense<0.000000e+00> : vector<1x32xf32>
    %220 = tpu.matmul %218, %219, %cst_69 {dimension_numbers = #tpu.dot_dimension_numbers<[1], [0], [0], [1], [0, 0, 1, 1], [], []>} : vector<1x32xf32>, vector<32x32xf32>, vector<1x32xf32> -> vector<1x32xf32>
    %221 = arith.addf %217, %220 : vector<1x32xf32>
    %222 = vector.extract_strided_slice %175 {offsets = [11, 0], sizes = [1, 32], strides = [1, 1]} : vector<16x32xf32> to vector<1x32xf32>
    %223 = vector.extract_strided_slice %176 {offsets = [352, 0], sizes = [32, 32], strides = [1, 1]} : vector<512x32xf32> to vector<32x32xf32>
    %cst_70 = arith.constant dense<0.000000e+00> : vector<1x32xf32>
    %224 = tpu.matmul %222, %223, %cst_70 {dimension_numbers = #tpu.dot_dimension_numbers<[1], [0], [0], [1], [0, 0, 1, 1], [], []>} : vector<1x32xf32>, vector<32x32xf32>, vector<1x32xf32> -> vector<1x32xf32>
    %225 = arith.addf %221, %224 : vector<1x32xf32>
    %226 = vector.extract_strided_slice %175 {offsets = [12, 0], sizes = [1, 32], strides = [1, 1]} : vector<16x32xf32> to vector<1x32xf32>
    %227 = vector.extract_strided_slice %176 {offsets = [384, 0], sizes = [32, 32], strides = [1, 1]} : vector<512x32xf32> to vector<32x32xf32>
    %cst_71 = arith.constant dense<0.000000e+00> : vector<1x32xf32>
    %228 = tpu.matmul %226, %227, %cst_71 {dimension_numbers = #tpu.dot_dimension_numbers<[1], [0], [0], [1], [0, 0, 1, 1], [], []>} : vector<1x32xf32>, vector<32x32xf32>, vector<1x32xf32> -> vector<1x32xf32>
    %229 = arith.addf %225, %228 : vector<1x32xf32>
    %230 = vector.extract_strided_slice %175 {offsets = [13, 0], sizes = [1, 32], strides = [1, 1]} : vector<16x32xf32> to vector<1x32xf32>
    %231 = vector.extract_strided_slice %176 {offsets = [416, 0], sizes = [32, 32], strides = [1, 1]} : vector<512x32xf32> to vector<32x32xf32>
    %cst_72 = arith.constant dense<0.000000e+00> : vector<1x32xf32>
    %232 = tpu.matmul %230, %231, %cst_72 {dimension_numbers = #tpu.dot_dimension_numbers<[1], [0], [0], [1], [0, 0, 1, 1], [], []>} : vector<1x32xf32>, vector<32x32xf32>, vector<1x32xf32> -> vector<1x32xf32>
    %233 = arith.addf %229, %232 : vector<1x32xf32>
    %234 = vector.extract_strided_slice %175 {offsets = [14, 0], sizes = [1, 32], strides = [1, 1]} : vector<16x32xf32> to vector<1x32xf32>
    %235 = vector.extract_strided_slice %176 {offsets = [448, 0], sizes = [32, 32], strides = [1, 1]} : vector<512x32xf32> to vector<32x32xf32>
    %cst_73 = arith.constant dense<0.000000e+00> : vector<1x32xf32>
    %236 = tpu.matmul %234, %235, %cst_73 {dimension_numbers = #tpu.dot_dimension_numbers<[1], [0], [0], [1], [0, 0, 1, 1], [], []>} : vector<1x32xf32>, vector<32x32xf32>, vector<1x32xf32> -> vector<1x32xf32>
    %237 = arith.addf %233, %236 : vector<1x32xf32>
    %238 = vector.extract_strided_slice %175 {offsets = [15, 0], sizes = [1, 32], strides = [1, 1]} : vector<16x32xf32> to vector<1x32xf32>
    %239 = vector.extract_strided_slice %176 {offsets = [480, 0], sizes = [32, 32], strides = [1, 1]} : vector<512x32xf32> to vector<32x32xf32>
    %cst_74 = arith.constant dense<0.000000e+00> : vector<1x32xf32>
    %240 = tpu.matmul %238, %239, %cst_74 {dimension_numbers = #tpu.dot_dimension_numbers<[1], [0], [0], [1], [0, 0, 1, 1], [], []>} : vector<1x32xf32>, vector<32x32xf32>, vector<1x32xf32> -> vector<1x32xf32>
    %241 = arith.addf %237, %240 : vector<1x32xf32>
    %c0_75 = arith.constant 0 : index
    %c0_76 = arith.constant 0 : index
    %242 = vector.load %arg7[%c0_75, %c0_76] : memref<1x32xf32, #tpu.memory_space<vmem>>, vector<1x32xf32>
    %243 = arith.addf %241, %242 : vector<1x32xf32>
    %244 = math.tanh %243 : vector<1x32xf32>
    %c0_77 = arith.constant 0 : index
    %c0_78 = arith.constant 0 : index
    %245 = vector.load %arg8[%c0_77, %c0_78] : memref<32x16xf32, #tpu.memory_space<vmem>>, vector<32x16xf32>
    %cst_79 = arith.constant dense<0.000000e+00> : vector<1x16xf32>
    %246 = tpu.matmul %244, %245, %cst_79 {dimension_numbers = #tpu.dot_dimension_numbers<[1], [0], [0], [1], [0, 0, 1, 1], [], []>} : vector<1x32xf32>, vector<32x16xf32>, vector<1x16xf32> -> vector<1x16xf32>
    %c0_80 = arith.constant 0 : index
    %c0_81 = arith.constant 0 : index
    %247 = vector.load %arg9[%c0_80, %c0_81] : memref<1x16xf32, #tpu.memory_space<vmem>>, vector<1x16xf32>
    %248 = arith.addf %246, %247 : vector<1x16xf32>
    %249 = math.tanh %248 : vector<1x16xf32>
    %c0_82 = arith.constant 0 : index
    %c0_83 = arith.constant 0 : index
    %250 = vector.load %arg10[%c0_82, %c0_83] : memref<16x16xf32, #tpu.memory_space<vmem>>, vector<16x16xf32>
    %cst_84 = arith.constant dense<0.000000e+00> : vector<1x16xf32>
    %251 = tpu.matmul %249, %250, %cst_84 {dimension_numbers = #tpu.dot_dimension_numbers<[1], [0], [0], [1], [0, 0, 1, 1], [], []>} : vector<1x16xf32>, vector<16x16xf32>, vector<1x16xf32> -> vector<1x16xf32>
    %c0_85 = arith.constant 0 : index
    %c0_86 = arith.constant 0 : index
    %252 = vector.load %arg11[%c0_85, %c0_86] : memref<1x16xf32, #tpu.memory_space<vmem>>, vector<1x16xf32>
    %253 = arith.addf %251, %252 : vector<1x16xf32>
    %254 = math.tanh %253 : vector<1x16xf32>
    %c0_87 = arith.constant 0 : index
    %c0_88 = arith.constant 0 : index
    %255 = vector.load %arg12[%c0_87, %c0_88] : memref<16x10xf32, #tpu.memory_space<vmem>>, vector<16x10xf32>
    %cst_89 = arith.constant dense<0.000000e+00> : vector<1x10xf32>
    %256 = tpu.matmul %254, %255, %cst_89 {dimension_numbers = #tpu.dot_dimension_numbers<[1], [0], [0], [1], [0, 0, 1, 1], [], []>} : vector<1x16xf32>, vector<16x10xf32>, vector<1x10xf32> -> vector<1x10xf32>
    %c0_90 = arith.constant 0 : index
    %c0_91 = arith.constant 0 : index
    %257 = vector.load %arg13[%c0_90, %c0_91] : memref<1x10xf32, #tpu.memory_space<vmem>>, vector<1x10xf32>
    %258 = arith.addf %256, %257 : vector<1x10xf32>
    %259 = vector.shape_cast %258 : vector<1x10xf32> to vector<1x1x10xf32>
    %c0_92 = arith.constant 0 : index
    %c0_93 = arith.constant 0 : index
    %c0_94 = arith.constant 0 : index
    %260 = vector.load %arg14[%c0_92, %c0_93, %c0_94] : memref<1x1x10xf32, #tpu.memory_space<vmem>>, vector<1x1x10xf32>
    tpu.vector_store %arg14[%c0_92, %c0_93, %c0_94], %259 {strides = array<i32>} : memref<1x1x10xf32, #tpu.memory_space<vmem>>, vector<1x1x10xf32>,
    return
  }
  func.func @transform_0(%arg0: i32) -> (i32, i32, i32, i32) {
    %c0_i32 = arith.constant 0 : i32
    %c0_i32_0 = arith.constant 0 : i32
    %c0_i32_1 = arith.constant 0 : i32
    %c0_i32_2 = arith.constant 0 : i32
    return %arg0, %c0_i32, %c0_i32_0, %c0_i32_1 : i32, i32, i32, i32
  }
  func.func @transform_1(%arg0: i32) -> (i32, i32, i32, i32) {
    %c0_i32 = arith.constant 0 : i32
    %c0_i32_0 = arith.constant 0 : i32
    %c0_i32_1 = arith.constant 0 : i32
    %c0_i32_2 = arith.constant 0 : i32
    %c0_i32_3 = arith.constant 0 : i32
    return %c0_i32, %c0_i32_0, %c0_i32_1, %c0_i32_2 : i32, i32, i32, i32
  }
  func.func @transform_2(%arg0: i32) -> (i32, i32) {
    %c0_i32 = arith.constant 0 : i32
    %c0_i32_0 = arith.constant 0 : i32
    %c0_i32_1 = arith.constant 0 : i32
    return %c0_i32, %c0_i32_0 : i32, i32
  }
  func.func @transform_3(%arg0: i32) -> (i32, i32, i32, i32) {
    %c0_i32 = arith.constant 0 : i32
    %c0_i32_0 = arith.constant 0 : i32
    %c0_i32_1 = arith.constant 0 : i32
    %c0_i32_2 = arith.constant 0 : i32
    %c0_i32_3 = arith.constant 0 : i32
    return %c0_i32, %c0_i32_0, %c0_i32_1, %c0_i32_2 : i32, i32, i32, i32
  }
  func.func @transform_4(%arg0: i32) -> (i32, i32) {
    %c0_i32 = arith.constant 0 : i32
    %c0_i32_0 = arith.constant 0 : i32
    %c0_i32_1 = arith.constant 0 : i32
    return %c0_i32, %c0_i32_0 : i32, i32
  }
  func.func @transform_5(%arg0: i32) -> (i32, i32) {
    %c0_i32 = arith.constant 0 : i32
    %c0_i32_0 = arith.constant 0 : i32
    %c0_i32_1 = arith.constant 0 : i32
    return %c0_i32, %c0_i32_0 : i32, i32
  }
  func.func @transform_6(%arg0: i32) -> (i32, i32) {
    %c0_i32 = arith.constant 0 : i32
    %c0_i32_0 = arith.constant 0 : i32
    %c0_i32_1 = arith.constant 0 : i32
    return %c0_i32, %c0_i32_0 : i32, i32
  }
  func.func @transform_7(%arg0: i32) -> (i32, i32) {
    %c0_i32 = arith.constant 0 : i32
    %c0_i32_0 = arith.constant 0 : i32
    %c0_i32_1 = arith.constant 0 : i32
    return %c0_i32, %c0_i32_0 : i32, i32
  }
  func.func @transform_8(%arg0: i32) -> (i32, i32) {
    %c0_i32 = arith.constant 0 : i32
    %c0_i32_0 = arith.constant 0 : i32
    %c0_i32_1 = arith.constant 0 : i32
    return %c0_i32, %c0_i32_0 : i32, i32
  }
  func.func @transform_9(%arg0: i32) -> (i32, i32) {
    %c0_i32 = arith.constant 0 : i32
    %c0_i32_0 = arith.constant 0 : i32
    %c0_i32_1 = arith.constant 0 : i32
    return %c0_i32, %c0_i32_0 : i32, i32
  }
  func.func @transform_10(%arg0: i32) -> (i32, i32) {
    %c0_i32 = arith.constant 0 : i32
    %c0_i32_0 = arith.constant 0 : i32
    %c0_i32_1 = arith.constant 0 : i32
    return %c0_i32, %c0_i32_0 : i32, i32
  }
  func.func @transform_11(%arg0: i32) -> (i32, i32) {
    %c0_i32 = arith.constant 0 : i32
    %c0_i32_0 = arith.constant 0 : i32
    %c0_i32_1 = arith.constant 0 : i32
    return %c0_i32, %c0_i32_0 : i32, i32
  }
  func.func @transform_12(%arg0: i32) -> (i32, i32) {
    %c0_i32 = arith.constant 0 : i32
    %c0_i32_0 = arith.constant 0 : i32
    %c0_i32_1 = arith.constant 0 : i32
    return %c0_i32, %c0_i32_0 : i32, i32
  }
  func.func @transform_13(%arg0: i32) -> (i32, i32, i32) {
    %c0_i32 = arith.constant 0 : i32
    %c0_i32_0 = arith.constant 0 : i32
    %c0_i32_1 = arith.constant 0 : i32
    return %arg0, %c0_i32, %c0_i32_0 : i32, i32, i32
  }
}

</mosaic_0001>

<bundles_post_ra>
// kernel: _lambda_.1
= control target key start
LH: loop header
LB: loop body
LE: loop exit
PB: predicated region body
PF: predicated region fallthrough
CT: control target
= control target key end

     0   :  { %s11539_s0 = inlined_call_operand.vmem [shape: f32[2,18,18,4], index: 0, kind: input, shape index: {}]   ;;  %s11540_s1 = inlined_call_operand.vmem [shape: f32[3,3,4,32], index: 1, kind: input, shape index: {}]   ;;  %s11541_s2 = inlined_call_operand.vmem [shape: f32[1,32], index: 2, kind: input, shape index: {}]   ;;  %s11542_s3 = inlined_call_operand.vmem [shape: f32[3,3,32,32], index: 3, kind: input, shape index: {}]   ;;  %s11543_s4 = inlined_call_operand.vmem [shape: f32[1,32], index: 4, kind: input, shape index: {}]   ;;  %s11544_s5 = inlined_call_operand.vmem [shape: f32[512,32], index: 5, kind: input, shape index: {}]   ;;  %s11545_s6 = inlined_call_operand.vmem [shape: f32[1,32], index: 6, kind: input, shape index: {}]   ;;  %s11546_s7 = inlined_call_operand.vmem [shape: f32[32,16], index: 7, kind: input, shape index: {}]   ;;  %s11547_s8 = inlined_call_operand.vmem [shape: f32[1,16], index: 8, kind: input, shape index: {}]   ;;  %s11548_s9 = inlined_call_operand.vmem [shape: f32[16,16], index: 9, kind: input, shape index: {}]   ;;  %s11549_s10 = inlined_call_operand.vmem [shape: f32[1,16], index: 10, kind: input, shape index: {}]   ;;  %s11550_s11 = inlined_call_operand.vmem [shape: f32[16,10], index: 11, kind: input, shape index: {}]   ;;  %s11551_s12 = inlined_call_operand.vmem [shape: f32[1,10], index: 12, kind: input, shape index: {}]   ;;  %s11552_s13 = inlined_call_operand.hbm [shape: f32[2,1,10], index: 13, kind: output, shape index: {}]  }
   0x1   :  { %11629 = sst [smem:[#allocation44_spill]] %s11539_s0 }
   0x2   :  { %11630 = sst [smem:[#allocation45_spill]] %s11540_s1 }
   0x3   :  { %11631 = sst [smem:[#allocation46_spill]] %s11541_s2 }
   0x4   :  { %18 = vsyncpa [#allocation4], 0 }
   0x5   :  { %20 = vsyncpa [#allocation4 + $0x1], 0  ;;  %s9284_s25 = smov 0   ;;  %s9286_s26 = smov 0  }
   0x6   :  { %s9288_s27 = smov 0   ;;  %s9290_s28 = smov 0  }
   0x7 LB: > { %s9305_s29 = sadd.s32 4294967295, %s9207_s28   ;;  %s6582_s30 = sadd.s32 4294967294, %s9207_s28   ;;  %s9207_s28 = sphi %s9290_s28, %s11780_s28   ;;  %s9203_s27 = sphi %s9288_s27, %s11779_s27   ;;  %s9199_s26 = sphi %s9286_s26, %s11778_s26   ;;  %s9195_s25 = sphi %s9284_s25, %s11777_s25  }
   0x8   : > { %s9309_s14 = sadd.s32 1, %s9207_s28   ;;  %s311_s15 = sadd.s32 1, %s9203_s27 }
   0x9   : > { %s308_s16 = ssub.s32 %s9207_s28, %s9309_s14  ;;  %p321_p0 = scmp.ne.s32.totalorder %s9203_s27, %s9199_s26 }
   0xa   : > { %p309_p1 = scmp.eq.s32.totalorder %s308_s16, 0  ;;  %p322_p2 = scmp.eq.s32.totalorder %s9305_s29, 1 }
   0xb   : > { %p327_p3 = scmp.ne.s32.totalorder %s9199_s26, %s9195_s25  ;;  %p328_p4 = scmp.eq.s32.totalorder %s6582_s30, 1 }
   0xc   : > { %s9320_s17 = scalar_select %p309_p1, %s9203_s27, %s311_s15  }
   0xd   : > { %p9322_p5 = por %p322_p2, %p321_p0  ;;  %p9326_p6 = por %p328_p4, %p327_p3 }
   0xe   : > { %p6585_p7 = scmp.ge.s32.totalorder %s9207_s28, 1  ;;  %p390_p8 = scmp.lt.s32.totalorder %s9207_s28, 3 }
  0x10   : > { %p391_p9 = pnand %p6585_p7, %p390_p8 }
  0x12   : > { %394 = sbr.rel (%p391_p9) target bundleno = 2595 (0xa23), region = 72 }
  0x19   : > { %s11634_s1 = sld [smem:[#allocation45_spill]]  ;;  %vm696_vm0 = vcmask 1043456   ;;  %p433_p10 = scmp.lt.s32.totalorder %s9305_s29, 1  ;;  %vm631_vm1 = vcmask 31744   ;;  %vm11623_vm2 = vcmask 1045504   ;;  %vm11624_vm3 = vcmask 1046528  }
  0x1a   : > { %s11635_s0 = sld [smem:[#allocation44_spill]]  ;;  %s11755_s2 = sld [smem:[#allocation46_spill]] }
  0x1b   : > { %s434_s24 = scalar_select %p433_p10, %s9305_s29, 1 }
  0x1c   : > { %s431_s22 = sand.u32 1, %s9199_s26  }
  0x1d   : > { %s9095_s30 = smul.u32 432, %s434_s24  ;;  %s432_s15 = scalar_lea.vmem [#allocation3], %s431_s22 }
  0x1e   : > { %s6527_s16 = sshll.u32 %s432_s15, 4  ;;  %s6515_s23 = scalar_lea.sflag [#allocation4], %s431_s22  ;;  %s11499_s16 = int_to_ptr.vmem [resolvable:$true] %s6527_s16 }
  0x1f   : > { %v9335_v0 = vld [vmem:[%s11634_s1] sm:$0xf]  ;;  %v494_v1 = vld [vmem:[%s11634_s1 + $0x8] sm:$0xf]  ;;  %v495_v5 = vld [vmem:[%s11634_s1 + $0xc] sm:$0xf] }
  0x20   : > { %7622 = vmatprep.subr.msk.mxu0 %vm696_vm0, %v9335_v0  ;;  %s9350_s20 = scalar_lea.vmem %s11635_s0, %s9095_s30  ;;  %v9423_v25 = vld [vmem:[%s11634_s1 + $0x10] sm:$0xf]  ;;  %s7013_s30 = sshll.u32 %s9305_s29, 4 }
  0x21   : > { %7623 = vmatpush3.msk.msra.mxu0 %vm696_vm0, %v9335_v0  ;;  %v9353_v2 = vld [vmem:[%s9350_s20] sm:$0xff]  ;;  %v9356_v3 = vld [vmem:[%s9350_s20 + $0x8] sm:$0xff]  ;;  %v9359_v4 = vld [vmem:[%s9350_s20 + $0x18] sm:$0xff]  ;;  %s11497_s0 = scalar_lea.hbm %s11552_s13, %s7013_s30  ;;  %s9145_s24 = scalar_lea.vmem %s11499_s16, 16 }
  0x22   : > { %7672 = vmatprep.subr.msk.mxu0 %vm696_vm0, %v494_v1  ;;  %7624 = vmatprep.mubr.msk.f32.mxu0 %vm631_vm1, %v9353_v2  ;;  %v9371_v6 = vld [vmem:[%s9350_s20 + $0x20] sm:$0xff]  ;;  %v9375_v7 = vld [vmem:[%s9350_s20 + $0x30] sm:$0xff]  ;;  %v9383_v8 = vld [vmem:[%s9350_s20 + $0x38] sm:$0xff]  ;;  %v1218_v9 = vrot.slane %v9353_v2, 2  ;;  %v1219_v10 = vrot.slane %v9356_v3, 2  ;;  %v1223_v15 = vrot.slane %v9359_v4, 2  ;;  %p9146_p11 = scmp.ne.s32.totalorder %s11499_s16, %s9145_s24 }
  0x23   : > { %7625 = vmatmul.mubr.msk.f32.vlgmr.msra.gmra.mrb[0].mxu0 %vm631_vm1, %v9356_v3  ;;  %11636 = vst [vmem:[#allocation6_spill] sm:$0xff] %v9375_v7  ;;  %11637 = vst [vmem:[#allocation7_spill] sm:$0xff] %v9383_v8  ;;  %v9388_v11 = vld [vmem:[%s9350_s20 + $0x48] sm:$0xff]  ;;  %v9391_v12 = vld [vmem:[%s9350_s20 + $0x10] sm:$0x3]  ;;  %v1224_v16 = vrot.slane %v9371_v6, 2 }
  0x24   : > { %7627 = vmatprep.mubr.msk.f32.mxu0 %vm631_vm1, %v9359_v4  ;;  %7673 = vmatpush3.msk.msra.mxu0 %vm696_vm0, %v494_v1  ;;  %11638 = vst [vmem:[#allocation8_spill] sm:$0xff] %v9388_v11  ;;  %v9398_v13 = vld [vmem:[%s9350_s20 + $0x50] sm:$0xff]  ;;  %v1221_v14 = vrot.slane %v9391_v12, 2  ;;  %v1220_v17 = vsel %vm11623_vm2, %v1218_v9, %v1219_v10  ;;  %v9405_v18 = vld [vmem:[%s9350_s20 + $0x28] sm:$0x3]  ;;  %v1228_v22 = vrot.slane %v9375_v7, 2  ;;  %p9147_p12 = pnand %p9146_p11, %p9322_p5 }
  0x25   : > { %7722 = vmatprep.subr.msk.mxu0 %vm696_vm0, %v495_v5  ;;  %11639 = vst [vmem:[#allocation9_spill] sm:$0xff] %v9398_v13  ;;  %v1226_v20 = vrot.slane %v9405_v18, 2  ;;  %v9413_v21 = vsel %vm11623_vm2, %v1223_v15, %v1224_v16  ;;  %v1229_v23 = vrot.slane %v9383_v8, 2  ;;  %v9418_v24 = vld [vmem:[%s9350_s20 + $0x40] sm:$0x3]  ;;  %v1233_v29 = vrot.slane %v9388_v11, 2 }
  0x26   : > { %v1222_v19 = vsel %vm11623_vm2, %v1219_v10, %v1221_v14  ;;  %v1231_v27 = vrot.slane %v9418_v24, 2  ;;  %v1234_v30 = vrot.slane %v9398_v13, 2  ;;  %v9439_v31 = vld [vmem:[%s9350_s20 + $0x58] sm:$0x3]  ;;  %v9444_v32 = vld [vmem:[%s9350_s20 + $0x60] sm:$0xff]  ;;  %v9447_v33 = vld [vmem:[%s9350_s20 + $0x68] sm:$0xff]  ;;  %p9148_p13 = pneg %p9147_p12 }
  0x27   : > { %7628 = vmatmul.mubr.msk.f32.gmra.mrb[2].mxu0 %vm631_vm1, %v9371_v6  ;;  %v9429_v26 = vsel %vm11623_vm2, %v1224_v16, %v1226_v20  ;;  %v9434_v28 = vsel %vm11623_vm2, %v1228_v22, %v1229_v23  ;;  %v1236_v35 = vrot.slane %v9439_v31, 2  ;;  %v1238_v37 = vrot.slane %v9444_v32, 2  ;;  %v9463_v39 = vld [vmem:[%s9350_s20 + $0x70] sm:$0x3]  ;;  %v9466_v40 = vld [vmem:[%s9350_s20 + $0x78] sm:$0xff]  ;;  %v9469_v41 = vld [vmem:[%s9350_s20 + $0x80] sm:$0xff] }
  0x28   : > { %7630 = vmatprep.mubr.msk.f32.mxu0 %vm631_vm1, %v9375_v7  ;;  %11640 = vst [vmem:[#allocation10_spill] sm:$0xff] %v9434_v28  ;;  %v9454_v34 = vsel %vm11623_vm2, %v1229_v23, %v1231_v27  ;;  %v9458_v36 = vsel %vm11623_vm2, %v1233_v29, %v1234_v30  ;;  %v1239_v38 = vrot.slane %v9447_v33, 2  ;;  %v1241_v43 = vrot.slane %v9463_v39, 2  ;;  %v9485_v47 = vld [vmem:[%s9350_s20 + $0x88] sm:$0x3]  ;;  %v9488_v48 = vld [vmem:[%s9350_s20 + $0x90] sm:$0xff] }
  0x29   : > { %11641 = vst [vmem:[#allocation11_spill] sm:$0xff] %v9454_v34  ;;  %11642 = vst [vmem:[#allocation12_spill] sm:$0xff] %v9458_v36  ;;  %v9476_v42 = vsel %vm11623_vm2, %v1234_v30, %v1236_v35  ;;  %v1243_v45 = vrot.slane %v9466_v40, 2  ;;  %v1244_v46 = vrot.slane %v9469_v41, 2  ;;  %v9491_v49 = vld [vmem:[%s9350_s20 + $0x98] sm:$0xff]  ;;  %v1246_v51 = vrot.slane %v9485_v47, 2 }
  0x2a   : > { %11643 = vst [vmem:[#allocation13_spill] sm:$0xff] %v9476_v42  ;;  %v9480_v44 = vsel %vm11623_vm2, %v1238_v37, %v1239_v38  ;;  %v9498_v50 = vsel %vm11623_vm2, %v1239_v38, %v1241_v43  ;;  %v1248_v53 = vrot.slane %v9488_v48, 2  ;;  %v1249_v54 = vrot.slane %v9491_v49, 2  ;;  %v9507_v55 = vld [vmem:[%s9350_s20 + $0xa0] sm:$0x3]  ;;  %v9510_v56 = vld [vmem:[%s9350_s20 + $0xa8] sm:$0xff] }
  0x2b   : > { %7631 = vmatmul.mubr.msk.f32.gmra.mrb[4].mxu0 %vm631_vm1, %v9383_v8  ;;  %11644 = vst [vmem:[#allocation14_spill] sm:$0xff] %v9480_v44  ;;  %11645 = vst [vmem:[#allocation15_spill] sm:$0xff] %v9498_v50  ;;  %v9502_v52 = vsel %vm11623_vm2, %v1243_v45, %v1244_v46  ;;  %v9513_v57 = vld [vmem:[%s9350_s20 + $0xb0] sm:$0xff]  ;;  %v9520_v58 = vsel %vm11623_vm2, %v1244_v46, %v1246_v51  ;;  %v1251_v59 = vrot.slane %v9507_v55, 2  ;;  %v1253_v61 = vrot.slane %v9510_v56, 2  ;;  %v9532_v1 = vld [vmem:[%s9350_s20 + $0xc0] sm:$0xff] }
  0x2c   : > { %7633 = vmatprep.mubr.msk.f32.mxu0 %vm631_vm1, %v9388_v11  ;;  %11646 = vst [vmem:[#allocation16_spill] sm:$0xff] %v9502_v52  ;;  %11647 = vst [vmem:[#allocation17_spill] sm:$0xff] %v9520_v58  ;;  %v9524_v60 = vsel %vm11623_vm2, %v1248_v53, %v1249_v54  ;;  %v1254_v62 = vrot.slane %v9513_v57, 2  ;;  %v9529_v63 = vld [vmem:[%s9350_s20 + $0xb8] sm:$0x3]  ;;  %v1258_v15 = vrot.slane %v9532_v1, 2 }
  0x2d   : > { %11648 = vst [vmem:[#allocation18_spill] sm:$0xff] %v9524_v60  ;;  %v9542_v9 = vsel %vm11623_vm2, %v1249_v54, %v1251_v59  ;;  %v1256_v10 = vrot.slane %v9529_v63, 2  ;;  %v9557_v20 = vld [vmem:[%s9350_s20 + $0xe0] sm:$0xff]  ;;  %v9573_v35 = vld [vmem:[%s9350_s20 + $0xe8] sm:$0x3]  ;;  %v9576_v37 = vld [vmem:[%s9350_s20 + $0xf0] sm:$0xff] }
  0x2e   : > { %11650 = vst [vmem:[#allocation20_spill] sm:$0xff] %v9542_v9  ;;  %v9546_v14 = vsel %vm11623_vm2, %v1253_v61, %v1254_v62  ;;  %11653 = vst [vmem:[#allocation23_spill] sm:$0xff] %v9557_v20  ;;  %v1264_v30 = vrot.slane %v9557_v20, 2  ;;  %v9579_v38 = vld [vmem:[%s9350_s20 + $0xf8] sm:$0xff]  ;;  %v1266_v45 = vrot.slane %v9573_v35, 2  ;;  %v1268_v51 = vrot.slane %v9576_v37, 2 }
  0x2f   : > { %7634 = vmatmul.mubr.msk.f32.gmra.mrb[6].mxu0 %vm631_vm1, %v9398_v13  ;;  %11651 = vst [vmem:[#allocation21_spill] sm:$0xff] %v9546_v14  ;;  %v9564_v22 = vsel %vm11623_vm2, %v1254_v62, %v1256_v10  ;;  %11656 = vst [vmem:[#allocation26_spill] sm:$0xff] %v9576_v37  ;;  %v1269_v53 = vrot.slane %v9579_v38, 2  ;;  %v9595_v54 = vld [vmem:[%s9350_s20 + $0x100] sm:$0x3]  ;;  %v9598_v59 = vld [vmem:[%s9350_s20 + $0x108] sm:$0xff] }
  0x30   : > { %7674 = vmatprep.mubr.msk.f32.mxu0 %vm631_vm1, %v1220_v17  ;;  %v9551_v17 = vld [vmem:[%s9350_s20 + $0xd0] sm:$0x3]  ;;  %11654 = vst [vmem:[#allocation24_spill] sm:$0xff] %v9564_v22  ;;  %11657 = vst [vmem:[#allocation27_spill] sm:$0xff] %v9579_v38  ;;  %v9608_v62 = vsel %vm11623_vm2, %v1264_v30, %v1266_v45  ;;  %v1271_v10 = vrot.slane %v9595_v54, 2  ;;  %s9213_s29 = smov [#allocation3]  }
  0x31   : > { %v1261_v23 = vrot.slane %v9551_v17, 2  ;;  %v9601_v61 = vld [vmem:[%s9350_s20 + $0x110] sm:$0xff]  ;;  %11660 = vst [vmem:[#allocation30_spill] sm:$0xff] %v9608_v62 }
  0x33   : > { %7675 = vmatmul.mubr.msk.f32.vlgmr.msra.gmra.mrb[0].mxu0 %vm631_vm1, %v1222_v19  ;;  %v9554_v19 = vld [vmem:[%s9350_s20 + $0xd8] sm:$0xff] }
  0x34   : > { %7677 = vmatprep.mubr.msk.f32.mxu0 %vm631_vm1, %v9413_v21  ;;  %7723 = vmatpush3.msk.msra.mxu0 %vm696_vm0, %v495_v5  ;;  %v9535_v5 = vld [vmem:[%s9350_s20 + $0xc8] sm:$0xff]  ;;  %11652 = vst [vmem:[#allocation22_spill] sm:$0xff] %v9554_v19  ;;  %v1263_v29 = vrot.slane %v9554_v19, 2 }
  0x35   : > { %7772 = vmatprep.subr.msk.mxu0 %vm696_vm0, %v9423_v25  ;;  %11649 = vst [vmem:[#allocation19_spill] sm:$0xff] %v9535_v5  ;;  %v1259_v16 = vrot.slane %v9535_v5, 2 }
  0x36   : > { %v9590_v46 = vsel %vm11623_vm2, %v1263_v29, %v1264_v30  ;;  %v9617_v29 = vld [vmem:[%s9350_s20 + $0x118] sm:$0x3]  ;;  %v9630_v30 = vsel %vm11623_vm2, %v1269_v53, %v1271_v10 }
  0x37   : > { %7678 = vmatmul.mubr.msk.f32.gmra.mrb[2].mxu0 %vm631_vm1, %v9429_v26  ;;  %v9568_v27 = vsel %vm11623_vm2, %v1258_v15, %v1259_v16  ;;  %v9586_v43 = vsel %vm11623_vm2, %v1259_v16, %v1261_v23  ;;  %11659 = vst [vmem:[#allocation29_spill] sm:$0xff] %v9590_v46  ;;  %v9612_v15 = vsel %vm11623_vm2, %v1268_v51, %v1269_v53  ;;  %v1273_v16 = vrot.slane %v9598_v59, 2 }
  0x38   : > { %7680 = vmatprep.mubr.msk.f32.mxu0 %vm631_vm1, %v9434_v28  ;;  %11655 = vst [vmem:[#allocation25_spill] sm:$0xff] %v9568_v27  ;;  %11658 = vst [vmem:[#allocation28_spill] sm:$0xff] %v9586_v43  ;;  %v1274_v23 = vrot.slane %v9601_v61, 2  ;;  %v1276_v45 = vrot.slane %v9617_v29, 2 }
  0x39   : > { %11661 = vst [vmem:[#allocation31_spill] sm:$0xff] %v9612_v15  ;;  %11662 = vst [vmem:[#allocation32_spill] sm:$0xff] %v9630_v30 }
  0x3a   : > { %v9634_v51 = vsel %vm11623_vm2, %v1273_v16, %v1274_v23  ;;  %v9652_v53 = vsel %vm11623_vm2, %v1274_v23, %v1276_v45 }
  0x3b   : > { %7681 = vmatmul.mubr.msk.f32.gmra.mrb[4].mxu0 %vm631_vm1, %v9454_v34  ;;  %11663 = vst [vmem:[#allocation33_spill] sm:$0xff] %v9634_v51  ;;  %11664 = vst [vmem:[#allocation34_spill] sm:$0xff] %v9652_v53  ;;  %v9705_v34 = vld [vmem:[%s9350_s20 + $0x178] sm:$0x3] }
  0x3c   : > { %7683 = vmatprep.mubr.msk.f32.mxu0 %vm631_vm1, %v9458_v36 }
  0x3f   : > { %7684 = vmatmul.mubr.msk.f32.gmra.mrb[6].mxu0 %vm631_vm1, %v9476_v42  ;;  %v9686_v42 = vld [vmem:[%s9350_s20 + $0x168] sm:$0xff] }
  0x40   : > { %7686 = vmatprep.mubr.msk.f32.mxu0 %vm631_vm1, %v9480_v44  ;;  %v9683_v44 = vld [vmem:[%s9350_s20 + $0x160] sm:$0x3] }
  0x43   : > { %7687 = vmatmul.mubr.msk.f32.gmra.mrb[8].mxu0 %vm631_vm1, %v9498_v50 }
  0x44   : > { %7689 = vmatprep.mubr.msk.f32.mxu0 %vm631_vm1, %v9502_v52 }
  0x47   : > { %7690 = vmatmul.mubr.msk.f32.gmra.mrb[10].mxu0 %vm631_vm1, %v9520_v58  ;;  %v9661_v58 = vld [vmem:[%s9350_s20 + $0x148] sm:$0x3] }
  0x48   : > { %7692 = vmatprep.mubr.msk.f32.mxu0 %vm631_vm1, %v9524_v60  ;;  %v1286_v23 = vrot.slane %v9661_v58, 2 }
  0x4b   : > { %7693 = vmatmul.mubr.msk.f32.gmra.mrb[12].mxu0 %vm631_vm1, %v9542_v9 }
  0x4c   : > { %7695 = vmatprep.mubr.msk.f32.mxu0 %vm631_vm1, %v9546_v14  ;;  %v9639_v14 = vld [vmem:[%s9350_s20 + $0x130] sm:$0x3] }
  0x4d   : > { %v1281_v10 = vrot.slane %v9639_v14, 2 }
  0x4f   : > { %7696 = vmatmul.mubr.msk.f32.gmra.mrb[14].mxu0 %vm631_vm1, %v9564_v22 }
  0x50   : > { %7698 = vmatprep.mubr.msk.f32.mxu0 %vm631_vm1, %v9568_v27 }
  0x53   : > { %7699 = vmatmul.mubr.msk.f32.gmra.mrb[16].mxu0 %vm631_vm1, %v9586_v43  ;;  %v9620_v43 = vld [vmem:[%s9350_s20 + $0x120] sm:$0xff] }
  0x54   : > { %7701 = vmatprep.mubr.msk.f32.mxu0 %vm631_vm1, %v9590_v46  ;;  %v9623_v46 = vld [vmem:[%s9350_s20 + $0x128] sm:$0xff]  ;;  %v1278_v27 = vrot.slane %v9620_v43, 2 }
  0x55   : > { %v1279_v22 = vrot.slane %v9623_v46, 2 }
  0x57   : > { %7702 = vmatmul.mubr.msk.f32.gmra.mrb[18].mxu0 %vm631_vm1, %v9608_v62  ;;  %v9642_v62 = vld [vmem:[%s9350_s20 + $0x138] sm:$0xff]  ;;  %v9656_v16 = vsel %vm11623_vm2, %v1278_v27, %v1279_v22  ;;  %v9674_v27 = vsel %vm11623_vm2, %v1279_v22, %v1281_v10 }
  0x58   : > { %7704 = vmatprep.mubr.msk.f32.mxu0 %vm631_vm1, %v9612_v15  ;;  %v9645_v15 = vld [vmem:[%s9350_s20 + $0x140] sm:$0xff]  ;;  %11665 = vst [vmem:[#allocation35_spill] sm:$0xff] %v9656_v16  ;;  %v1283_v9 = vrot.slane %v9642_v62, 2  ;;  %11666 = vst [vmem:[#allocation36_spill] sm:$0xff] %v9674_v27 }
  0x59   : > { %v1284_v60 = vrot.slane %v9645_v15, 2 }
  0x5b   : > { %7705 = vmatmul.mubr.msk.f32.gmra.mrb[20].mxu0 %vm631_vm1, %v9630_v30  ;;  %v9664_v30 = vld [vmem:[%s9350_s20 + $0x150] sm:$0xff]  ;;  %v9678_v45 = vsel %vm11623_vm2, %v1283_v9, %v1284_v60  ;;  %v9696_v22 = vsel %vm11623_vm2, %v1284_v60, %v1286_v23  ;;  %v1291_v9 = vrot.slane %v9683_v44, 2  ;;  %v1296_v23 = vrot.slane %v9705_v34, 2 }
  0x5c   : > { %7707 = vmatprep.mubr.msk.f32.mxu0 %vm631_vm1, %v9634_v51  ;;  %v9667_v51 = vld [vmem:[%s9350_s20 + $0x158] sm:$0xff]  ;;  %11667 = vst [vmem:[#allocation37_spill] sm:$0xff] %v9678_v45  ;;  %v1288_v52 = vrot.slane %v9664_v30, 2  ;;  %11668 = vst [vmem:[#allocation38_spill] sm:$0xff] %v9696_v22 }
  0x5d   : > { %v1289_v50 = vrot.slane %v9667_v51, 2 }
  0x5f   : > { %7708 = vmatmul.mubr.msk.f32.gmra.mrb[22].mxu0 %vm631_vm1, %v9652_v53  ;;  %v9689_v53 = vld [vmem:[%s9350_s20 + $0x170] sm:$0xff]  ;;  %v9700_v10 = vsel %vm11623_vm2, %v1288_v52, %v1289_v50  ;;  %v9712_v60 = vsel %vm11623_vm2, %v1289_v50, %v1291_v9  ;;  %v559_v9 = vrot.slane %v9405_v18, 1 }
  0x60   : > { %7710 = vmatprep.mubr.msk.f32.mxu0 %vm631_vm1, %v9656_v16  ;;  %11669 = vst [vmem:[#allocation39_spill] sm:$0xff] %v9700_v10  ;;  %v1293_v16 = vrot.slane %v9686_v42, 2  ;;  %v1294_v36 = vrot.slane %v9689_v53, 2  ;;  %11670 = vst [vmem:[#allocation40_spill] sm:$0xff] %v9712_v60  ;;  %v497_v50 = vld [vmem:[%s11634_s1 + $0x14] sm:$0xf] }
  0x62   : > { %v9716_v52 = vsel %vm11623_vm2, %v1293_v16, %v1294_v36  ;;  %v9794_v16 = vld [vmem:[%s9350_s20 + $0x180] sm:$0xff] }
  0x63   : > { %7711 = vmatmul.mubr.msk.f32.gmra.mrb[24].mxu0 %vm631_vm1, %v9674_v27  ;;  %11671 = vst [vmem:[#allocation41_spill] sm:$0xff] %v9716_v52 }
  0x64   : > { %7713 = vmatprep.mubr.msk.f32.mxu0 %vm631_vm1, %v9678_v45  ;;  %v9723_v45 = vsel %vm11623_vm2, %v1294_v36, %v1296_v23  ;;  %v557_v36 = vrot.slane %v9371_v6, 1  ;;  %v9802_v23 = vld [vmem:[%s9350_s20 + $0x188] sm:$0xff] }
  0x65   : > { %11672 = vst [vmem:[#allocation42_spill] sm:$0xff] %v9723_v45 }
  0x66   : > { %v9814_v18 = vsel %vm11624_vm3, %v557_v36, %v559_v9 }
  0x67   : > { %7714 = vmatmul.mubr.msk.f32.gmra.mrb[26].mxu0 %vm631_vm1, %v9696_v22 }
  0x68   : > { %7716 = vmatprep.mubr.msk.f32.mxu0 %vm631_vm1, %v9700_v10 }
  0x6b   : > { %7717 = vmatmul.mubr.msk.f32.gmra.mrb[28].mxu0 %vm631_vm1, %v9712_v60 }
  0x6c   : > { %7719 = vmatprep.mubr.msk.f32.mxu0 %vm631_vm1, %v9716_v52  ;;  %v564_v52 = vrot.slane %v9418_v24, 1 }
  0x6f   : > { %7720 = vmatmul.mubr.msk.f32.gmra.mrb[30].mxu0 %vm631_vm1, %v9723_v45 }
  0x70   : > { %7724 = vmatprep.mubr.msk.f32.mxu0 %vm631_vm1, %v9359_v4 }
  0x73   : > { %7725 = vmatmul.mubr.msk.f32.vlgmr.msra.gmra.mrb[0].mxu0 %vm631_vm1, %v9371_v6  ;;  %v562_v6 = vrot.slane %v9383_v8, 1 }
  0x74   : > { %7727 = vmatprep.mubr.msk.f32.mxu0 %vm631_vm1, %v9375_v7  ;;  %7773 = vmatpush3.msk.msra.mxu0 %vm696_vm0, %v9423_v25  ;;  %v556_v25 = vrot.slane %v9359_v4, 1  ;;  %v561_v4 = vrot.slane %v9375_v7, 1  ;;  %v567_v7 = vrot.slane %v9398_v13, 1 }
  0x75   : > { %7822 = vmatprep.subr.msk.mxu0 %vm696_vm0, %v497_v50  ;;  %v9832_v24 = vsel %vm11624_vm3, %v562_v6, %v564_v52 }
  0x76   : > { %v9805_v45 = vsel %vm11624_vm3, %v556_v25, %v557_v36  ;;  %v9818_v60 = vsel %vm11624_vm3, %v561_v4, %v562_v6  ;;  %v566_v25 = vrot.slane %v9388_v11, 1  ;;  %v569_v36 = vrot.slane %v9439_v31, 1 }
  0x77   : > { %7728 = vmatmul.mubr.msk.f32.gmra.mrb[2].mxu0 %vm631_vm1, %v9383_v8  ;;  %v9825_v8 = vld [vmem:[%s11634_s1 + $0x18] sm:$0xf]  ;;  %v571_v4 = vrot.slane %v9444_v32, 1  ;;  %v574_v31 = vrot.slane %v9463_v39, 1  ;;  %v576_v6 = vrot.slane %v9466_v40, 1 }
  0x78   : > { %7730 = vmatprep.mubr.msk.f32.mxu0 %vm631_vm1, %v9388_v11  ;;  %v9837_v9 = vsel %vm11624_vm3, %v566_v25, %v567_v7  ;;  %v9848_v52 = vsel %vm11624_vm3, %v567_v7, %v569_v36  ;;  %v577_v25 = vrot.slane %v9469_v41, 1  ;;  %v579_v7 = vrot.slane %v9485_v47, 1 }
  0x79   : > { %v581_v36 = vrot.slane %v9488_v48, 1 }
  0x7a   : > { %v9865_v39 = vsel %vm11624_vm3, %v576_v6, %v577_v25  ;;  %v9874_v10 = vsel %vm11624_vm3, %v577_v25, %v579_v7  ;;  %v587_v6 = vrot.slane %v9513_v57, 1  ;;  %v589_v25 = vrot.slane %v9529_v63, 1 }
  0x7b   : > { %7731 = vmatmul.mubr.msk.f32.gmra.mrb[4].mxu0 %vm631_vm1, %v9398_v13  ;;  %v572_v13 = vrot.slane %v9447_v33, 1  ;;  %v591_v7 = vrot.slane %v9532_v1, 1 }
  0x7c   : > { %7733 = vmatprep.mubr.msk.f32.mxu0 %vm631_vm1, %v9444_v32  ;;  %v9900_v27 = vsel %vm11624_vm3, %v587_v6, %v589_v25 }
  0x7d   : > { %v9861_v11 = vsel %vm11624_vm3, %v572_v13, %v574_v31  ;;  %v586_v31 = vrot.slane %v9510_v56, 1 }
  0x7f   : > { %7734 = vmatmul.mubr.msk.f32.gmra.mrb[6].mxu0 %vm631_vm1, %v9447_v33 }
  0x80   : > { %7736 = vmatprep.mubr.msk.f32.mxu0 %vm631_vm1, %v9466_v40 }
  0x83   : > { %7737 = vmatmul.mubr.msk.f32.gmra.mrb[8].mxu0 %vm631_vm1, %v9469_v41 }
  0x84   : > { %7739 = vmatprep.mubr.msk.f32.mxu0 %vm631_vm1, %v9488_v48 }
  0x87   : > { %7740 = vmatmul.mubr.msk.f32.gmra.mrb[10].mxu0 %vm631_vm1, %v9491_v49 }
  0x88   : > { %7742 = vmatprep.mubr.msk.f32.mxu0 %vm631_vm1, %v9510_v56 }
  0x8b   : > { %7743 = vmatmul.mubr.msk.f32.gmra.mrb[12].mxu0 %vm631_vm1, %v9513_v57 }
  0x8c   : > { %7745 = vmatprep.mubr.msk.f32.mxu0 %vm631_vm1, %v9532_v1 }
  0x8f   : > { %7746 = vmatmul.mubr.msk.f32.gmra.mrb[14].mxu0 %vm631_vm1, %v9535_v5 }
  0x90   : > { %7748 = vmatprep.mubr.msk.f32.mxu0 %vm631_vm1, %v9554_v19 }
  0x93   : > { %7749 = vmatmul.mubr.msk.f32.gmra.mrb[16].mxu0 %vm631_vm1, %v9557_v20 }
  0x94   : > { %7751 = vmatprep.mubr.msk.f32.mxu0 %vm631_vm1, %v9576_v37 }
  0x97   : > { %7752 = vmatmul.mubr.msk.f32.gmra.mrb[18].mxu0 %vm631_vm1, %v9579_v38 }
  0x98   : > { %7754 = vmatprep.mubr.msk.f32.mxu0 %vm631_vm1, %v9598_v59 }
  0x9b   : > { %7755 = vmatmul.mubr.msk.f32.gmra.mrb[20].mxu0 %vm631_vm1, %v9601_v61 }
  0x9c   : > { %7757 = vmatprep.mubr.msk.f32.mxu0 %vm631_vm1, %v9620_v43 }
  0x9f   : > { %7758 = vmatmul.mubr.msk.f32.gmra.mrb[22].mxu0 %vm631_vm1, %v9623_v46 }
  0xa0   : > { %7760 = vmatprep.mubr.msk.f32.mxu0 %vm631_vm1, %v9642_v62 }
  0xa3   : > { %7761 = vmatmul.mubr.msk.f32.gmra.mrb[24].mxu0 %vm631_vm1, %v9645_v15 }
  0xa4   : > { %7763 = vmatprep.mubr.msk.f32.mxu0 %vm631_vm1, %v9664_v30 }
  0xa7   : > { %7764 = vmatmul.mubr.msk.f32.gmra.mrb[26].mxu0 %vm631_vm1, %v9667_v51 }
  0xa8   : > { %7766 = vmatprep.mubr.msk.f32.mxu0 %vm631_vm1, %v9686_v42 }
  0xab   : > { %7767 = vmatmul.mubr.msk.f32.gmra.mrb[28].mxu0 %vm631_vm1, %v9689_v53 }
  0xac   : > { %7769 = vmatprep.mubr.msk.f32.mxu0 %vm631_vm1, %v9794_v16 }
  0xaf   : > { %7770 = vmatmul.mubr.msk.f32.gmra.mrb[30].mxu0 %vm631_vm1, %v9802_v23 }
  0xb0   : > { %7774 = vmatprep.mubr.msk.f32.mxu0 %vm631_vm1, %v9805_v45 }
  0xb3   : > { %7775 = vmatmul.mubr.msk.f32.vlgmr.msra.gmra.mrb[0].mxu0 %vm631_vm1, %v9814_v18 }
  0xb4   : > { %7777 = vmatprep.mubr.msk.f32.mxu0 %vm631_vm1, %v9818_v60  ;;  %7823 = vmatpush3.msk.msra.mxu0 %vm696_vm0, %v497_v50  ;;  %v9852_v50 = vsel %vm11624_vm3, %v571_v4, %v572_v13  ;;  %v582_v4 = vrot.slane %v9491_v49, 1  ;;  %v584_v13 = vrot.slane %v9507_v55, 1  ;;  %v9891_v55 = vsel %vm11624_vm3, %v586_v31, %v587_v6 }
  0xb5   : > { %7872 = vmatprep.subr.msk.mxu0 %vm696_vm0, %v9825_v8  ;;  %v597_v31 = vrot.slane %v9557_v20, 1  ;;  %v602_v20 = vrot.slane %v9579_v38, 1  ;;  %v606_v38 = vrot.slane %v9598_v59, 1 }
  0xb6   : > { %v9878_v47 = vsel %vm11624_vm3, %v581_v36, %v582_v4  ;;  %v9887_v22 = vsel %vm11624_vm3, %v582_v4, %v584_v13  ;;  %v592_v36 = vrot.slane %v9535_v5, 1  ;;  %v594_v4 = vrot.slane %v9551_v17, 1 }
  0xb7   : > { %7778 = vmatmul.mubr.msk.f32.gmra.mrb[2].mxu0 %vm631_vm1, %v9832_v24  ;;  %v596_v13 = vrot.slane %v9554_v19, 1  ;;  %v551_v5 = vrot.slane %v9353_v2, 1  ;;  %v599_v17 = vrot.slane %v9573_v35, 1  ;;  %v552_v19 = vrot.slane %v9356_v3, 1  ;;  %v493_v2 = vld [vmem:[%s11634_s1 + $0x4] sm:$0xf] }
  0xb8   : > { %7780 = vmatprep.mubr.msk.f32.mxu0 %vm631_vm1, %v9837_v9  ;;  %v9904_v63 = vsel %vm11624_vm3, %v591_v7, %v592_v36  ;;  %v9914_v6 = vsel %vm11624_vm3, %v592_v36, %v594_v4  ;;  %v601_v7 = vrot.slane %v9576_v37, 1  ;;  %v554_v36 = vrot.slane %v9391_v12, 1  ;;  %7572 = vmatprep.subr.msk.mxu1 %vm696_vm0, %v493_v2 }
  0xb9   : > { %v9918_v25 = vsel %vm11624_vm3, %v596_v13, %v597_v31  ;;  %v9932_v35 = vsel %vm11624_vm3, %v597_v31, %v599_v17  ;;  %v604_v4 = vrot.slane %v9595_v54, 1  ;;  %v553_v3 = vsel %vm11624_vm3, %v551_v5, %v552_v19  ;;  %7573 = vmatpush3.msk.msra.mxu1 %vm696_vm0, %v493_v2 }
  0xba   : > { %v9938_v13 = vsel %vm11624_vm3, %v601_v7, %v602_v20  ;;  %v607_v37 = vrot.slane %v9601_v61, 1  ;;  %7574 = vmatprep.mubr.msk.f32.mxu1 %vm631_vm1, %v553_v3  ;;  %v555_v12 = vsel %vm11624_vm3, %v552_v19, %v554_v36  ;;  %8773 = vmatprep.subr.msk.mxu1 %vm696_vm0, %v9335_v0  ;;  %v609_v54 = vrot.slane %v9617_v29, 1 }
  0xbb   : > { %7781 = vmatmul.mubr.msk.f32.gmra.mrb[4].mxu0 %vm631_vm1, %v9848_v52  ;;  %7575 = vmatmul.mubr.msk.f32.vlgmr.msra.gmra.mrb[0].mxu1 %vm631_vm1, %v555_v12  ;;  %v9955_v5 = vsel %vm11624_vm3, %v602_v20, %v604_v4  ;;  %v611_v31 = vrot.slane %v9620_v43, 1  ;;  %v612_v17 = vrot.slane %v9623_v46, 1  ;;  %v614_v20 = vrot.slane %v9639_v14, 1 }
  0xbc   : > { %7783 = vmatprep.mubr.msk.f32.mxu0 %vm631_vm1, %v9852_v50  ;;  %7577 = vmatprep.mubr.msk.f32.mxu1 %vm631_vm1, %v9805_v45  ;;  %v9961_v19 = vsel %vm11624_vm3, %v606_v38, %v607_v37  ;;  %v616_v29 = vrot.slane %v9642_v62, 1  ;;  %v617_v45 = vrot.slane %v9645_v15, 1  ;;  %v621_v7 = vrot.slane %v9664_v30, 1 }
  0xbd   : > { %8774 = vmatpush3.msk.msra.mxu1 %vm696_vm0, %v9335_v0  ;;  %v9974_v0 = vsel %vm11624_vm3, %v607_v37, %v609_v54  ;;  %v9978_v38 = vsel %vm11624_vm3, %v611_v31, %v612_v17  ;;  %v9991_v14 = vsel %vm11624_vm3, %v612_v17, %v614_v20  ;;  %v619_v37 = vrot.slane %v9661_v58, 1 }
  0xbe   : > { %v622_v2 = vrot.slane %v9667_v51, 1  ;;  %v624_v36 = vrot.slane %v9683_v44, 1  ;;  %v626_v3 = vrot.slane %v9686_v42, 1  ;;  %v627_v12 = vrot.slane %v9689_v53, 1 }
  0xbf   : > { %7784 = vmatmul.mubr.msk.f32.gmra.mrb[6].mxu0 %vm631_vm1, %v9861_v11  ;;  %7578 = vmatmul.mubr.msk.f32.gmra.mrb[2].mxu1 %vm631_vm1, %v9814_v18  ;;  %v9995_v18 = vsel %vm11624_vm3, %v616_v29, %v617_v45  ;;  %v10008_v58 = vsel %vm11624_vm3, %v617_v45, %v619_v37  ;;  %v629_v54 = vrot.slane %v9705_v34, 1  ;;  %v1889_v31 = vrot.slane %v9794_v16, 1  ;;  %v10034_v29 = vld [vmem:[%s9350_s20 + $0x190] sm:$0x3] }
  0xc0   : > { %7786 = vmatprep.mubr.msk.f32.mxu0 %vm631_vm1, %v9865_v39  ;;  %7580 = vmatprep.mubr.msk.f32.mxu1 %vm631_vm1, %v9818_v60  ;;  %v10012_v4 = vsel %vm11624_vm3, %v621_v7, %v622_v2  ;;  %v10025_v44 = vsel %vm11624_vm3, %v622_v2, %v624_v36  ;;  %v1890_v17 = vrot.slane %v9802_v23, 1  ;;  %v10031_v20 = vsel %vm11624_vm3, %v626_v3, %v627_v12  ;;  %v10073_v2 = vld [vmem:[%s11634_s1 + $0x1c] sm:$0xf]  ;;  %v11678_v3 = vld [vmem:[#allocation15_spill] sm:$0xff] }
  0xc1   : > { %v10045_v34 = vsel %vm11624_vm3, %v627_v12, %v629_v54  ;;  %v1892_v45 = vrot.slane %v10034_v29, 1  ;;  %v11676_v36 = vld [vmem:[#allocation13_spill] sm:$0xff]  ;;  %v11679_v12 = vld [vmem:[#allocation16_spill] sm:$0xff] }
  0xc2   : > { %v10049_v37 = vsel %vm11624_vm3, %v1889_v31, %v1890_v17  ;;  %v11680_v54 = vld [vmem:[#allocation17_spill] sm:$0xff]  ;;  %v11681_v31 = vld [vmem:[#allocation18_spill] sm:$0xff] }
  0xc3   : > { %7787 = vmatmul.mubr.msk.f32.gmra.mrb[8].mxu0 %vm631_vm1, %v9874_v10  ;;  %7581 = vmatmul.mubr.msk.f32.gmra.mrb[4].mxu1 %vm631_vm1, %v9832_v24  ;;  %v10060_v7 = vsel %vm11624_vm3, %v1890_v17, %v1892_v45  ;;  %v11682_v17 = vld [vmem:[#allocation20_spill] sm:$0xff]  ;;  %v11683_v45 = vld [vmem:[#allocation21_spill] sm:$0xff] }
  0xc4   : > { %7789 = vmatprep.mubr.msk.f32.mxu0 %vm631_vm1, %v9878_v47  ;;  %7583 = vmatprep.mubr.msk.f32.mxu1 %vm631_vm1, %v9837_v9  ;;  %11673 = vst [vmem:[#allocation43_spill] sm:$0xff] %v10060_v7 }
  0xc7   : > { %7790 = vmatmul.mubr.msk.f32.gmra.mrb[10].mxu0 %vm631_vm1, %v9887_v22  ;;  %7584 = vmatmul.mubr.msk.f32.gmra.mrb[6].mxu1 %vm631_vm1, %v9848_v52 }
  0xc8   : > { %7792 = vmatprep.mubr.msk.f32.mxu0 %vm631_vm1, %v9891_v55  ;;  %7586 = vmatprep.mubr.msk.f32.mxu1 %vm631_vm1, %v9852_v50 }
  0xcb   : > { %7793 = vmatmul.mubr.msk.f32.gmra.mrb[12].mxu0 %vm631_vm1, %v9900_v27  ;;  %7587 = vmatmul.mubr.msk.f32.gmra.mrb[8].mxu1 %vm631_vm1, %v9861_v11 }
  0xcc   : > { %7795 = vmatprep.mubr.msk.f32.mxu0 %vm631_vm1, %v9904_v63  ;;  %7589 = vmatprep.mubr.msk.f32.mxu1 %vm631_vm1, %v9865_v39 }
  0xcf   : > { %7796 = vmatmul.mubr.msk.f32.gmra.mrb[14].mxu0 %vm631_vm1, %v9914_v6  ;;  %7590 = vmatmul.mubr.msk.f32.gmra.mrb[10].mxu1 %vm631_vm1, %v9874_v10 }
  0xd0   : > { %7798 = vmatprep.mubr.msk.f32.mxu0 %vm631_vm1, %v9918_v25  ;;  %7592 = vmatprep.mubr.msk.f32.mxu1 %vm631_vm1, %v9878_v47 }
  0xd3   : > { %7799 = vmatmul.mubr.msk.f32.gmra.mrb[16].mxu0 %vm631_vm1, %v9932_v35  ;;  %7593 = vmatmul.mubr.msk.f32.gmra.mrb[12].mxu1 %vm631_vm1, %v9887_v22 }
  0xd4   : > { %7801 = vmatprep.mubr.msk.f32.mxu0 %vm631_vm1, %v9938_v13  ;;  %7595 = vmatprep.mubr.msk.f32.mxu1 %vm631_vm1, %v9891_v55 }
  0xd7   : > { %7802 = vmatmul.mubr.msk.f32.gmra.mrb[18].mxu0 %vm631_vm1, %v9955_v5  ;;  %7596 = vmatmul.mubr.msk.f32.gmra.mrb[14].mxu1 %vm631_vm1, %v9900_v27 }
  0xd8   : > { %7804 = vmatprep.mubr.msk.f32.mxu0 %vm631_vm1, %v9961_v19  ;;  %7598 = vmatprep.mubr.msk.f32.mxu1 %vm631_vm1, %v9904_v63 }
  0xdb   : > { %7805 = vmatmul.mubr.msk.f32.gmra.mrb[20].mxu0 %vm631_vm1, %v9974_v0  ;;  %7599 = vmatmul.mubr.msk.f32.gmra.mrb[16].mxu1 %vm631_vm1, %v9914_v6 }
  0xdc   : > { %7807 = vmatprep.mubr.msk.f32.mxu0 %vm631_vm1, %v9978_v38  ;;  %7601 = vmatprep.mubr.msk.f32.mxu1 %vm631_vm1, %v9918_v25 }
  0xdf   : > { %7808 = vmatmul.mubr.msk.f32.gmra.mrb[22].mxu0 %vm631_vm1, %v9991_v14  ;;  %7602 = vmatmul.mubr.msk.f32.gmra.mrb[18].mxu1 %vm631_vm1, %v9932_v35 }
  0xe0   : > { %7810 = vmatprep.mubr.msk.f32.mxu0 %vm631_vm1, %v9995_v18  ;;  %7604 = vmatprep.mubr.msk.f32.mxu1 %vm631_vm1, %v9938_v13 }
  0xe3   : > { %7811 = vmatmul.mubr.msk.f32.gmra.mrb[24].mxu0 %vm631_vm1, %v10008_v58  ;;  %7605 = vmatmul.mubr.msk.f32.gmra.mrb[20].mxu1 %vm631_vm1, %v9955_v5 }
  0xe4   : > { %7813 = vmatprep.mubr.msk.f32.mxu0 %vm631_vm1, %v10012_v4  ;;  %7607 = vmatprep.mubr.msk.f32.mxu1 %vm631_vm1, %v9961_v19 }
  0xe7   : > { %7814 = vmatmul.mubr.msk.f32.gmra.mrb[26].mxu0 %vm631_vm1, %v10025_v44  ;;  %7608 = vmatmul.mubr.msk.f32.gmra.mrb[22].mxu1 %vm631_vm1, %v9974_v0 }
  0xe8   : > { %7816 = vmatprep.mubr.msk.f32.mxu0 %vm631_vm1, %v10031_v20  ;;  %7610 = vmatprep.mubr.msk.f32.mxu1 %vm631_vm1, %v9978_v38 }
  0xeb   : > { %7817 = vmatmul.mubr.msk.f32.gmra.mrb[28].mxu0 %vm631_vm1, %v10045_v34  ;;  %7611 = vmatmul.mubr.msk.f32.gmra.mrb[24].mxu1 %vm631_vm1, %v9991_v14 }
  0xec   : > { %7819 = vmatprep.mubr.msk.f32.mxu0 %vm631_vm1, %v10049_v37  ;;  %7613 = vmatprep.mubr.msk.f32.mxu1 %vm631_vm1, %v9995_v18 }
  0xef   : > { %7820 = vmatmul.mubr.msk.f32.gmra.mrb[30].mxu0 %vm631_vm1, %v10060_v7  ;;  %7614 = vmatmul.mubr.msk.f32.gmra.mrb[26].mxu1 %vm631_vm1, %v10008_v58  ;;  %v11705_v7 = vld [vmem:[#allocation42_spill] sm:$0xff] }
  0xf0   : > { %7824 = vmatprep.mubr.msk.f32.mxu0 %vm631_vm1, %v9413_v21  ;;  %v11674_v21 = vld [vmem:[#allocation11_spill] sm:$0xff]  ;;  %7616 = vmatprep.mubr.msk.f32.mxu1 %vm631_vm1, %v10012_v4 }
  0xf3   : > { %7825 = vmatmul.mubr.msk.f32.vlgmr.msra.gmra.mrb[0].mxu0 %vm631_vm1, %v9429_v26  ;;  %v11675_v26 = vld [vmem:[#allocation12_spill] sm:$0xff]  ;;  %7617 = vmatmul.mubr.msk.f32.gmra.mrb[28].mxu1 %vm631_vm1, %v10025_v44 }
  0xf4   : > { %7827 = vmatprep.mubr.msk.f32.mxu0 %vm631_vm1, %v9434_v28  ;;  %7873 = vmatpush3.msk.msra.mxu0 %vm696_vm0, %v9825_v8  ;;  %v11677_v8 = vld [vmem:[#allocation14_spill] sm:$0xff]  ;;  %v11704_v28 = vld [vmem:[#allocation27_spill] sm:$0xff] }
  0xf5   : > { %7922 = vmatprep.subr.msk.mxu0 %vm696_vm0, %v10073_v2  ;;  %7619 = vmatprep.mubr.msk.f32.mxu1 %vm631_vm1, %v10031_v20 }
  0xf7   : > { %7828 = vmatmul.mubr.msk.f32.gmra.mrb[2].mxu0 %vm631_vm1, %v11674_v21  ;;  %7620 = vmatmul.mubr.msk.f32.gmra.mrb[30].mxu1 %vm631_vm1, %v10045_v34  ;;  %v2161_v21 = vrot.slane %v10034_v29, 2  ;;  %v11706_v29 = vld [vmem:[#allocation6_spill] sm:$0xff] }
  0xf8   : > { %7830 = vmatprep.mubr.msk.f32.mxu0 %vm631_vm1, %v11675_v26  ;;  %7636 = vmatprep.mubr.msk.f32.mxu1 %vm631_vm1, %v9444_v32  ;;  %v11702_v26 = vld [vmem:[#allocation26_spill] sm:$0xff] }
  0xfb   : > { %7831 = vmatmul.mubr.msk.f32.gmra.mrb[4].mxu0 %vm631_vm1, %v11676_v36  ;;  %7637 = vmatmul.mubr.msk.f32.vlgmr.msra.gmra.mrb[8].mxu1 %vm631_vm1, %v9447_v33  ;;  %v11700_v36 = vld [vmem:[#allocation23_spill] sm:$0xff] }
  0xfc   : > { %7833 = vmatprep.mubr.msk.f32.mxu0 %vm631_vm1, %v11677_v8  ;;  %7639 = vmatprep.mubr.msk.f32.mxu1 %vm631_vm1, %v9466_v40  ;;  %v2159_v8 = vrot.slane %v9802_v23, 2 }
  0xff   : > { %7834 = vmatmul.mubr.msk.f32.gmra.mrb[6].mxu0 %vm631_vm1, %v11678_v3  ;;  %7640 = vmatmul.mubr.msk.f32.gmra.mrb[10].mxu1 %vm631_vm1, %v9469_v41  ;;  %v11698_v3 = vld [vmem:[#allocation22_spill] sm:$0xff] }
 0x100   : > { %7836 = vmatprep.mubr.msk.f32.mxu0 %vm631_vm1, %v11679_v12  ;;  %7642 = vmatprep.mubr.msk.f32.mxu1 %vm631_vm1, %v9488_v48  ;;  %v11696_v12 = vld [vmem:[#allocation19_spill] sm:$0xff] }
 0x103   : > { %7837 = vmatmul.mubr.msk.f32.gmra.mrb[8].mxu0 %vm631_vm1, %v11680_v54  ;;  %v11684_v54 = vld [vmem:[#allocation24_spill] sm:$0xff]  ;;  %7643 = vmatmul.mubr.msk.f32.gmra.mrb[12].mxu1 %vm631_vm1, %v9491_v49 }
 0x104   : > { %7839 = vmatprep.mubr.msk.f32.mxu0 %vm631_vm1, %v11681_v31  ;;  %v11685_v31 = vld [vmem:[#allocation25_spill] sm:$0xff]  ;;  %7645 = vmatprep.mubr.msk.f32.mxu1 %vm631_vm1, %v9510_v56 }
 0x107   : > { %7840 = vmatmul.mubr.msk.f32.gmra.mrb[10].mxu0 %vm631_vm1, %v11682_v17  ;;  %v11686_v17 = vld [vmem:[#allocation28_spill] sm:$0xff]  ;;  %7646 = vmatmul.mubr.msk.f32.gmra.mrb[14].mxu1 %vm631_vm1, %v9513_v57 }
 0x108   : > { %7842 = vmatprep.mubr.msk.f32.mxu0 %vm631_vm1, %v11683_v45  ;;  %v11687_v45 = vld [vmem:[#allocation29_spill] sm:$0xff]  ;;  %7648 = vmatprep.mubr.msk.f32.mxu1 %vm631_vm1, %v9532_v1 }
 0x10b   : > { %7843 = vmatmul.mubr.msk.f32.gmra.mrb[12].mxu0 %vm631_vm1, %v11684_v54  ;;  %v11688_v54 = vld [vmem:[#allocation30_spill] sm:$0xff]  ;;  %7649 = vmatmul.mubr.msk.f32.gmra.mrb[16].mxu1 %vm631_vm1, %v11696_v12 }
 0x10c   : > { %7845 = vmatprep.mubr.msk.f32.mxu0 %vm631_vm1, %v11685_v31  ;;  %v11689_v31 = vld [vmem:[#allocation31_spill] sm:$0xff]  ;;  %7651 = vmatprep.mubr.msk.f32.mxu1 %vm631_vm1, %v11698_v3 }
 0x10f   : > { %7846 = vmatmul.mubr.msk.f32.gmra.mrb[14].mxu0 %vm631_vm1, %v11686_v17  ;;  %v11690_v17 = vld [vmem:[#allocation32_spill] sm:$0xff]  ;;  %7652 = vmatmul.mubr.msk.f32.gmra.mrb[18].mxu1 %vm631_vm1, %v11700_v36 }
 0x110   : > { %7848 = vmatprep.mubr.msk.f32.mxu0 %vm631_vm1, %v11687_v45  ;;  %v11691_v45 = vld [vmem:[#allocation33_spill] sm:$0xff]  ;;  %7654 = vmatprep.mubr.msk.f32.mxu1 %vm631_vm1, %v11702_v26 }
 0x113   : > { %7849 = vmatmul.mubr.msk.f32.gmra.mrb[16].mxu0 %vm631_vm1, %v11688_v54  ;;  %v11692_v54 = vld [vmem:[#allocation34_spill] sm:$0xff]  ;;  %7655 = vmatmul.mubr.msk.f32.gmra.mrb[20].mxu1 %vm631_vm1, %v11704_v28 }
 0x114   : > { %7851 = vmatprep.mubr.msk.f32.mxu0 %vm631_vm1, %v11689_v31  ;;  %v11693_v31 = vld [vmem:[#allocation35_spill] sm:$0xff]  ;;  %7657 = vmatprep.mubr.msk.f32.mxu1 %vm631_vm1, %v9598_v59 }
 0x117   : > { %7852 = vmatmul.mubr.msk.f32.gmra.mrb[18].mxu0 %vm631_vm1, %v11690_v17  ;;  %v11694_v17 = vld [vmem:[#allocation36_spill] sm:$0xff]  ;;  %7658 = vmatmul.mubr.msk.f32.gmra.mrb[22].mxu1 %vm631_vm1, %v9601_v61 }
 0x118   : > { %7854 = vmatprep.mubr.msk.f32.mxu0 %vm631_vm1, %v11691_v45  ;;  %v11695_v45 = vld [vmem:[#allocation37_spill] sm:$0xff]  ;;  %7660 = vmatprep.mubr.msk.f32.mxu1 %vm631_vm1, %v9620_v43 }
 0x11b   : > { %7855 = vmatmul.mubr.msk.f32.gmra.mrb[20].mxu0 %vm631_vm1, %v11692_v54  ;;  %v11697_v54 = vld [vmem:[#allocation38_spill] sm:$0xff]  ;;  %7661 = vmatmul.mubr.msk.f32.gmra.mrb[24].mxu1 %vm631_vm1, %v9623_v46 }
 0x11c   : > { %7857 = vmatprep.mubr.msk.f32.mxu0 %vm631_vm1, %v11693_v31  ;;  %v11699_v31 = vld [vmem:[#allocation39_spill] sm:$0xff]  ;;  %7663 = vmatprep.mubr.msk.f32.mxu1 %vm631_vm1, %v9642_v62 }
 0x11f   : > { %7858 = vmatmul.mubr.msk.f32.gmra.mrb[22].mxu0 %vm631_vm1, %v11694_v17  ;;  %v2158_v17 = vrot.slane %v9794_v16, 2  ;;  %7664 = vmatmul.mubr.msk.f32.gmra.mrb[26].mxu1 %vm631_vm1, %v9645_v15 }
 0x120   : > { %7860 = vmatprep.mubr.msk.f32.mxu0 %vm631_vm1, %v11695_v45  ;;  %v11701_v45 = vld [vmem:[#allocation40_spill] sm:$0xff]  ;;  %7666 = vmatprep.mubr.msk.f32.mxu1 %vm631_vm1, %v9664_v30 }
 0x123   : > { %7861 = vmatmul.mubr.msk.f32.gmra.mrb[24].mxu0 %vm631_vm1, %v11697_v54  ;;  %v11703_v54 = vld [vmem:[#allocation41_spill] sm:$0xff]  ;;  %7667 = vmatmul.mubr.msk.f32.gmra.mrb[28].mxu1 %vm631_vm1, %v9667_v51 }
 0x124   : > { %7863 = vmatprep.mubr.msk.f32.mxu0 %vm631_vm1, %v11699_v31  ;;  %v10195_v31 = vsel %vm11623_vm2, %v2158_v17, %v2159_v8  ;;  %v500_v17 = vld [vmem:[%s11634_s1 + $0x20] sm:$0xf]  ;;  %7669 = vmatprep.mubr.msk.f32.mxu1 %vm631_vm1, %v9686_v42  ;;  %s9149_s1 = sshll.u32 %s9213_s29, 4  ;;  %s9150_s1 = int_to_ptr.vmem [resolvable:$false] %s9149_s1 }
 0x125   : > { %p9152_p0 = scmp.lt.s32.totalorder %s11499_s16, %s9150_s1 }
 0x127   : > { %7864 = vmatmul.mubr.msk.f32.gmra.mrb[26].mxu0 %vm631_vm1, %v11701_v45  ;;  %v10206_v45 = vsel %vm11623_vm2, %v2159_v8, %v2161_v21  ;;  %v11707_v21 = vld [vmem:[#allocation7_spill] sm:$0xff]  ;;  %v11708_v8 = vld [vmem:[#allocation8_spill] sm:$0xff]  ;;  %7670 = vmatmul.mubr.msk.f32.gmra.mrb[30].mxu1 %vm631_vm1, %v9689_v53 }
 0x128   : > { %7866 = vmatprep.mubr.msk.f32.mxu0 %vm631_vm1, %v11703_v54 }
 0x12b   : > { %7867 = vmatmul.mubr.msk.f32.gmra.mrb[28].mxu0 %vm631_vm1, %v11705_v7 }
 0x12c   : > { %7869 = vmatprep.mubr.msk.f32.mxu0 %vm631_vm1, %v10195_v31 }
 0x12f   : > { %7870 = vmatmul.mubr.msk.f32.gmra.mrb[30].mxu0 %vm631_vm1, %v10206_v45 }
 0x130   : > { %7874 = vmatprep.mubr.msk.f32.mxu0 %vm631_vm1, %v11706_v29  ;;  %v11709_v29 = vld [vmem:[#allocation9_spill] sm:$0xff] }
 0x133   : > { %7875 = vmatmul.mubr.msk.f32.vlgmr.msra.gmra.mrb[0].mxu0 %vm631_vm1, %v11707_v21 }
 0x134   : > { %7877 = vmatprep.mubr.msk.f32.mxu0 %vm631_vm1, %v11708_v8  ;;  %7923 = vmatpush3.msk.msra.mxu0 %vm696_vm0, %v10073_v2 }
 0x135   : > { %7972 = vmatprep.subr.msk.mxu0 %vm696_vm0, %v500_v17 }
 0x137   : > { %7878 = vmatmul.mubr.msk.f32.gmra.mrb[2].mxu0 %vm631_vm1, %v11709_v29 }
 0x138   : > { %7880 = vmatprep.mubr.msk.f32.mxu0 %vm631_vm1, %v9444_v32  ;;  %v10300_v32 = vld [vmem:[%s9350_s20 + $0x1a0] sm:$0xff] }
 0x13b   : > { %7881 = vmatmul.mubr.msk.f32.gmra.mrb[4].mxu0 %vm631_vm1, %v9447_v33  ;;  %v2695_v33 = vrot.slane %v10300_v32, 1 }
 0x13c   : > { %7883 = vmatprep.mubr.msk.f32.mxu0 %vm631_vm1, %v9466_v40  ;;  %v491_v40 = vld [vmem:[%s9350_s20 + $0x1a8] sm:$0x3] }
 0x13f   : > { %7884 = vmatmul.mubr.msk.f32.gmra.mrb[6].mxu0 %vm631_vm1, %v9469_v41 }
 0x140   : > { %7886 = vmatprep.mubr.msk.f32.mxu0 %vm631_vm1, %v9488_v48  ;;  %v2697_v48 = vrot.slane %v491_v40, 1 }
 0x143   : > { %7887 = vmatmul.mubr.msk.f32.gmra.mrb[8].mxu0 %vm631_vm1, %v9491_v49 }
 0x144   : > { %7889 = vmatprep.mubr.msk.f32.mxu0 %vm631_vm1, %v9510_v56 }
 0x147   : > { %7890 = vmatmul.mubr.msk.f32.gmra.mrb[10].mxu0 %vm631_vm1, %v9513_v57 }
 0x148   : > { %7892 = vmatprep.mubr.msk.f32.mxu0 %vm631_vm1, %v9532_v1  ;;  %v11710_v1 = vld [vmem:[#allocation43_spill] sm:$0xff] }
 0x14b   : > { %7893 = vmatmul.mubr.msk.f32.gmra.mrb[12].mxu0 %vm631_vm1, %v11696_v12 }
 0x14c   : > { %7895 = vmatprep.mubr.msk.f32.mxu0 %vm631_vm1, %v11698_v3 }
 0x14f   : > { %7896 = vmatmul.mubr.msk.f32.gmra.mrb[14].mxu0 %vm631_vm1, %v11700_v36 }
 0x150   : > { %7898 = vmatprep.mubr.msk.f32.mxu0 %vm631_vm1, %v11702_v26 }
 0x153   : > { %7899 = vmatmul.mubr.msk.f32.gmra.mrb[16].mxu0 %vm631_vm1, %v11704_v28  ;;  %v10293_v28 = vld [vmem:[%s9350_s20 + $0x198] sm:$0xff] }
 0x154   : > { %7901 = vmatprep.mubr.msk.f32.mxu0 %vm631_vm1, %v9598_v59 }
 0x157   : > { %7902 = vmatmul.mubr.msk.f32.gmra.mrb[18].mxu0 %vm631_vm1, %v9601_v61  ;;  %v11711_v61 = vld [vmem:[#allocation10_spill] sm:$0xff] }
 0x158   : > { %7904 = vmatprep.mubr.msk.f32.mxu0 %vm631_vm1, %v9620_v43  ;;  %v2698_v43 = vsel %vm11624_vm3, %v2695_v33, %v2697_v48 }
 0x15b   : > { %7905 = vmatmul.mubr.msk.f32.gmra.mrb[20].mxu0 %vm631_vm1, %v9623_v46 }
 0x15c   : > { %7907 = vmatprep.mubr.msk.f32.mxu0 %vm631_vm1, %v9642_v62 }
 0x15f   : > { %7908 = vmatmul.mubr.msk.f32.gmra.mrb[22].mxu0 %vm631_vm1, %v9645_v15 }
 0x160   : > { %7910 = vmatprep.mubr.msk.f32.mxu0 %vm631_vm1, %v9664_v30  ;;  %v11712_v30 = vld [vmem:[#allocation11_spill] sm:$0xff] }
 0x163   : > { %7911 = vmatmul.mubr.msk.f32.gmra.mrb[24].mxu0 %vm631_vm1, %v9667_v51  ;;  %v11713_v51 = vld [vmem:[#allocation12_spill] sm:$0xff] }
 0x164   : > { %7913 = vmatprep.mubr.msk.f32.mxu0 %vm631_vm1, %v9686_v42 }
 0x167   : > { %7914 = vmatmul.mubr.msk.f32.gmra.mrb[26].mxu0 %vm631_vm1, %v9689_v53  ;;  %v11714_v53 = vld [vmem:[#allocation13_spill] sm:$0xff] }
 0x168   : > { %7916 = vmatprep.mubr.msk.f32.mxu0 %vm631_vm1, %v9794_v16  ;;  %v11719_v16 = vld [vmem:[#allocation18_spill] sm:$0xff] }
 0x16b   : > { %7917 = vmatmul.mubr.msk.f32.gmra.mrb[28].mxu0 %vm631_vm1, %v9802_v23  ;;  %v11720_v23 = vld [vmem:[#allocation20_spill] sm:$0xff] }
 0x16c   : > { %7919 = vmatprep.mubr.msk.f32.mxu0 %vm631_vm1, %v10293_v28 }
 0x16f   : > { %7920 = vmatmul.mubr.msk.f32.gmra.mrb[30].mxu0 %vm631_vm1, %v10300_v32 }
 0x170   : > { %7924 = vmatprep.mubr.msk.f32.mxu0 %vm631_vm1, %v9818_v60  ;;  %v11718_v60 = vld [vmem:[#allocation17_spill] sm:$0xff] }
 0x173   : > { %7925 = vmatmul.mubr.msk.f32.vlgmr.msra.gmra.mrb[0].mxu0 %vm631_vm1, %v9832_v24  ;;  %v11721_v24 = vld [vmem:[#allocation21_spill] sm:$0xff] }
 0x174   : > { %7927 = vmatprep.mubr.msk.f32.mxu0 %vm631_vm1, %v9837_v9  ;;  %7973 = vmatpush3.msk.msra.mxu0 %vm696_vm0, %v500_v17  ;;  %v11722_v9 = vld [vmem:[#allocation24_spill] sm:$0xff] }
 0x177   : > { %7928 = vmatmul.mubr.msk.f32.gmra.mrb[2].mxu0 %vm631_vm1, %v9848_v52  ;;  %v11723_v52 = vld [vmem:[#allocation25_spill] sm:$0xff] }
 0x178   : > { %7930 = vmatprep.mubr.msk.f32.mxu0 %vm631_vm1, %v9852_v50  ;;  %v11724_v50 = vld [vmem:[#allocation28_spill] sm:$0xff] }
 0x17b   : > { %7931 = vmatmul.mubr.msk.f32.gmra.mrb[4].mxu0 %vm631_vm1, %v9861_v11  ;;  %v2694_v11 = vrot.slane %v10293_v28, 1 }
 0x17c   : > { %7933 = vmatprep.mubr.msk.f32.mxu0 %vm631_vm1, %v9865_v39  ;;  %v11725_v39 = vld [vmem:[#allocation29_spill] sm:$0xff] }
 0x17d   : > { %v2696_v49 = vsel %vm11624_vm3, %v2694_v11, %v2695_v33 }
 0x17f   : > { %7934 = vmatmul.mubr.msk.f32.gmra.mrb[6].mxu0 %vm631_vm1, %v9874_v10  ;;  %v11717_v10 = vld [vmem:[#allocation16_spill] sm:$0xff] }
 0x180   : > { %7936 = vmatprep.mubr.msk.f32.mxu0 %vm631_vm1, %v9878_v47  ;;  %v11726_v47 = vld [vmem:[#allocation30_spill] sm:$0xff] }
 0x183   : > { %7937 = vmatmul.mubr.msk.f32.gmra.mrb[8].mxu0 %vm631_vm1, %v9887_v22  ;;  %v11716_v22 = vld [vmem:[#allocation15_spill] sm:$0xff] }
 0x184   : > { %7939 = vmatprep.mubr.msk.f32.mxu0 %vm631_vm1, %v9891_v55  ;;  %v11727_v55 = vld [vmem:[#allocation31_spill] sm:$0xff] }
 0x187   : > { %7940 = vmatmul.mubr.msk.f32.gmra.mrb[10].mxu0 %vm631_vm1, %v9900_v27  ;;  %v11715_v27 = vld [vmem:[#allocation14_spill] sm:$0xff] }
 0x188   : > { %7942 = vmatprep.mubr.msk.f32.mxu0 %vm631_vm1, %v9904_v63  ;;  %v11728_v63 = vld [vmem:[#allocation32_spill] sm:$0xff] }
 0x18b   : > { %7943 = vmatmul.mubr.msk.f32.gmra.mrb[12].mxu0 %vm631_vm1, %v9914_v6  ;;  %v11729_v6 = vld [vmem:[#allocation33_spill] sm:$0xff] }
 0x18c   : > { %7945 = vmatprep.mubr.msk.f32.mxu0 %vm631_vm1, %v9918_v25  ;;  %v11730_v25 = vld [vmem:[#allocation34_spill] sm:$0xff] }
 0x18e   : > { %v10362_v41 = vpop.f32.mrb[0].mxu1 }
 0x18f   : > { %7946 = vmatmul.mubr.msk.f32.gmra.mrb[14].mxu0 %vm631_vm1, %v9932_v35  ;;  %v10364_v42 = vpop.f32.mrb[1].mxu1  ;;  %v11731_v35 = vld [vmem:[#allocation35_spill] sm:$0xff] }
 0x190   : > { %7948 = vmatprep.mubr.msk.f32.mxu0 %vm631_vm1, %v9938_v13  ;;  %v11732_v13 = vld [vmem:[#allocation36_spill] sm:$0xff] }
 0x192   : > { %v10371_v56 = vpop.f32.mrb[2].mxu1 }
 0x193   : > { %7949 = vmatmul.mubr.msk.f32.gmra.mrb[16].mxu0 %vm631_vm1, %v9955_v5  ;;  %v10373_v57 = vpop.f32.mrb[3].mxu1  ;;  %v11733_v5 = vld [vmem:[#allocation37_spill] sm:$0xff] }
 0x194   : > { %7951 = vmatprep.mubr.msk.f32.mxu0 %vm631_vm1, %v9961_v19  ;;  %v11734_v19 = vld [vmem:[#allocation38_spill] sm:$0xff] }
 0x196   : > { %v10379_v46 = vpop.f32.mrb[4].mxu1 }
 0x197   : > { %7952 = vmatmul.mubr.msk.f32.gmra.mrb[18].mxu0 %vm631_vm1, %v9974_v0  ;;  %v10381_v59 = vpop.f32.mrb[5].mxu1  ;;  %v11735_v0 = vld [vmem:[#allocation39_spill] sm:$0xff] }
 0x198   : > { %7954 = vmatprep.mubr.msk.f32.mxu0 %vm631_vm1, %v9978_v38  ;;  %v11736_v38 = vld [vmem:[#allocation40_spill] sm:$0xff] }
 0x19a   : > { %v10386_v62 = vpop.f32.mrb[6].mxu1 }
 0x19b   : > { %7955 = vmatmul.mubr.msk.f32.gmra.mrb[20].mxu0 %vm631_vm1, %v9991_v14  ;;  %v10388_v15 = vpop.f32.mrb[7].mxu1  ;;  %v2963_v14 = vrot.slane %v10293_v28, 2 }
 0x19c   : > { %7957 = vmatprep.mubr.msk.f32.mxu0 %vm631_vm1, %v9995_v18  ;;  %v2964_v18 = vrot.slane %v10300_v32, 2 }
 0x19f   : > { %7958 = vmatmul.mubr.msk.f32.gmra.mrb[22].mxu0 %vm631_vm1, %v10008_v58 }
 0x1a0   : > { %7960 = vmatprep.mubr.msk.f32.mxu0 %vm631_vm1, %v10012_v4 }
 0x1a3   : > { %7961 = vmatmul.mubr.msk.f32.gmra.mrb[24].mxu0 %vm631_vm1, %v10025_v44  ;;  %v2966_v44 = vrot.slane %v491_v40, 2 }
 0x1a4   : > { %7963 = vmatprep.mubr.msk.f32.mxu0 %vm631_vm1, %v10031_v20  ;;  %v2965_v20 = vsel %vm11623_vm2, %v2963_v14, %v2964_v18 }
 0x1a5   : > { %v2967_v2 = vsel %vm11623_vm2, %v2964_v18, %v2966_v44 }
 0x1a7   : > { %7964 = vmatmul.mubr.msk.f32.gmra.mrb[26].mxu0 %vm631_vm1, %v10045_v34 }
 0x1a8   : > { %7966 = vmatprep.mubr.msk.f32.mxu0 %vm631_vm1, %v10049_v37 }
 0x1ab   : > { %7967 = vmatmul.mubr.msk.f32.gmra.mrb[28].mxu0 %vm631_vm1, %v11710_v1 }
 0x1ac   : > { %7969 = vmatprep.mubr.msk.f32.mxu0 %vm631_vm1, %v2696_v49 }
 0x1af   : > { %7970 = vmatmul.mubr.msk.f32.gmra.mrb[30].mxu0 %vm631_vm1, %v2698_v43  ;;  %v3318_v43 = vlaneseq }
 0x1b0   : > { %7974 = vmatprep.mubr.msk.f32.mxu0 %vm631_vm1, %v11711_v61 }
 0x1b1   : > { %v3319_v61 = vshrl.u32 %v3318_v43, 7 }
 0x1b3   : > { %7975 = vmatmul.mubr.msk.f32.vlgmr.msra.gmra.mrb[0].mxu0 %vm631_vm1, %v11712_v30  ;;  %v3320_v30 = vadd.s32 8, %v3319_v61 }
 0x1b4   : > { %7977 = vmatprep.mubr.msk.f32.mxu0 %vm631_vm1, %v11713_v51  ;;  %v10502_v51 = vand.u32 127, %v3318_v43 }
 0x1b7   : > { %7978 = vmatmul.mubr.msk.f32.gmra.mrb[2].mxu0 %vm631_vm1, %v11714_v53  ;;  %v3329_v53 = vmul.u32 2, %v3319_v61 }
 0x1b8   : > { %7980 = vmatprep.mubr.msk.f32.mxu0 %vm631_vm1, %v11715_v27  ;;  %v3330_v27 = vmul.u32 2, %v3320_v30 }
 0x1b9   : > { %vm10505_vm4 = vcmp.eq.s32.totalorder %v10502_v51, %v3329_v53  ;;  %v10547_v14 = vadd.s32 1, %v3329_v53 }
 0x1ba   : > { %vm10513_vm5 = vcmp.eq.s32.totalorder %v10502_v51, %v3330_v27  ;;  %v10549_v18 = vadd.s32 1, %v3330_v27 }
 0x1bb   : > { %7981 = vmatmul.mubr.msk.f32.gmra.mrb[4].mxu0 %vm631_vm1, %v11716_v22  ;;  %v11737_v22 = vmov 0  ;;  %vm3369_vm12 = vcmp.eq.s32.totalorder %v10502_v51, %v10547_v14  ;;  %v5035_v14 = vld [vmem:[%s11544_s5 + $0x28] sm:$0xff] }
 0x1bc   : > { %7983 = vmatprep.mubr.msk.f32.mxu0 %vm631_vm1, %v11717_v10  ;;  %v11738_v22 = vsel %vm10505_vm4, 4294967295, %v11737_v22  ;;  %v11625_v10 = vmov 1.0   ;;  %vm3370_vm13 = vcmp.eq.s32.totalorder %v10502_v51, %v10549_v18  ;;  %v5037_v18 = vld [vmem:[%s11544_s5 + $0x38] sm:$0xff] }
 0x1bd   : > { %11739 = vst [vmem:[#allocation19_spill] sm:$0xff] %v11738_v22  ;;  %8054 = vmatprep.mubr.msk.f32.mxu1 %vm10505_vm4, %v11625_v10 }
 0x1bf   : > { %7984 = vmatmul.mubr.msk.f32.gmra.mrb[6].mxu0 %vm631_vm1, %v11718_v60  ;;  %v5034_v60 = vld [vmem:[%s11544_s5 + $0x20] sm:$0xff] }
 0x1c0   : > { %7986 = vmatprep.mubr.msk.f32.mxu0 %vm631_vm1, %v11719_v16  ;;  %v3321_v16 = vadd.s32 16, %v3319_v61 }
 0x1c3   : > { %7987 = vmatmul.mubr.msk.f32.gmra.mrb[8].mxu0 %vm631_vm1, %v11720_v23  ;;  %v3322_v23 = vadd.s32 24, %v3319_v61 }
 0x1c4   : > { %7989 = vmatprep.mubr.msk.f32.mxu0 %vm631_vm1, %v11721_v24  ;;  %v3331_v24 = vmul.u32 2, %v3321_v16 }
 0x1c6   : > { %vm10518_vm6 = vcmp.eq.s32.totalorder %v10502_v51, %v3331_v24  ;;  %v10555_v44 = vadd.s32 1, %v3331_v24 }
 0x1c7   : > { %7990 = vmatmul.mubr.msk.f32.gmra.mrb[10].mxu0 %vm631_vm1, %v11722_v9  ;;  %v3332_v9 = vmul.u32 2, %v3322_v23  ;;  %v10583_v23 = vld [vmem:[%s11755_s2] ss:$0 sm:$0xff]  ;;  %s9151_s2 = scalar_lea.vmem %s9150_s1, 32 }
 0x1c8   : > { %7992 = vmatprep.mubr.msk.f32.mxu0 %vm631_vm1, %v11723_v52  ;;  %vm3371_vm14 = vcmp.eq.s32.totalorder %v10502_v51, %v10555_v44  ;;  %v9210_v52 = vmov 0.0   ;;  %p9153_p1 = scmp.lt.s32.totalorder %s9151_s2, %s9145_s24 }
 0x1c9   : > { %vm10523_vm7 = vcmp.eq.s32.totalorder %v10502_v51, %v3332_v9 }
 0x1ca   : > { %p9154_p2 = por %p9153_p1, %p9152_p0 }
 0x1cb   : > { %7993 = vmatmul.mubr.msk.f32.gmra.mrb[12].mxu0 %vm631_vm1, %v11724_v50  ;;  %v3323_v50 = vadd.s32 32, %v3319_v61 }
 0x1cc   : > { %7995 = vmatprep.mubr.msk.f32.mxu0 %vm631_vm1, %v11725_v39  ;;  %v3666_v39 = vld [vmem:[%s11542_s3 + $0x20] sm:$0xff]  ;;  %p9155_p3 = pnand %p9154_p2, %p9148_p13 }
 0x1ce   : > { %v10444_v58 = vpop.f32.mrb[8].mxu1 }
 0x1cf   : > { %7996 = vmatmul.mubr.msk.f32.gmra.mrb[14].mxu0 %vm631_vm1, %v11726_v47  ;;  %v10446_v4 = vpop.f32.mrb[9].mxu1  ;;  %v3324_v47 = vadd.s32 40, %v3319_v61 }
 0x1d0   : > { %7998 = vmatprep.mubr.msk.f32.mxu0 %vm631_vm1, %v11727_v55  ;;  %v3333_v55 = vmul.u32 2, %v3323_v50 }
 0x1d2   : > { %v10453_v34 = vpop.f32.mrb[10].mxu1  ;;  %vm10528_vm8 = vcmp.eq.s32.totalorder %v10502_v51, %v3333_v55 }
 0x1d3   : > { %7999 = vmatmul.mubr.msk.f32.gmra.mrb[16].mxu0 %vm631_vm1, %v11728_v63  ;;  %v10455_v37 = vpop.f32.mrb[11].mxu1  ;;  %v3334_v63 = vmul.u32 2, %v3324_v47 }
 0x1d4   : > { %8001 = vmatprep.mubr.msk.f32.mxu0 %vm631_vm1, %v11729_v6  ;;  %v3667_v6 = vld [vmem:[%s11542_s3 + $0x28] sm:$0xff] }
 0x1d5   : > { %vm10533_vm9 = vcmp.eq.s32.totalorder %v10502_v51, %v3334_v63  ;;  %v10565_v43 = vadd.s32 1, %v3334_v63 }
 0x1d6   : > { %v10461_v26 = vpop.f32.mrb[12].mxu1 }
 0x1d7   : > { %8002 = vmatmul.mubr.msk.f32.gmra.mrb[18].mxu0 %vm631_vm1, %v11730_v25  ;;  %v3325_v25 = vadd.s32 48, %v3319_v61 }
 0x1d8   : > { %8004 = vmatprep.mubr.msk.f32.mxu0 %vm631_vm1, %v11731_v35  ;;  %v8577_v35 = vpack.c.bf16 %v3667_v6, %v3666_v39 }
 0x1db   : > { %8005 = vmatmul.mubr.msk.f32.gmra.mrb[20].mxu0 %vm631_vm1, %v11732_v13  ;;  %v3326_v13 = vadd.s32 56, %v3319_v61 }
 0x1dc   : > { %8007 = vmatprep.mubr.msk.f32.mxu0 %vm631_vm1, %v11733_v5  ;;  %v3335_v5 = vmul.u32 2, %v3325_v25 }
 0x1de   : > { %vm10538_vm10 = vcmp.eq.s32.totalorder %v10502_v51, %v3335_v5  ;;  %v10571_v61 = vadd.s32 1, %v3335_v5 }
 0x1df   : > { %8008 = vmatmul.mubr.msk.f32.gmra.mrb[22].mxu0 %vm631_vm1, %v11734_v19  ;;  %v3336_v19 = vmul.u32 2, %v3326_v13 }
 0x1e0   : > { %8010 = vmatprep.mubr.msk.f32.mxu0 %vm631_vm1, %v11735_v0  ;;  %vm3375_vm2 = vcmp.eq.s32.totalorder %v10502_v51, %v10571_v61  ;;  %v3668_v0 = vld [vmem:[%s11542_s3 + $0x30] sm:$0xff] }
 0x1e1   : > { %vm10543_vm11 = vcmp.eq.s32.totalorder %v10502_v51, %v3336_v19  ;;  %v10573_v30 = vadd.s32 1, %v3336_v19 }
 0x1e3   : > { %8011 = vmatmul.mubr.msk.f32.gmra.mrb[24].mxu0 %vm631_vm1, %v11736_v38  ;;  %11754 = vst [vmem:[#allocation22_spill] sm:$0xff] %v10573_v30  ;;  %vm3376_vm3 = vcmp.eq.s32.totalorder %v10502_v51, %v10573_v30  ;;  %v3669_v38 = vld [vmem:[%s11542_s3 + $0x38] sm:$0xff] }
 0x1e4   : > { %8013 = vmatprep.mubr.msk.f32.mxu0 %vm631_vm1, %v11703_v54  ;;  %v8581_v44 = vpack.c.bf16 %v3669_v38, %v3668_v0 }
 0x1e7   : > { %8014 = vmatmul.mubr.msk.f32.gmra.mrb[26].mxu0 %vm631_vm1, %v11705_v7  ;;  %v10463_v7 = vpop.f32.mrb[13].mxu1 }
 0x1e8   : > { %8016 = vmatprep.mubr.msk.f32.mxu0 %vm631_vm1, %v10195_v31  ;;  %v10466_v36 = vpop.f32.mrb[14].mxu1 }
 0x1e9   : > { %v10468_v3 = vpop.f32.mrb[15].mxu1 }
 0x1ea   : > { %v10470_v12 = vpop.f32.mrb[16].mxu1 }
 0x1eb   : > { %8017 = vmatmul.mubr.msk.f32.gmra.mrb[28].mxu0 %vm631_vm1, %v10206_v45  ;;  %v10472_v54 = vpop.f32.mrb[17].mxu1 }
 0x1ec   : > { %8019 = vmatprep.mubr.msk.f32.mxu0 %vm631_vm1, %v2965_v20  ;;  %v10474_v31 = vpop.f32.mrb[18].mxu1  ;;  %v10557_v20 = vadd.s32 1, %v3332_v9 }
 0x1ed   : > { %v10476_v45 = vpop.f32.mrb[19].mxu1 }
 0x1ee   : > { %v10478_v17 = vpop.f32.mrb[20].mxu1  ;;  %vm3372_vm15 = vcmp.eq.s32.totalorder %v10502_v51, %v10557_v20 }
 0x1ef   : > { %8020 = vmatmul.mubr.msk.f32.gmra.mrb[30].mxu0 %vm631_vm1, %v2967_v2  ;;  %v10480_v21 = vpop.f32.mrb[21].mxu1  ;;  %v10563_v2 = vadd.s32 1, %v3333_v55  ;;  %vm3374_vm1 = vcmp.eq.s32.totalorder %v10502_v51, %v10565_v43 }
 0x1f0   : > { %v10482_v8 = vpop.f32.mrb[22].mxu1 }
 0x1f1   : > { %v10484_v29 = vpop.f32.mrb[23].mxu1  ;;  %vm3373_vm0 = vcmp.eq.s32.totalorder %v10502_v51, %v10563_v2  ;;  %v5036_v51 = vld [vmem:[%s11544_s5 + $0x30] sm:$0xff] }
 0x1f2   : > { %v10486_v28 = vpop.f32.mrb[24].mxu1 }
 0x1f3   : > { %v10488_v32 = vpop.f32.mrb[25].mxu1 }
 0x1f4   : > { %v10490_v11 = vpop.f32.mrb[26].mxu1 }
 0x1f5   : > { %v10492_v33 = vpop.f32.mrb[27].mxu1 }
 0x1f6   : > { %v10494_v40 = vpop.f32.mrb[28].mxu1 }
 0x1f7   : > { %v10496_v48 = vpop.f32.mrb[29].mxu1 }
 0x1fa   : > { %v10498_v49 = vpop.f32.mrb[30].mxu1 }
 0x1fb   : > { %v10500_v1 = vpop.f32.mrb[31].mxu1 }
 0x286   : > { %v7976_v53 = vpop.f32.mrb[0].mxu0 }
 0x287   : > { %v8775_v27 = vadd.f32 %v7976_v53, %v10362_v41  ;;  %v3041_v16 = vpop.f32.mrb[1].mxu0 }
 0x288   : > { %v8776_v24 = vadd.f32 %v3041_v16, %v10364_v42 }
 0x289   : > { %v3239_v50 = vadd.f32 %v8775_v27, %v10583_v23 }
 0x28a   : > { %v7979_v9 = vpop.f32.mrb[2].mxu0  ;;  %v3238_v63 = vadd.f32 %v8776_v24, %v10583_v23 }
 0x28b   : > { %v8777_v47 = vadd.f32 %v7979_v9, %v10371_v56  ;;  %v3051_v55 = vpop.f32.mrb[3].mxu0  ;;  %v3271_v19 = vmax.f32 %v3239_v50, 0.0 }
 0x28c   : > { %v8778_v25 = vadd.f32 %v3051_v55, %v10373_v57  ;;  %v3270_v16 = vmax.f32 %v3238_v63, 0.0 }
 0x28d   : > { %v3241_v41 = vadd.f32 %v8777_v47, %v10583_v23 }
 0x28e   : > { %v3240_v13 = vadd.f32 %v8778_v25, %v10583_v23  ;;  %v7982_v5 = vpop.f32.mrb[4].mxu0 }
 0x28f   : > { %v3273_v53 = vmax.f32 %v3241_v41, 0.0  ;;  %v8779_v10 = vadd.f32 %v7982_v5, %v10379_v46  ;;  %v3061_v42 = vpop.f32.mrb[5].mxu0 }
 0x290   : > { %v3272_v22 = vmax.f32 %v3240_v13, 0.0  ;;  %v8780_v27 = vadd.f32 %v3061_v42, %v10381_v59 }
 0x291   : > { %v3303_v56 = vmax.f32 %v3271_v19, %v3273_v53  ;;  %v3243_v24 = vadd.f32 %v8779_v10, %v10583_v23 }
 0x292   : > { %v3302_v9 = vmax.f32 %v3270_v16, %v3272_v22  ;;  %v7985_v30 = vpop.f32.mrb[6].mxu0  ;;  %v3242_v50 = vadd.f32 %v8780_v27, %v10583_v23 }
 0x293   : > { %v8781_v57 = vadd.f32 %v7985_v30, %v10386_v62  ;;  %v3071_v47 = vpop.f32.mrb[7].mxu0  ;;  %v3275_v59 = vmax.f32 %v3243_v24, 0.0 }
 0x294   : > { %v10596_v55 = vpack.c.bf16 %v3303_v56, %v3302_v9  ;;  %v8782_v25 = vadd.f32 %v3071_v47, %v10388_v15  ;;  %v3274_v62 = vmax.f32 %v3242_v50, 0.0 }
 0x295   : > { %v3245_v46 = vadd.f32 %v8781_v57, %v10583_v23 }
 0x296   : > { %v3244_v63 = vadd.f32 %v8782_v25, %v10583_v23  ;;  %v7988_v41 = vpop.f32.mrb[8].mxu0  ;;  %8514 = vmatprep.subr.bf16.mxu1 %v10596_v55 }
 0x297   : > { %v3277_v22 = vmax.f32 %v3245_v46, 0.0  ;;  %v8783_v10 = vadd.f32 %v7988_v41, %v10444_v58  ;;  %v3081_v13 = vpop.f32.mrb[9].mxu0  ;;  %8516 = vmatpush3.bf16.msra.mxu1 %v10596_v55 }
 0x298   : > { %v3276_v30 = vmax.f32 %v3244_v63, 0.0  ;;  %v8784_v5 = vadd.f32 %v3081_v13, %v10446_v4 }
 0x299   : > { %v3305_v19 = vmax.f32 %v3275_v59, %v3277_v22  ;;  %v3247_v42 = vadd.f32 %v8783_v10, %v10583_v23 }
 0x29a   : > { %v3304_v15 = vmax.f32 %v3274_v62, %v3276_v30  ;;  %v7991_v53 = vpop.f32.mrb[10].mxu0  ;;  %v3246_v9 = vadd.f32 %v8784_v5, %v10583_v23 }
 0x29b   : > { %v8785_v16 = vadd.f32 %v7991_v53, %v10453_v34  ;;  %v3091_v27 = vpop.f32.mrb[11].mxu0  ;;  %v3279_v4 = vmax.f32 %v3247_v42, 0.0 }
 0x29c   : > { %v10608_v56 = vpack.c.bf16 %v3305_v19, %v3304_v15  ;;  %v8786_v58 = vadd.f32 %v3091_v27, %v10455_v37  ;;  %v3278_v34 = vmax.f32 %v3246_v9, 0.0 }
 0x29d   : > { %v3249_v24 = vadd.f32 %v8785_v16, %v10583_v23 }
 0x29e   : > { %v3248_v57 = vadd.f32 %v8786_v58, %v10583_v23  ;;  %v7994_v47 = vpop.f32.mrb[12].mxu0  ;;  %8518 = vmatprep.subr.bf16.mxu1 %v10608_v56 }
 0x29f   : > { %v3281_v50 = vmax.f32 %v3249_v24, 0.0  ;;  %v8787_v25 = vadd.f32 %v7994_v47, %v10461_v26  ;;  %v3101_v46 = vpop.f32.mrb[13].mxu0  ;;  %8520 = vmatpush3.bf16.msra.mxu1 %v10608_v56 }
 0x2a0   : > { %v3280_v63 = vmax.f32 %v3248_v57, 0.0  ;;  %v8788_v41 = vadd.f32 %v3101_v46, %v10463_v7 }
 0x2a1   : > { %v3307_v59 = vmax.f32 %v3279_v4, %v3281_v50  ;;  %v3251_v10 = vadd.f32 %v8787_v25, %v10583_v23 }
 0x2a2   : > { %v3306_v37 = vmax.f32 %v3278_v34, %v3280_v63  ;;  %v7997_v22 = vpop.f32.mrb[14].mxu0  ;;  %v3250_v5 = vadd.f32 %v8788_v41, %v10583_v23 }
 0x2a3   : > { %v8789_v13 = vadd.f32 %v7997_v22, %v10466_v36  ;;  %v3111_v62 = vpop.f32.mrb[15].mxu0  ;;  %v3283_v7 = vmax.f32 %v3251_v10, 0.0 }
 0x2a4   : > { %v10620_v30 = vpack.c.bf16 %v3307_v59, %v3306_v37  ;;  %v8790_v26 = vadd.f32 %v3111_v62, %v10468_v3  ;;  %v3282_v36 = vmax.f32 %v3250_v5, 0.0 }
 0x2a5   : > { %v3253_v19 = vadd.f32 %v8789_v13, %v10583_v23 }
 0x2a6   : > { %v3252_v15 = vadd.f32 %v8790_v26, %v10583_v23  ;;  %v8000_v53 = vpop.f32.mrb[16].mxu0  ;;  %8522 = vmatprep.subr.bf16.mxu1 %v10620_v30 }
 0x2a7   : > { %v3285_v42 = vmax.f32 %v3253_v19, 0.0  ;;  %v8791_v16 = vadd.f32 %v8000_v53, %v10470_v12  ;;  %v3121_v27 = vpop.f32.mrb[17].mxu0  ;;  %8524 = vmatpush3.bf16.msra.mxu1 %v10620_v30 }
 0x2a8   : > { %v3284_v9 = vmax.f32 %v3252_v15, 0.0  ;;  %v8792_v58 = vadd.f32 %v3121_v27, %v10472_v54 }
 0x2a9   : > { %v3309_v24 = vmax.f32 %v3283_v7, %v3285_v42  ;;  %v3255_v47 = vadd.f32 %v8791_v16, %v10583_v23 }
 0x2aa   : > { %v3308_v3 = vmax.f32 %v3282_v36, %v3284_v9  ;;  %v8003_v57 = vpop.f32.mrb[18].mxu0  ;;  %v3254_v46 = vadd.f32 %v8792_v58, %v10583_v23 }
 0x2ab   : > { %v8793_v4 = vadd.f32 %v8003_v57, %v10474_v31  ;;  %v3131_v50 = vpop.f32.mrb[19].mxu0  ;;  %v3287_v54 = vmax.f32 %v3255_v47, 0.0 }
 0x2ac   : > { %v10632_v25 = vpack.c.bf16 %v3309_v24, %v3308_v3  ;;  %v8794_v12 = vadd.f32 %v3131_v50, %v10476_v45  ;;  %v3286_v31 = vmax.f32 %v3254_v46, 0.0 }
 0x2ad   : > { %v3257_v34 = vadd.f32 %v8793_v4, %v10583_v23 }
 0x2ae   : > { %v3256_v63 = vadd.f32 %v8794_v12, %v10583_v23  ;;  %v8006_v41 = vpop.f32.mrb[20].mxu0  ;;  %8526 = vmatprep.subr.bf16.mxu1 %v10632_v25 }
 0x2af   : > { %v3289_v59 = vmax.f32 %v3257_v34, 0.0  ;;  %v8795_v37 = vadd.f32 %v8006_v41, %v10478_v17  ;;  %v3141_v22 = vpop.f32.mrb[21].mxu0  ;;  %8528 = vmatpush3.bf16.msra.mxu1 %v10632_v25 }
 0x2b0   : > { %v3288_v10 = vmax.f32 %v3256_v63, 0.0  ;;  %v8796_v13 = vadd.f32 %v3141_v22, %v10480_v21 }
 0x2b1   : > { %v3311_v62 = vmax.f32 %v3287_v54, %v3289_v59  ;;  %v3259_v26 = vadd.f32 %v8795_v37, %v10583_v23 }
 0x2b2   : > { %v3310_v45 = vmax.f32 %v3286_v31, %v3288_v10  ;;  %v8009_v5 = vpop.f32.mrb[22].mxu0  ;;  %v3258_v7 = vadd.f32 %v8796_v13, %v10583_v23 }
 0x2b3   : > { %v8797_v19 = vadd.f32 %v8009_v5, %v10482_v8  ;;  %v3151_v15 = vpop.f32.mrb[23].mxu0  ;;  %v3291_v21 = vmax.f32 %v3259_v26, 0.0 }
 0x2b4   : > { %v10644_v53 = vpack.c.bf16 %v3311_v62, %v3310_v45  ;;  %v8798_v17 = vadd.f32 %v3151_v15, %v10484_v29  ;;  %v3290_v8 = vmax.f32 %v3258_v7, 0.0 }
 0x2b5   : > { %v3261_v42 = vadd.f32 %v8797_v19, %v10583_v23 }
 0x2b6   : > { %v3260_v16 = vadd.f32 %v8798_v17, %v10583_v23  ;;  %v8012_v27 = vpop.f32.mrb[24].mxu0  ;;  %8530 = vmatprep.subr.bf16.mxu1 %v10644_v53 }
 0x2b7   : > { %v3293_v36 = vmax.f32 %v3261_v42, 0.0  ;;  %v8799_v9 = vadd.f32 %v8012_v27, %v10486_v28  ;;  %v3161_v58 = vpop.f32.mrb[25].mxu0  ;;  %8532 = vmatpush3.bf16.msra.mxu1 %v10644_v53 }
 0x2b8   : > { %v3292_v24 = vmax.f32 %v3260_v16, 0.0  ;;  %v8800_v3 = vadd.f32 %v3161_v58, %v10488_v32 }
 0x2b9   : > { %v3313_v57 = vmax.f32 %v3291_v21, %v3293_v36  ;;  %v3263_v4 = vadd.f32 %v8799_v9, %v10583_v23 }
 0x2ba   : > { %v3312_v29 = vmax.f32 %v3290_v8, %v3292_v24  ;;  %v8015_v47 = vpop.f32.mrb[26].mxu0  ;;  %v3262_v34 = vadd.f32 %v8800_v3, %v10583_v23 }
 0x2bb   : > { %v8801_v50 = vadd.f32 %v8015_v47, %v10490_v11  ;;  %v3171_v46 = vpop.f32.mrb[27].mxu0  ;;  %v3295_v32 = vmax.f32 %v3263_v4, 0.0 }
 0x2bc   : > { %v8533_v12 = vpack.c.bf16 %v3313_v57, %v3312_v29  ;;  %v8802_v28 = vadd.f32 %v3171_v46, %v10492_v33  ;;  %v3294_v31 = vmax.f32 %v3262_v34, 0.0 }
 0x2bd   : > { %v3265_v63 = vadd.f32 %v8801_v50, %v10583_v23 }
 0x2be   : > { %v3264_v41 = vadd.f32 %v8802_v28, %v10583_v23  ;;  %v8018_v54 = vpop.f32.mrb[28].mxu0  ;;  %8534 = vmatprep.subr.bf16.mxu1 %v8533_v12 }
 0x2bf   : > { %v3297_v59 = vmax.f32 %v3265_v63, 0.0  ;;  %v8803_v37 = vadd.f32 %v8018_v54, %v10494_v40  ;;  %v3181_v22 = vpop.f32.mrb[29].mxu0  ;;  %8536 = vmatpush3.bf16.msra.mxu1 %v8533_v12 }
 0x2c0   : > { %v3296_v11 = vmax.f32 %v3264_v41, 0.0  ;;  %v8804_v10 = vadd.f32 %v3181_v22, %v10496_v48 }
 0x2c1   : > { %v3315_v13 = vmax.f32 %v3295_v32, %v3297_v59  ;;  %v3267_v33 = vadd.f32 %v8803_v37, %v10583_v23  ;;  %v3664_v59 = vld [vmem:[%s11542_s3 + $0x10] sm:$0xff] }
 0x2c2   : > { %v3314_v62 = vmax.f32 %v3294_v31, %v3296_v11  ;;  %v8021_v45 = vpop.f32.mrb[30].mxu0  ;;  %v3266_v15 = vadd.f32 %v8804_v10, %v10583_v23  ;;  %v3665_v11 = vld [vmem:[%s11542_s3 + $0x18] sm:$0xff] }
 0x2c3   : > { %v8805_v5 = vadd.f32 %v8021_v45, %v10498_v49  ;;  %v3191_v26 = vpop.f32.mrb[31].mxu0  ;;  %v3299_v42 = vmax.f32 %v3267_v33, 0.0  ;;  %v11756_v49 = vmov 1.0  }
 0x2c4   : > { %v8537_v19 = vpack.c.bf16 %v3315_v13, %v3314_v62  ;;  %v8806_v7 = vadd.f32 %v3191_v26, %v10500_v1  ;;  %v3298_v16 = vmax.f32 %v3266_v15, 0.0 }
 0x2c5   : > { %v3269_v40 = vadd.f32 %v8805_v5, %v10583_v23 }
 0x2c6   : > { %v3268_v17 = vadd.f32 %v8806_v7, %v10583_v23  ;;  %8538 = vmatprep.subr.bf16.mxu1 %v8537_v19  ;;  %v8589_v7 = vpack.c.bf16 %v3665_v11, %v3664_v59  ;;  %v3676_v59 = vld [vmem:[%s11542_s3 + $0x70] sm:$0xff] }
 0x2c7   : > { %v3301_v48 = vmax.f32 %v3269_v40, 0.0  ;;  %8540 = vmatpush3.bf16.msra.mxu1 %v8537_v19  ;;  %v3670_v40 = vld [vmem:[%s11542_s3 + $0x40] sm:$0xff] }
 0x2c8   : > { %v3300_v27 = vmax.f32 %v3268_v17, 0.0 }
 0x2c9   : > { %v3317_v21 = vmax.f32 %v3299_v42, %v3301_v48 }
 0x2ca   : > { %v3316_v36 = vmax.f32 %v3298_v16, %v3300_v27  ;;  %v3671_v27 = vld [vmem:[%s11542_s3 + $0x48] sm:$0xff] }
 0x2cc   : > { %v8541_v9 = vpack.c.bf16 %v3317_v21, %v3316_v36 }
 0x2ce   : > { %8542 = vmatprep.subr.bf16.mxu1 %v8541_v9 }
 0x2cf   : > { %8544 = vmatpush3.bf16.msra.mxu1 %v8541_v9 }
 0x2d0   : > { %8546 = vmatprep.subr.bf16.mxu1 %v10596_v55 }
 0x2d2   : > { %8055 = vmatmul.mubr.msk.f32.vlgmr.msra.gmra.mrb[32].mxu1 %vm10513_vm5, %v11756_v49 }
 0x2d3   : > { %8548 = vmatpush3.bf16.msra.mxu1 %v10596_v55  ;;  %8057 = vmatprep.mubr.msk.f32.mxu1 %vm10518_vm6, %v11756_v49  ;;  %vm3611_vm6 = vcmask 261120   ;;  %v3662_v55 = vld [vmem:[%s11542_s3] sm:$0xff] }
 0x2d4   : > { %8550 = vmatprep.subr.bf16.mxu1 %v10608_v56  ;;  %3617 = vst.msk [vmem:[#allocation2 + $0x20] sm:$0xff] %vm3611_vm6, %v9210_v52  ;;  %3612 = vst.msk [vmem:[#allocation2] sm:$0xff] %vm3611_vm6, %v9210_v52 }
 0x2d5   : > { %3615 = vst.msk [vmem:[#allocation2 + $0x10] sm:$0xff] %vm3611_vm6, %v9210_v52  ;;  %3619 = vst.msk [vmem:[#allocation2 + $0x30] sm:$0xff] %vm3611_vm6, %v9210_v52 }
 0x2d6   : > { %8058 = vmatmul.mubr.msk.f32.gmra.mrb[34].mxu1 %vm10523_vm7, %v11756_v49  ;;  %vm3613_vm7 = vcmask 254976   ;;  %3621 = vst.msk [vmem:[#allocation2 + $0x40] sm:$0xff] %vm3611_vm6, %v9210_v52  ;;  %3623 = vst.msk [vmem:[#allocation2 + $0x50] sm:$0xff] %vm3611_vm6, %v9210_v52 }
 0x2d7   : > { %8552 = vmatpush3.bf16.msra.mxu1 %v10608_v56  ;;  %8060 = vmatprep.mubr.msk.f32.mxu1 %vm10528_vm8, %v11756_v49  ;;  %3618 = vst.msk [vmem:[#allocation2 + $0x28] sm:$0x3] %vm3613_vm7, %v9210_v52  ;;  %3614 = vst.msk [vmem:[#allocation2 + $0x8] sm:$0x3] %vm3613_vm7, %v9210_v52  ;;  %v3663_v56 = vld [vmem:[%s11542_s3 + $0x8] sm:$0xff] }
 0x2d8   : > { %8554 = vmatprep.subr.bf16.mxu1 %v10620_v30  ;;  %3616 = vst.msk [vmem:[#allocation2 + $0x18] sm:$0x3] %vm3613_vm7, %v9210_v52  ;;  %3620 = vst.msk [vmem:[#allocation2 + $0x38] sm:$0x3] %vm3613_vm7, %v9210_v52 }
 0x2d9   : > { %3622 = vst.msk [vmem:[#allocation2 + $0x48] sm:$0x3] %vm3613_vm7, %v9210_v52  ;;  %3624 = vst.msk [vmem:[#allocation2 + $0x58] sm:$0x3] %vm3613_vm7, %v9210_v52 }
 0x2da   : > { %8061 = vmatmul.mubr.msk.f32.gmra.mrb[36].mxu1 %vm10533_vm9, %v11756_v49  ;;  %3625 = vst.msk [vmem:[#allocation2 + $0x60] sm:$0xff] %vm3611_vm6, %v9210_v52  ;;  %3627 = vst.msk [vmem:[#allocation2 + $0x70] sm:$0xff] %vm3611_vm6, %v9210_v52 }
 0x2db   : > { %8556 = vmatpush3.bf16.msra.mxu1 %v10620_v30  ;;  %8063 = vmatprep.mubr.msk.f32.mxu1 %vm10538_vm10, %v11756_v49  ;;  %3626 = vst.msk [vmem:[#allocation2 + $0x68] sm:$0x3] %vm3613_vm7, %v9210_v52  ;;  %3628 = vst.msk [vmem:[#allocation2 + $0x78] sm:$0x3] %vm3613_vm7, %v9210_v52  ;;  %v10783_v20 = vld [vmem:[#allocation2] sm:$0xff]  ;;  %v8585_v30 = vpack.c.bf16 %v3663_v56, %v3662_v55 }
 0x2dc   : > { %8558 = vmatprep.subr.bf16.mxu1 %v10632_v25  ;;  %3629 = vst.msk [vmem:[#allocation2 + $0x80] sm:$0xff] %vm3611_vm6, %v9210_v52  ;;  %3631 = vst.msk [vmem:[#allocation2 + $0x90] sm:$0xff] %vm3611_vm6, %v9210_v52  ;;  %v3715_v43 = vrot.slane %v10783_v20, 1 }
 0x2dd   : > { %3630 = vst.msk [vmem:[#allocation2 + $0x88] sm:$0x3] %vm3613_vm7, %v9210_v52  ;;  %3632 = vst.msk [vmem:[#allocation2 + $0x98] sm:$0x3] %vm3613_vm7, %v9210_v52 }
 0x2de   : > { %8064 = vmatmul.mubr.msk.f32.gmra.mrb[38].mxu1 %vm10543_vm11, %v11756_v49  ;;  %v10785_v2 = vld [vmem:[#allocation2 + $0x8] sm:$0x3] }
 0x2df   : > { %8560 = vmatpush3.bf16.msra.mxu1 %v10632_v25  ;;  %8098 = vmatprep.mubr.msk.f32.mxu1 %vm3369_vm12, %v11756_v49  ;;  %v3716_v61 = vrot.slane %v10785_v2, 1 }
 0x2e0   : > { %8562 = vmatprep.subr.bf16.mxu1 %v10644_v53 }
 0x2e3   : > { %8564 = vmatpush3.bf16.msra.mxu1 %v10644_v53 }
 0x2e4   : > { %8566 = vmatprep.subr.bf16.mxu1 %v8533_v12 }
 0x2e7   : > { %8568 = vmatpush3.bf16.msra.mxu1 %v8533_v12 }
 0x2e8   : > { %8570 = vmatprep.subr.bf16.mxu1 %v8537_v19 }
 0x2eb   : > { %8572 = vmatpush3.bf16.msra.mxu1 %v8537_v19 }
 0x2ec   : > { %8574 = vmatprep.subr.bf16.mxu1 %v8541_v9 }
 0x2ef   : > { %8576 = vmatpush3.bf16.msra.mxu1 %v8541_v9 }
 0x2f0   : > { %8578 = vmatprep.subr.bf16.mxu1 %v8577_v35 }
 0x2f2   : > { %8099 = vmatmul.mubr.msk.f32.vlgmr.msra.gmra.mrb[40].mxu1 %vm3370_vm13, %v11756_v49 }
 0x2f3   : > { %8101 = vmatprep.mubr.msk.f32.mxu1 %vm3371_vm14, %v11756_v49  ;;  %8580 = vmatpush3.bf16.msra.mxu1 %v8577_v35  ;;  %v8593_v35 = vpack.c.bf16 %v3671_v27, %v3670_v40 }
 0x2f4   : > { %8582 = vmatprep.subr.bf16.mxu1 %v8581_v44 }
 0x2f6   : > { %8102 = vmatmul.mubr.msk.f32.gmra.mrb[42].mxu1 %vm3372_vm15, %v11756_v49 }
 0x2f7   : > { %8104 = vmatprep.mubr.msk.f32.mxu1 %vm3373_vm0, %v11756_v49  ;;  %8584 = vmatpush3.bf16.msra.mxu1 %v8581_v44  ;;  %vm11766_vm0 = vcmask 1045504  }
 0x2f8   : > { %8586 = vmatprep.subr.bf16.mxu1 %v8585_v30  ;;  %vm11768_vm7 = vmmov %vm11766_vm0 }
 0x2fa   : > { %8105 = vmatmul.mubr.msk.f32.gmra.mrb[44].mxu1 %vm3374_vm1, %v11756_v49  ;;  %vm11767_vm1 = vmmov %vm11766_vm0 }
 0x2fb   : > { %8107 = vmatprep.mubr.msk.f32.mxu1 %vm3375_vm2, %v11756_v49  ;;  %vm11758_vm2 = vcmask 1046528  }
 0x2fc   : > { %v3717_v23 = vsel %vm11758_vm2, %v3715_v43, %v3716_v61  ;;  %vm11760_vm8 = vmmov %vm11758_vm2 }
 0x2fd   : > { %vm11761_vm9 = vmmov %vm11758_vm2 }
 0x2fe   : > { %8108 = vmatmul.mubr.msk.f32.gmra.mrb[46].mxu1 %vm3376_vm3, %v11756_v49  ;;  %vm11759_vm3 = vmmov %vm11758_vm2 }
 0x2ff   : > { %8118 = vmatprep.mubr.msk.f32.mxu1 %vm3611_vm6, %v3717_v23  ;;  %vm11762_vm10 = vmmov %vm11758_vm2 }
 0x300   : > { %vm11763_vm11 = vmmov %vm11758_vm2 }
 0x301   : > { %vm11764_vm14 = vmmov %vm11758_vm2 }
 0x302   : > { %vm11765_vm15 = vmmov %vm11758_vm2 }
 0x303   : > { %vm11769_vm2 = vmmov %vm11766_vm0 }
 0x3a5   : > { %v8056_v25 = vpop.f32.mrb[32].mxu1 }
 0x3a6   : > { %v3459_v53 = vpop.f32.mrb[33].mxu1 }
 0x3a9   : > { %v8059_v58 = vpop.f32.mrb[34].mxu1 }
 0x3aa   : > { %v3469_v8 = vpop.f32.mrb[35].mxu1 }
 0x3ad   : > { %v8062_v24 = vpop.f32.mrb[36].mxu1 }
 0x3ae   : > { %v3479_v3 = vpop.f32.mrb[37].mxu1 }
 0x3b1   : > { %v8065_v57 = vpop.f32.mrb[38].mxu1 }
 0x3b2   : > { %v3489_v29 = vpop.f32.mrb[39].mxu1 }
 0x3c5   : > { %v8100_v47 = vpop.f32.mrb[40].mxu1 }
 0x3c6   : > { %v3604_v4 = vmax.f32 %v8056_v25, %v8100_v47  ;;  %v3564_v50 = vpop.f32.mrb[41].mxu1  ;;  %v3672_v47 = vld [vmem:[%s11542_s3 + $0x50] sm:$0xff] }
 0x3c7   : > { %v3603_v46 = vmax.f32 %v3459_v53, %v3564_v50 }
 0x3c8   : > { %3635 = vst.msk [vmem:[#allocation2 + $0x21] sm:$0xff] %vm3611_vm6, %v3604_v4  ;;  %v3673_v4 = vld [vmem:[%s11542_s3 + $0x58] sm:$0xff] }
 0x3c9   : > { %3634 = vst.msk [vmem:[#allocation2 + $0x11] sm:$0xff] %vm3611_vm6, %v3603_v46  ;;  %v8103_v12 = vpop.f32.mrb[42].mxu1  ;;  %v8597_v50 = vpack.c.bf16 %v3673_v4, %v3672_v47  ;;  %v3674_v46 = vld [vmem:[%s11542_s3 + $0x60] sm:$0xff]  ;;  %v3687_v4 = vld [vmem:[%s11542_s3 + $0xc8] sm:$0xff] }
 0x3ca   : > { %v3606_v34 = vmax.f32 %v8059_v58, %v8103_v12  ;;  %v3574_v28 = vpop.f32.mrb[43].mxu1  ;;  %v3675_v12 = vld [vmem:[%s11542_s3 + $0x68] sm:$0xff]  ;;  %v3686_v47 = vld [vmem:[%s11542_s3 + $0xc0] sm:$0xff] }
 0x3cb   : > { %v3605_v63 = vmax.f32 %v3469_v8, %v3574_v28  ;;  %v3981_v28 = vrot.slane %v10783_v20, 2 }
 0x3cc   : > { %3637 = vst.msk [vmem:[#allocation2 + $0x41] sm:$0xff] %vm3611_vm6, %v3606_v34  ;;  %v8601_v34 = vpack.c.bf16 %v3675_v12, %v3674_v46 }
 0x3cd   : > { %3636 = vst.msk [vmem:[#allocation2 + $0x31] sm:$0xff] %vm3611_vm6, %v3605_v63  ;;  %v8106_v41 = vpop.f32.mrb[44].mxu1  ;;  %v3982_v63 = vrot.slane %v10785_v2, 2 }
 0x3ce   : > { %v3608_v54 = vmax.f32 %v8062_v24, %v8106_v41  ;;  %v3584_v32 = vpop.f32.mrb[45].mxu1 }
 0x3cf   : > { %v3607_v37 = vmax.f32 %v3479_v3, %v3584_v32  ;;  %v10804_v22 = vld [vmem:[#allocation2 + $0x20] sm:$0xff]  ;;  %v10806_v31 = vld [vmem:[#allocation2 + $0x28] sm:$0x3]  ;;  %v3983_v41 = vsel %vm11766_vm0, %v3981_v28, %v3982_v63  ;;  %v3688_v28 = vld [vmem:[%s11542_s3 + $0xd0] sm:$0xff] }
 0x3d0   : > { %3639 = vst.msk [vmem:[#allocation2 + $0x61] sm:$0xff] %vm3611_vm6, %v3608_v54  ;;  %v10812_v10 = vld [vmem:[#allocation2 + $0x10] sm:$0xff]  ;;  %v10814_v13 = vld [vmem:[#allocation2 + $0x18] sm:$0x3]  ;;  %v3721_v62 = vrot.slane %v10804_v22, 1  ;;  %v3722_v45 = vrot.slane %v10806_v31, 1 }
 0x3d1   : > { %3638 = vst.msk [vmem:[#allocation2 + $0x51] sm:$0xff] %vm3611_vm6, %v3607_v37  ;;  %v8109_v33 = vpop.f32.mrb[46].mxu1  ;;  %v3718_v5 = vrot.slane %v10812_v10, 1  ;;  %v3719_v26 = vrot.slane %v10814_v13, 1  ;;  %v3984_v54 = vrot.slane %v10812_v10, 2  ;;  %v3985_v32 = vrot.slane %v10814_v13, 2 }
 0x3d2   : > { %v3610_v19 = vmax.f32 %v8065_v57, %v8109_v33  ;;  %v3594_v15 = vpop.f32.mrb[47].mxu1  ;;  %v10838_v21 = vsel %vm11760_vm8, %v3721_v62, %v3722_v45  ;;  %v3987_v2 = vrot.slane %v10804_v22, 2  ;;  %v3988_v37 = vrot.slane %v10806_v31, 2  ;;  %v3678_v33 = vld [vmem:[%s11542_s3 + $0x80] sm:$0xff]  ;;  %vm11771_vm8 = vmmov %vm11766_vm0  ;;  %v3689_v63 = vld [vmem:[%s11542_s3 + $0xd8] sm:$0xff] }
 0x3d3   : > { %v3609_v17 = vmax.f32 %v3489_v29, %v3594_v15  ;;  %v10825_v42 = vsel %vm11759_vm3, %v3718_v5, %v3719_v26  ;;  %v10827_v48 = vld [vmem:[#allocation2 + $0x40] sm:$0xff]  ;;  %v10829_v16 = vld [vmem:[#allocation2 + $0x48] sm:$0x3]  ;;  %v10937_v13 = vsel %vm11767_vm1, %v3984_v54, %v3985_v32  ;;  %vm11770_vm3 = vmmov %vm11766_vm0 }
 0x3d4   : > { %3641 = vst.msk [vmem:[#allocation2 + $0x81] sm:$0xff] %vm3611_vm6, %v3610_v19  ;;  %8119 = vmatmul.mubr.msk.f32.vlgmr.msra.gmra.mrb[48].mxu1 %vm3611_vm6, %v10825_v42  ;;  %v10840_v36 = vld [vmem:[#allocation2 + $0x30] sm:$0xff]  ;;  %v10842_v9 = vld [vmem:[#allocation2 + $0x38] sm:$0x3]  ;;  %v3727_v49 = vrot.slane %v10827_v48, 1  ;;  %v3728_v1 = vrot.slane %v10829_v16, 1  ;;  %v10950_v31 = vsel %vm11768_vm7, %v3987_v2, %v3988_v37 }
 0x3d5   : > { %3640 = vst.msk [vmem:[#allocation2 + $0x71] sm:$0xff] %vm3611_vm6, %v3609_v17  ;;  %8121 = vmatprep.mubr.msk.f32.mxu1 %vm3611_vm6, %v10838_v21  ;;  %v3724_v39 = vrot.slane %v10840_v36, 1  ;;  %v3725_v6 = vrot.slane %v10842_v9, 1  ;;  %8588 = vmatpush3.bf16.msra.mxu1 %v8585_v30  ;;  %v3990_v62 = vrot.slane %v10840_v36, 2  ;;  %v3991_v45 = vrot.slane %v10842_v9, 2  ;;  %v3679_v5 = vld [vmem:[%s11542_s3 + $0x88] sm:$0xff] }
 0x3d6   : > { %8590 = vmatprep.subr.bf16.mxu1 %v8589_v7  ;;  %v10861_v43 = vsel %vm11762_vm10, %v3727_v49, %v3728_v1  ;;  %v3993_v26 = vrot.slane %v10827_v48, 2  ;;  %v3994_v19 = vrot.slane %v10829_v16, 2  ;;  %v8609_v15 = vpack.c.bf16 %v3679_v5, %v3678_v33  ;;  %vm11773_vm10 = vmmov %vm11766_vm0  ;;  %v3690_v54 = vld [vmem:[%s11542_s3 + $0xe0] sm:$0xff]  ;;  %v3691_v32 = vld [vmem:[%s11542_s3 + $0xe8] sm:$0xff] }
 0x3d7   : > { %v10852_v0 = vsel %vm11761_vm9, %v3724_v39, %v3725_v6  ;;  %v10854_v38 = vld [vmem:[#allocation2 + $0x60] sm:$0xff]  ;;  %v10856_v44 = vld [vmem:[#allocation2 + $0x68] sm:$0x3]  ;;  %vm11772_vm9 = vmmov %vm11766_vm0 }
 0x3d8   : > { %8122 = vmatmul.mubr.msk.f32.gmra.mrb[50].mxu1 %vm3611_vm6, %v10852_v0  ;;  %v10863_v61 = vld [vmem:[#allocation2 + $0x50] sm:$0xff]  ;;  %v10865_v23 = vld [vmem:[#allocation2 + $0x58] sm:$0x3]  ;;  %v3733_v55 = vrot.slane %v10854_v38, 1  ;;  %v3734_v56 = vrot.slane %v10856_v44, 1  ;;  %v10964_v27 = vsel %vm11770_vm3, %v3993_v26, %v3994_v19  ;;  %v3999_v16 = vrot.slane %v10854_v38, 2 }
 0x3d9   : > { %8124 = vmatprep.mubr.msk.f32.mxu1 %vm3611_vm6, %v10861_v43  ;;  %v3730_v30 = vrot.slane %v10863_v61, 1  ;;  %v3731_v25 = vrot.slane %v10865_v23, 1  ;;  %8592 = vmatpush3.bf16.msra.mxu1 %v8589_v7  ;;  %v10957_v7 = vsel %vm11769_vm2, %v3990_v62, %v3991_v45  ;;  %v3996_v40 = vrot.slane %v10863_v61, 2  ;;  %v3694_v45 = vld [vmem:[%s11542_s3 + $0x100] sm:$0xff]  ;;  %v3695_v33 = vld [vmem:[%s11542_s3 + $0x108] sm:$0xff] }
 0x3da   : > { %8594 = vmatprep.subr.bf16.mxu1 %v8593_v35  ;;  %v10879_v58 = vsel %vm11764_vm14, %v3733_v55, %v3734_v56  ;;  %v3997_v17 = vrot.slane %v10865_v23, 2  ;;  %v4000_v9 = vrot.slane %v10856_v44, 2  ;;  %v3680_v44 = vld [vmem:[%s11542_s3 + $0x90] sm:$0xff]  ;;  %v3681_v23 = vld [vmem:[%s11542_s3 + $0x98] sm:$0xff]  ;;  %v3682_v56 = vld [vmem:[%s11542_s3 + $0xa0] sm:$0xff]  ;;  %v8641_v5 = vpack.c.bf16 %v3695_v33, %v3694_v45 }
 0x3db   : > { %v10874_v53 = vsel %vm11763_vm11, %v3730_v30, %v3731_v25  ;;  %v8613_v55 = vpack.c.bf16 %v3681_v23, %v3680_v44  ;;  %v3683_v30 = vld [vmem:[%s11542_s3 + $0xa8] sm:$0xff]  ;;  %vm11774_vm14 = vmmov %vm11766_vm0 }
 0x3dc   : > { %8125 = vmatmul.mubr.msk.f32.gmra.mrb[52].mxu1 %vm3611_vm6, %v10874_v53  ;;  %v10881_v8 = vld [vmem:[#allocation2 + $0x70] sm:$0xff]  ;;  %v10883_v24 = vld [vmem:[#allocation2 + $0x78] sm:$0x3]  ;;  %v10971_v49 = vsel %vm11771_vm8, %v3996_v40, %v3997_v17  ;;  %v10978_v6 = vsel %vm11772_vm9, %v3999_v16, %v4000_v9  ;;  %v8617_v25 = vpack.c.bf16 %v3683_v30, %v3682_v56 }
 0x3dd   : > { %8127 = vmatprep.mubr.msk.f32.mxu1 %vm3611_vm6, %v10879_v58  ;;  %v3736_v3 = vrot.slane %v10881_v8, 1  ;;  %v3737_v57 = vrot.slane %v10883_v24, 1  ;;  %v4002_v1 = vrot.slane %v10881_v8, 2  ;;  %v4003_v39 = vrot.slane %v10883_v24, 2  ;;  %v3684_v24 = vld [vmem:[%s11542_s3 + $0xb0] sm:$0xff] }
 0x3df   : > { %v10890_v29 = vsel %vm11765_vm15, %v3736_v3, %v3737_v57  ;;  %v3685_v3 = vld [vmem:[%s11542_s3 + $0xb8] sm:$0xff]  ;;  %vm11775_vm15 = vmmov %vm11763_vm11 }
 0x3e0   : > { %8128 = vmatmul.mubr.msk.f32.gmra.mrb[54].mxu1 %vm3611_vm6, %v10890_v29  ;;  %v8621_v57 = vpack.c.bf16 %v3685_v3, %v3684_v24 }
 0x3e1   : > { %8138 = vmatprep.mubr.msk.f32.mxu1 %vm3611_vm6, %v10783_v20  ;;  %v3677_v20 = vld [vmem:[%s11542_s3 + $0x78] sm:$0xff] }
 0x3e2   : > { %v8605_v11 = vpack.c.bf16 %v3677_v20, %v3676_v59  ;;  %v8633_v59 = vpack.c.bf16 %v3691_v32, %v3690_v54  ;;  %v9211_v54 = vmov 0.0|0.0   ;;  %v8666_v32 = vpack.c.bf16 %v5035_v14, %v5034_v60 }
 0x3e4   : > { %8139 = vmatmul.mubr.msk.f32.vlgmr.msra.gmra.mrb[48].mxu1 %vm3611_vm6, %v10812_v10 }
 0x3e5   : > { %8141 = vmatprep.mubr.msk.f32.mxu1 %vm3611_vm6, %v10804_v22  ;;  %8596 = vmatpush3.bf16.msra.mxu1 %v8593_v35  ;;  %v10983_v35 = vsel %vm11773_vm10, %v4002_v1, %v4003_v39 }
 0x3e6   : > { %8598 = vmatprep.subr.bf16.mxu1 %v8597_v50 }
 0x3e8   : > { %8142 = vmatmul.mubr.msk.f32.gmra.mrb[50].mxu1 %vm3611_vm6, %v10840_v36 }
 0x3e9   : > { %8144 = vmatprep.mubr.msk.f32.mxu1 %vm3611_vm6, %v10827_v48  ;;  %8600 = vmatpush3.bf16.msra.mxu1 %v8597_v50  ;;  %v8625_v50 = vpack.c.bf16 %v3687_v4, %v3686_v47 }
 0x3ea   : > { %8602 = vmatprep.subr.bf16.mxu1 %v8601_v34 }
 0x3ec   : > { %8145 = vmatmul.mubr.msk.f32.gmra.mrb[52].mxu1 %vm3611_vm6, %v10863_v61 }
 0x3ed   : > { %8147 = vmatprep.mubr.msk.f32.mxu1 %vm3611_vm6, %v10854_v38 }
 0x3f0   : > { %8148 = vmatmul.mubr.msk.f32.gmra.mrb[54].mxu1 %vm3611_vm6, %v10881_v8 }
 0x3f1   : > { %8158 = vmatprep.mubr.msk.f32.mxu1 %vm3611_vm6, %v3983_v41  ;;  %v8629_v41 = vpack.c.bf16 %v3689_v63, %v3688_v28  ;;  %v6886_v28 = vsel %vm10513_vm5, 1.0, %v9210_v52  ;;  %v6893_v63 = vsel %vm3369_vm12, 1.0, %v9210_v52  ;;  %vm6361_vm5 = vcmask 130048  }
 0x3f2   : > { %vm6512_vm12 = vcmask 73728  }
 0x3f4   : > { %8159 = vmatmul.mubr.msk.f32.vlgmr.msra.gmra.mrb[48].mxu1 %vm3611_vm6, %v10937_v13 }
 0x3f5   : > { %8161 = vmatprep.mubr.msk.f32.mxu1 %vm3611_vm6, %v10950_v31  ;;  %8604 = vmatpush3.bf16.msra.mxu1 %v8601_v34 }
 0x3f6   : > { %8606 = vmatprep.subr.bf16.mxu1 %v8605_v11 }
 0x3f8   : > { %8162 = vmatmul.mubr.msk.f32.gmra.mrb[50].mxu1 %vm3611_vm6, %v10957_v7 }
 0x3f9   : > { %8164 = vmatprep.mubr.msk.f32.mxu1 %vm3611_vm6, %v10964_v27  ;;  %8608 = vmatpush3.bf16.msra.mxu1 %v8605_v11  ;;  %v3692_v11 = vld [vmem:[%s11542_s3 + $0xf0] sm:$0xff] }
 0x3fa   : > { %8610 = vmatprep.subr.bf16.mxu1 %v8609_v15 }
 0x3fc   : > { %8165 = vmatmul.mubr.msk.f32.gmra.mrb[52].mxu1 %vm3611_vm6, %v10971_v49 }
 0x3fd   : > { %8167 = vmatprep.mubr.msk.f32.mxu1 %vm3611_vm6, %v10978_v6 }
 0x400   : > { %8168 = vmatmul.mubr.msk.f32.gmra.mrb[54].mxu1 %vm3611_vm6, %v10983_v35 }
 0x401   : > { %8178 = vmatprep.mubr.msk.f32.mxu1 %vm3611_vm6, %v10812_v10  ;;  %v3658_v10 = vld [vmem:[#allocation2 + $0x80] sm:$0xff] }
 0x402   : > { %v4251_v46 = vrot.slane %v3658_v10, 1  ;;  %v4369_v20 = vrot.slane %v3658_v10, 2 }
 0x404   : > { %8179 = vmatmul.mubr.msk.f32.vlgmr.msra.gmra.mrb[48].mxu1 %vm3611_vm6, %v10804_v22 }
 0x405   : > { %8181 = vmatprep.mubr.msk.f32.mxu1 %vm3611_vm6, %v10840_v36  ;;  %8612 = vmatpush3.bf16.msra.mxu1 %v8609_v15 }
 0x406   : > { %8614 = vmatprep.subr.bf16.mxu1 %v8613_v55 }
 0x408   : > { %8182 = vmatmul.mubr.msk.f32.gmra.mrb[50].mxu1 %vm3611_vm6, %v10827_v48 }
 0x409   : > { %8184 = vmatprep.mubr.msk.f32.mxu1 %vm3611_vm6, %v10863_v61  ;;  %8616 = vmatpush3.bf16.msra.mxu1 %v8613_v55 }
 0x40a   : > { %8618 = vmatprep.subr.bf16.mxu1 %v8617_v25 }
 0x40c   : > { %8185 = vmatmul.mubr.msk.f32.gmra.mrb[52].mxu1 %vm3611_vm6, %v10854_v38 }
 0x40d   : > { %8187 = vmatprep.mubr.msk.f32.mxu1 %vm3611_vm6, %v10881_v8 }
 0x410   : > { %8188 = vmatmul.mubr.msk.f32.gmra.mrb[54].mxu1 %vm3611_vm6, %v3658_v10 }
 0x411   : > { %8198 = vmatprep.mubr.msk.f32.mxu1 %vm3611_vm6, %v10825_v42  ;;  %v3659_v42 = vld [vmem:[#allocation2 + $0x88] sm:$0x3] }
 0x412   : > { %v4252_v12 = vrot.slane %v3659_v42, 1  ;;  %v4370_v2 = vrot.slane %v3659_v42, 2 }
 0x414   : > { %8199 = vmatmul.mubr.msk.f32.vlgmr.msra.gmra.mrb[48].mxu1 %vm3611_vm6, %v10838_v21  ;;  %v4253_v34 = vsel %vm11763_vm11, %v4251_v46, %v4252_v12  ;;  %v4371_v37 = vsel %vm11774_vm14, %v4369_v20, %v4370_v2 }
 0x415   : > { %8201 = vmatprep.mubr.msk.f32.mxu1 %vm3611_vm6, %v10852_v0  ;;  %8620 = vmatpush3.bf16.msra.mxu1 %v8617_v25 }
 0x416   : > { %8622 = vmatprep.subr.bf16.mxu1 %v8621_v57 }
 0x418   : > { %8202 = vmatmul.mubr.msk.f32.gmra.mrb[50].mxu1 %vm3611_vm6, %v10861_v43 }
 0x419   : > { %8204 = vmatprep.mubr.msk.f32.mxu1 %vm3611_vm6, %v10874_v53  ;;  %8624 = vmatpush3.bf16.msra.mxu1 %v8621_v57 }
 0x41a   : > { %8626 = vmatprep.subr.bf16.mxu1 %v8625_v50 }
 0x41c   : > { %8205 = vmatmul.mubr.msk.f32.gmra.mrb[52].mxu1 %vm3611_vm6, %v10879_v58 }
 0x41d   : > { %8207 = vmatprep.mubr.msk.f32.mxu1 %vm3611_vm6, %v10890_v29 }
 0x420   : > { %8208 = vmatmul.mubr.msk.f32.gmra.mrb[54].mxu1 %vm3611_vm6, %v4253_v34 }
 0x421   : > { %8218 = vmatprep.mubr.msk.f32.mxu1 %vm3611_vm6, %v10937_v13  ;;  %v3693_v13 = vld [vmem:[%s11542_s3 + $0xf8] sm:$0xff] }
 0x422   : > { %v8637_v62 = vpack.c.bf16 %v3693_v13, %v3692_v11  ;;  %v5030_v11 = vld [vmem:[%s11544_s5] sm:$0xff]  ;;  %v5031_v13 = vld [vmem:[%s11544_s5 + $0x8] sm:$0xff] }
 0x424   : > { %8219 = vmatmul.mubr.msk.f32.vlgmr.msra.gmra.mrb[48].mxu1 %vm3611_vm6, %v10950_v31 }
 0x425   : > { %8221 = vmatprep.mubr.msk.f32.mxu1 %vm3611_vm6, %v10957_v7  ;;  %8628 = vmatpush3.bf16.msra.mxu1 %v8625_v50 }
 0x426   : > { %8630 = vmatprep.subr.bf16.mxu1 %v8629_v41 }
 0x428   : > { %8222 = vmatmul.mubr.msk.f32.gmra.mrb[50].mxu1 %vm3611_vm6, %v10964_v27 }
 0x429   : > { %8224 = vmatprep.mubr.msk.f32.mxu1 %vm3611_vm6, %v10971_v49  ;;  %8632 = vmatpush3.bf16.msra.mxu1 %v8629_v41  ;;  %v6894_v41 = vsel %vm3370_vm13, 1.0, %v9210_v52 }
 0x42a   : > { %8634 = vmatprep.subr.bf16.mxu1 %v8633_v59 }
 0x42c   : > { %8225 = vmatmul.mubr.msk.f32.gmra.mrb[52].mxu1 %vm3611_vm6, %v10978_v6 }
 0x42d   : > { %8227 = vmatprep.mubr.msk.f32.mxu1 %vm3611_vm6, %v10983_v35 }
 0x430   : > { %8228 = vmatmul.mubr.msk.f32.gmra.mrb[54].mxu1 %vm3611_vm6, %v4371_v37 }
 0x431   : > { %8238 = vmatprep.mubr.msk.f32.mxu1 %vm3611_vm6, %v10804_v22  ;;  %v3660_v22 = vld [vmem:[#allocation2 + $0x90] sm:$0xff] }
 0x434   : > { %8239 = vmatmul.mubr.msk.f32.vlgmr.msra.gmra.mrb[48].mxu1 %vm3611_vm6, %v10840_v36  ;;  %v3697_v36 = vld [vmem:[%s11542_s3 + $0x118] sm:$0xff] }
 0x435   : > { %8241 = vmatprep.mubr.msk.f32.mxu1 %vm3611_vm6, %v10827_v48  ;;  %8636 = vmatpush3.bf16.msra.mxu1 %v8633_v59  ;;  %v3696_v48 = vld [vmem:[%s11542_s3 + $0x110] sm:$0xff]  ;;  %v8669_v59 = vpack.c.bf16 %v5037_v18, %v5036_v51  ;;  %v5065_v51 = vld [vmem:[%s11544_s5 + $0x118] sm:$0xff] }
 0x436   : > { %8638 = vmatprep.subr.bf16.mxu1 %v8637_v62 }
 0x438   : > { %8242 = vmatmul.mubr.msk.f32.gmra.mrb[50].mxu1 %vm3611_vm6, %v10863_v61  ;;  %v3661_v61 = vld [vmem:[#allocation2 + $0x98] sm:$0x3] }
 0x439   : > { %8244 = vmatprep.mubr.msk.f32.mxu1 %vm3611_vm6, %v10854_v38  ;;  %8640 = vmatpush3.bf16.msra.mxu1 %v8637_v62  ;;  %v8645_v38 = vpack.c.bf16 %v3697_v36, %v3696_v48  ;;  %v4605_v26 = vrot.slane %v3661_v61, 1  ;;  %v5032_v48 = vld [vmem:[%s11544_s5 + $0x10] sm:$0xff]  ;;  %v5033_v36 = vld [vmem:[%s11544_s5 + $0x18] sm:$0xff] }
 0x43a   : > { %8642 = vmatprep.subr.bf16.mxu1 %v8641_v5 }
 0x43c   : > { %8245 = vmatmul.mubr.msk.f32.gmra.mrb[52].mxu1 %vm3611_vm6, %v10881_v8  ;;  %v4604_v8 = vrot.slane %v3660_v22, 1 }
 0x43d   : > { %8247 = vmatprep.mubr.msk.f32.mxu1 %vm3611_vm6, %v3658_v10 }
 0x440   : > { %8248 = vmatmul.mubr.msk.f32.gmra.mrb[54].mxu1 %vm3611_vm6, %v3660_v22 }
 0x441   : > { %8258 = vmatprep.mubr.msk.f32.mxu1 %vm3611_vm6, %v10838_v21  ;;  %v4606_v21 = vsel %vm11775_vm15, %v4604_v8, %v4605_v26  ;;  %v5039_v8 = vld [vmem:[%s11544_s5 + $0x48] sm:$0xff] }
 0x444   : > { %8259 = vmatmul.mubr.msk.f32.vlgmr.msra.gmra.mrb[48].mxu1 %vm3611_vm6, %v10852_v0  ;;  %v4722_v0 = vrot.slane %v3660_v22, 2 }
 0x445   : > { %8261 = vmatprep.mubr.msk.f32.mxu1 %vm3611_vm6, %v10861_v43  ;;  %8644 = vmatpush3.bf16.msra.mxu1 %v8641_v5  ;;  %v4723_v43 = vrot.slane %v3661_v61, 2  ;;  %v8672_v5 = vpack.c.bf16 %v5031_v13, %v5030_v11  ;;  %v5038_v61 = vld [vmem:[%s11544_s5 + $0x40] sm:$0xff]  ;;  %v5069_v11 = vld [vmem:[%s11544_s5 + $0x138] sm:$0xff] }
 0x446   : > { %8646 = vmatprep.subr.bf16.mxu1 %v8645_v38  ;;  %v8678_v26 = vpack.c.bf16 %v5039_v8, %v5038_v61  ;;  %v5074_v61 = vld [vmem:[%s11544_s5 + $0x160] sm:$0xff]  ;;  %v5075_v8 = vld [vmem:[%s11544_s5 + $0x168] sm:$0xff] }
 0x448   : > { %8262 = vmatmul.mubr.msk.f32.gmra.mrb[50].mxu1 %vm3611_vm6, %v10874_v53  ;;  %v4724_v53 = vsel %vm11766_vm0, %v4722_v0, %v4723_v43  ;;  %v5041_v0 = vld [vmem:[%s11544_s5 + $0x58] sm:$0xff] }
 0x449   : > { %8264 = vmatprep.mubr.msk.f32.mxu1 %vm3611_vm6, %v10879_v58  ;;  %8648 = vmatpush3.bf16.msra.mxu1 %v8645_v38  ;;  %v8675_v38 = vpack.c.bf16 %v5033_v36, %v5032_v48  ;;  %v5043_v58 = vld [vmem:[%s11544_s5 + $0x68] sm:$0xff]  ;;  %v5072_v48 = vld [vmem:[%s11544_s5 + $0x150] sm:$0xff]  ;;  %v5073_v36 = vld [vmem:[%s11544_s5 + $0x158] sm:$0xff] }
 0x44c   : > { %8265 = vmatmul.mubr.msk.f32.gmra.mrb[52].mxu1 %vm3611_vm6, %v10890_v29  ;;  %v6885_v29 = vsel %vm10505_vm4, 1.0, %v9210_v52  ;;  %vm9212_vm4 = vmmov 0  }
 0x44d   : > { %8267 = vmatprep.mubr.msk.f32.mxu1 %vm3611_vm6, %v4253_v34 }
 0x450   : > { %8268 = vmatmul.mubr.msk.f32.gmra.mrb[54].mxu1 %vm3611_vm6, %v4606_v21  ;;  %v5040_v21 = vld [vmem:[%s11544_s5 + $0x50] sm:$0xff] }
 0x451   : > { %8278 = vmatprep.mubr.msk.f32.mxu1 %vm3611_vm6, %v10950_v31  ;;  %v6989_v31 = vld [vmem:[%s11543_s4] ss:$0 sm:$0xff]  ;;  %v8681_v43 = vpack.c.bf16 %v5041_v0, %v5040_v21  ;;  %v5076_v0 = vld [vmem:[%s11544_s5 + $0x170] sm:$0xff] }
 0x454   : > { %8279 = vmatmul.mubr.msk.f32.vlgmr.msra.gmra.mrb[48].mxu1 %vm3611_vm6, %v10957_v7 }
 0x455   : > { %8281 = vmatprep.mubr.msk.f32.mxu1 %vm3611_vm6, %v10964_v27 }
 0x458   : > { %8282 = vmatmul.mubr.msk.f32.gmra.mrb[50].mxu1 %vm3611_vm6, %v10971_v49 }
 0x459   : > { %8284 = vmatprep.mubr.msk.f32.mxu1 %vm3611_vm6, %v10978_v6 }
 0x45c   : > { %8285 = vmatmul.mubr.msk.f32.gmra.mrb[52].mxu1 %vm3611_vm6, %v10983_v35 }
 0x45d   : > { %8287 = vmatprep.mubr.msk.f32.mxu1 %vm3611_vm6, %v4371_v37 }
 0x460   : > { %8288 = vmatmul.mubr.msk.f32.gmra.mrb[54].mxu1 %vm3611_vm6, %v4724_v53  ;;  %v5042_v53 = vld [vmem:[%s11544_s5 + $0x60] sm:$0xff] }
 0x461   : > { %8298 = vmatprep.mubr.msk.f32.mxu1 %vm3611_vm6, %v6885_v29  ;;  %v8684_v29 = vpack.c.bf16 %v5043_v58, %v5042_v53  ;;  %v5078_v58 = vld [vmem:[%s11544_s5 + $0x180] sm:$0xff] }
 0x527   : > { %v8280_v19 = vpop.f32.mrb[48].mxu1 }
 0x528   : > { %v4847_v15 = vadd.f32 %v8280_v19, %v6989_v31  ;;  %v4793_v7 = vpop.f32.mrb[49].mxu1  ;;  %v5044_v19 = vld [vmem:[%s11544_s5 + $0x70] sm:$0xff] }
 0x529   : > { %v4846_v40 = vadd.f32 %v6989_v31, %v4793_v7 }
 0x52a   : > { %v4855_v17 = vmax.f32 %v4847_v15, 0.0  ;;  %v5045_v15 = vld [vmem:[%s11544_s5 + $0x78] sm:$0xff] }
 0x52b   : > { %v4854_v27 = vmax.f32 %v4846_v40, 0.0  ;;  %v8283_v16 = vpop.f32.mrb[50].mxu1  ;;  %v8687_v7 = vpack.c.bf16 %v5045_v15, %v5044_v19  ;;  %v5046_v40 = vld [vmem:[%s11544_s5 + $0x80] sm:$0xff]  ;;  %v5080_v15 = vld [vmem:[%s11544_s5 + $0x190] sm:$0xff] }
 0x52c   : > { %v4849_v9 = vadd.f32 %v8283_v16, %v6989_v31  ;;  %v4803_v49 = vpop.f32.mrb[51].mxu1 }
 0x52d   : > { %v4862_v1 = vmax.f32 %v4854_v27, %v4855_v17  ;;  %v4848_v39 = vadd.f32 %v6989_v31, %v4803_v49  ;;  %v5047_v17 = vld [vmem:[%s11544_s5 + $0x88] sm:$0xff]  ;;  %v5049_v49 = vld [vmem:[%s11544_s5 + $0x98] sm:$0xff] }
 0x52e   : > { %v4857_v6 = vmax.f32 %v4849_v9, 0.0  ;;  %v8690_v27 = vpack.c.bf16 %v5047_v17, %v5046_v40  ;;  %v5048_v9 = vld [vmem:[%s11544_s5 + $0x90] sm:$0xff]  ;;  %v5082_v17 = vld [vmem:[%s11544_s5 + $0x1a0] sm:$0xff] }
 0x52f   : > { %v4856_v35 = vmax.f32 %v4848_v39, 0.0  ;;  %v8286_v44 = vpop.f32.mrb[52].mxu1  ;;  %v5050_v39 = vld [vmem:[%s11544_s5 + $0xa0] sm:$0xff] }
 0x530   : > { %v4851_v23 = vadd.f32 %v8286_v44, %v6989_v31  ;;  %v4813_v55 = vpop.f32.mrb[53].mxu1 }
 0x531   : > { %v4863_v56 = vmax.f32 %v4856_v35, %v4857_v6  ;;  %v4850_v30 = vadd.f32 %v6989_v31, %v4813_v55  ;;  %v5051_v6 = vld [vmem:[%s11544_s5 + $0xa8] sm:$0xff]  ;;  %v5053_v55 = vld [vmem:[%s11544_s5 + $0xb8] sm:$0xff] }
 0x532   : > { %v4859_v25 = vmax.f32 %v4851_v23, 0.0  ;;  %v8696_v35 = vpack.c.bf16 %v5051_v6, %v5050_v39  ;;  %v5052_v23 = vld [vmem:[%s11544_s5 + $0xb0] sm:$0xff]  ;;  %v5086_v6 = vld [vmem:[%s11544_s5 + $0x1c0] sm:$0xff] }
 0x533   : > { %v8649_v10 = vpack.c.bf16 %v4863_v56, %v4862_v1  ;;  %v4858_v24 = vmax.f32 %v4850_v30, 0.0  ;;  %v8289_v3 = vpop.f32.mrb[54].mxu1  ;;  %v8693_v1 = vpack.c.bf16 %v5049_v49, %v5048_v9  ;;  %v8699_v56 = vpack.c.bf16 %v5053_v55, %v5052_v23  ;;  %v5054_v30 = vld [vmem:[%s11544_s5 + $0xc0] sm:$0xff]  ;;  %v5084_v49 = vld [vmem:[%s11544_s5 + $0x1b0] sm:$0xff] }
 0x534   : > { %v4853_v57 = vadd.f32 %v8289_v3, %v6989_v31  ;;  %v4823_v47 = vpop.f32.mrb[55].mxu1  ;;  %v5056_v3 = vld [vmem:[%s11544_s5 + $0xd0] sm:$0xff] }
 0x535   : > { %v4864_v4 = vmax.f32 %v4858_v24, %v4859_v25  ;;  %v4852_v50 = vadd.f32 %v6989_v31, %v4823_v47  ;;  %8650 = vmatprep.subr.bf16.mxu1 %v8649_v10  ;;  %v5055_v25 = vld [vmem:[%s11544_s5 + $0xc8] sm:$0xff]  ;;  %v5088_v55 = vld [vmem:[%s11544_s5 + $0x1d0] sm:$0xff] }
 0x536   : > { %v4861_v42 = vmax.f32 %v4853_v57, 0.0  ;;  %8652 = vmatpush3.bf16.msra.mxu1 %v8649_v10  ;;  %v5057_v57 = vld [vmem:[%s11544_s5 + $0xd8] sm:$0xff] }
 0x537   : > { %v4860_v46 = vmax.f32 %v4852_v50, 0.0  ;;  %v8705_v47 = vpack.c.bf16 %v5057_v57, %v5056_v3  ;;  %v5059_v50 = vld [vmem:[%s11544_s5 + $0xe8] sm:$0xff]  ;;  %v5092_v57 = vld [vmem:[%s11544_s5 + $0x1f0] sm:$0xff] }
 0x539   : > { %v4865_v12 = vmax.f32 %v4860_v46, %v4861_v42 }
 0x53b   : > { %v8653_v34 = vpack.c.bf16 %v4865_v12, %v4864_v4  ;;  %v5058_v4 = vld [vmem:[%s11544_s5 + $0xe0] sm:$0xff]  ;;  %v5060_v12 = vld [vmem:[%s11544_s5 + $0xf0] sm:$0xff] }
 0x53c   : > { %v8708_v42 = vpack.c.bf16 %v5059_v50, %v5058_v4 }
 0x53d   : > { %8654 = vmatprep.subr.bf16.mxu1 %v8653_v34 }
 0x53e   : > { %8656 = vmatpush3.bf16.msra.mxu1 %v8653_v34 }
 0x53f   : > { %8658 = vmatprep.subr.bf16.mxu1 %v8649_v10 }
 0x541   : > { %8299 = vmatmul.mubr.msk.f32.vlgmr.msra.gmra.mrb[56].mxu1 %vm3611_vm6, %v6886_v28 }
 0x542   : > { %8660 = vmatpush3.bf16.msra.mxu1 %v8649_v10  ;;  %8309 = vmatprep.mubr.msk.f32.mxu1 %vm3611_vm6, %v6893_v63  ;;  %v8702_v10 = vpack.c.bf16 %v5055_v25, %v5054_v30  ;;  %v5062_v63 = vld [vmem:[%s11544_s5 + $0x100] sm:$0xff] }
 0x543   : > { %8662 = vmatprep.subr.bf16.mxu1 %v8653_v34  ;;  %v5090_v25 = vld [vmem:[%s11544_s5 + $0x1e0] sm:$0xff] }
 0x546   : > { %8664 = vmatpush3.bf16.msra.mxu1 %v8653_v34  ;;  %v5061_v34 = vld [vmem:[%s11544_s5 + $0xf8] sm:$0xff] }
 0x547   : > { %8665 = vmatprep.subr.bf16.mxu1 %v9211_v54  ;;  %v8711_v28 = vpack.c.bf16 %v5061_v34, %v5060_v12  ;;  %v6281_v12 = vld [vmem:[%s11546_s7 + $0x10] sm:$0xff]  ;;  %v6282_v34 = vld [vmem:[%s11546_s7 + $0x18] sm:$0xff] }
 0x549   : > { %8310 = vmatmul.mubr.msk.f32.vlgmr.msra.gmra.mrb[58].mxu1 %vm3611_vm6, %v6894_v41  ;;  %v5063_v41 = vld [vmem:[%s11544_s5 + $0x108] sm:$0xff] }
 0x54a   : > { %8667 = vmatpush3.bf16.msra.mxu1 %v8666_v32  ;;  %8320 = vmatprep.mubr.msk.f32.mxu1 %vm9212_vm4, %v9210_v52  ;;  %v8714_v60 = vpack.c.bf16 %v5063_v41, %v5062_v63  ;;  %v5064_v32 = vld [vmem:[%s11544_s5 + $0x110] sm:$0xff]  ;;  %v8765_v63 = vpack.c.bf16 %v6282_v34, %v6281_v12  ;;  %v6437_v12 = vld [vmem:[%s11550_s11 + $0x8] sm:$0xff]  ;;  %v6360_v34 = vld [vmem:[%s11549_s10] sm:$0x1] }
 0x54b   : > { %8668 = vmatprep.subr.bf16.mxu1 %v9211_v54  ;;  %v8717_v18 = vpack.c.bf16 %v5065_v51, %v5064_v32 }
 0x54e   : > { %8670 = vmatpush3.bf16.msra.mxu1 %v8669_v59  ;;  %v5066_v59 = vld [vmem:[%s11544_s5 + $0x120] sm:$0xff] }
 0x54f   : > { %8671 = vmatprep.subr.bf16.mxu1 %v9211_v54 }
 0x614   : > { %v8300_v20 = vpop.f32.mrb[56].mxu1 }
 0x615   : > { %v4938_v2 = vpop.f32.mrb[57].mxu1 }
 0x61c   : > { %v8311_v37 = vpop.f32.mrb[58].mxu1 }
 0x61d   : > { %v11176_v62 = vmax.f32 %v8300_v20, %v8311_v37  ;;  %v5019_v45 = vpop.f32.mrb[59].mxu1  ;;  %v5067_v20 = vld [vmem:[%s11544_s5 + $0x128] sm:$0xff]  ;;  %v5068_v37 = vld [vmem:[%s11544_s5 + $0x130] sm:$0xff] }
 0x61e   : > { %v11178_v33 = vmax.f32 %v4938_v2, %v5019_v45  ;;  %v8720_v2 = vpack.c.bf16 %v5067_v20, %v5066_v59  ;;  %v8723_v13 = vpack.c.bf16 %v5069_v11, %v5068_v37  ;;  %v5070_v45 = vld [vmem:[%s11544_s5 + $0x140] sm:$0xff] }
 0x61f   : > { %v5832_v21 = vrot.slane %v11176_v62, 2  ;;  %v5906_v19 = vrot.slane %v11176_v62, 3  ;;  %v5980_v9 = vrot.slane %v11176_v62, 4  ;;  %v6054_v23 = vrot.slane %v11176_v62, 5 }
 0x620   : > { %v5095_v22 = vrot.slane %v11178_v33, 1  ;;  %v5240_v31 = vrot.slane %v11178_v33, 2  ;;  %v5314_v16 = vrot.slane %v11178_v33, 3  ;;  %v5388_v44 = vrot.slane %v11178_v33, 4 }
 0x621   : > { %v5462_v24 = vrot.slane %v11178_v33, 5  ;;  %v5536_v46 = vrot.slane %v11178_v33, 6  ;;  %v5610_v14 = vrot.slane %v11178_v33, 7  ;;  %v6128_v3 = vrot.slane %v11176_v62, 6 }
 0x622   : > { %8321 = vmatmul.mubr.msk.f32.vlgmr.msra.gmra.mrb[60].mxu1 %vm3611_vm6, %v5095_v22  ;;  %v5758_v22 = vrot.slane %v11176_v62, 1  ;;  %v6202_v50 = vrot.slane %v11176_v62, 7 }
 0x623   : > { %8673 = vmatpush3.bf16.msra.mxu1 %v8672_v5  ;;  %8331 = vmatprep.mubr.msk.f32.mxu1 %vm9212_vm4, %v9210_v52 }
 0x624   : > { %8674 = vmatprep.subr.bf16.mxu1 %v9211_v54 }
 0x627   : > { %8676 = vmatpush3.bf16.msra.mxu1 %v8675_v38  ;;  %v8729_v38 = vpack.c.bf16 %v5073_v36, %v5072_v48 }
 0x628   : > { %8677 = vmatprep.subr.bf16.mxu1 %v9211_v54 }
 0x62a   : > { %8332 = vmatmul.mubr.msk.f32.vlgmr.msra.gmra.mrb[62].mxu1 %vm3611_vm6, %v11178_v33  ;;  %v5071_v33 = vld [vmem:[%s11544_s5 + $0x148] sm:$0xff] }
 0x62b   : > { %8679 = vmatpush3.bf16.msra.mxu1 %v8678_v26  ;;  %8342 = vmatprep.mubr.msk.f32.mxu1 %vm9212_vm4, %v9210_v52  ;;  %v8726_v5 = vpack.c.bf16 %v5071_v33, %v5070_v45  ;;  %v8732_v26 = vpack.c.bf16 %v5075_v8, %v5074_v61 }
 0x62c   : > { %8680 = vmatprep.subr.bf16.mxu1 %v9211_v54 }
 0x62f   : > { %8682 = vmatpush3.bf16.msra.mxu1 %v8681_v43  ;;  %v5077_v43 = vld [vmem:[%s11544_s5 + $0x178] sm:$0xff] }
 0x630   : > { %8683 = vmatprep.subr.bf16.mxu1 %v9211_v54  ;;  %v8735_v53 = vpack.c.bf16 %v5077_v43, %v5076_v0 }
 0x632   : > { %8343 = vmatmul.mubr.msk.f32.vlgmr.msra.gmra.mrb[64].mxu1 %vm3611_vm6, %v5240_v31 }
 0x633   : > { %8685 = vmatpush3.bf16.msra.mxu1 %v8684_v29  ;;  %8353 = vmatprep.mubr.msk.f32.mxu1 %vm9212_vm4, %v9210_v52  ;;  %v5079_v29 = vld [vmem:[%s11544_s5 + $0x188] sm:$0xff] }
 0x634   : > { %8686 = vmatprep.subr.bf16.mxu1 %v9211_v54  ;;  %v8738_v31 = vpack.c.bf16 %v5079_v29, %v5078_v58 }
 0x637   : > { %8688 = vmatpush3.bf16.msra.mxu1 %v8687_v7  ;;  %v5081_v7 = vld [vmem:[%s11544_s5 + $0x198] sm:$0xff] }
 0x638   : > { %8689 = vmatprep.subr.bf16.mxu1 %v9211_v54  ;;  %v8741_v40 = vpack.c.bf16 %v5081_v7, %v5080_v15 }
 0x63a   : > { %8354 = vmatmul.mubr.msk.f32.vlgmr.msra.gmra.mrb[66].mxu1 %vm3611_vm6, %v5314_v16 }
 0x63b   : > { %8691 = vmatpush3.bf16.msra.mxu1 %v8690_v27  ;;  %8364 = vmatprep.mubr.msk.f32.mxu1 %vm9212_vm4, %v9210_v52  ;;  %v5083_v27 = vld [vmem:[%s11544_s5 + $0x1a8] sm:$0xff] }
 0x63c   : > { %8692 = vmatprep.subr.bf16.mxu1 %v9211_v54  ;;  %v8744_v16 = vpack.c.bf16 %v5083_v27, %v5082_v17 }
 0x63f   : > { %8694 = vmatpush3.bf16.msra.mxu1 %v8693_v1  ;;  %v5085_v1 = vld [vmem:[%s11544_s5 + $0x1b8] sm:$0xff] }
 0x640   : > { %8695 = vmatprep.subr.bf16.mxu1 %v9211_v54  ;;  %v8747_v39 = vpack.c.bf16 %v5085_v1, %v5084_v49 }
 0x642   : > { %8365 = vmatmul.mubr.msk.f32.vlgmr.msra.gmra.mrb[68].mxu1 %vm3611_vm6, %v5388_v44 }
 0x643   : > { %8697 = vmatpush3.bf16.msra.mxu1 %v8696_v35  ;;  %8375 = vmatprep.mubr.msk.f32.mxu1 %vm9212_vm4, %v9210_v52  ;;  %v5087_v35 = vld [vmem:[%s11544_s5 + $0x1c8] sm:$0xff] }
 0x644   : > { %8698 = vmatprep.subr.bf16.mxu1 %v9211_v54  ;;  %v8750_v44 = vpack.c.bf16 %v5087_v35, %v5086_v6 }
 0x647   : > { %8700 = vmatpush3.bf16.msra.mxu1 %v8699_v56  ;;  %v5089_v56 = vld [vmem:[%s11544_s5 + $0x1d8] sm:$0xff] }
 0x648   : > { %8701 = vmatprep.subr.bf16.mxu1 %v9211_v54  ;;  %v8753_v30 = vpack.c.bf16 %v5089_v56, %v5088_v55  ;;  %v6276_v55 = vld [vmem:[%s11545_s6] sm:$0x1] }
 0x64a   : > { %8376 = vmatmul.mubr.msk.f32.vlgmr.msra.gmra.mrb[70].mxu1 %vm3611_vm6, %v5462_v24 }
 0x64b   : > { %8703 = vmatpush3.bf16.msra.mxu1 %v8702_v10  ;;  %8386 = vmatprep.mubr.msk.f32.mxu1 %vm9212_vm4, %v9210_v52  ;;  %v5091_v10 = vld [vmem:[%s11544_s5 + $0x1e8] sm:$0xff] }
 0x64c   : > { %8704 = vmatprep.subr.bf16.mxu1 %v9211_v54  ;;  %v8756_v24 = vpack.c.bf16 %v5091_v10, %v5090_v25 }
 0x64f   : > { %8706 = vmatpush3.bf16.msra.mxu1 %v8705_v47  ;;  %v5093_v47 = vld [vmem:[%s11544_s5 + $0x1f8] sm:$0xff] }
 0x650   : > { %8707 = vmatprep.subr.bf16.mxu1 %v9211_v54  ;;  %v8759_v4 = vpack.c.bf16 %v5093_v47, %v5092_v57  ;;  %v6283_v47 = vld [vmem:[%s11547_s8] sm:$0x1] }
 0x652   : > { %8387 = vmatmul.mubr.msk.f32.vlgmr.msra.gmra.mrb[72].mxu1 %vm3611_vm6, %v5536_v46  ;;  %v6280_v46 = vld [vmem:[%s11546_s7 + $0x8] sm:$0xff] }
 0x653   : > { %8709 = vmatpush3.bf16.msra.mxu1 %v8708_v42  ;;  %8397 = vmatprep.mubr.msk.f32.mxu1 %vm9212_vm4, %v9210_v52  ;;  %v6279_v42 = vld [vmem:[%s11546_s7] sm:$0xff] }
 0x654   : > { %8710 = vmatprep.subr.bf16.mxu1 %v9211_v54 }
 0x657   : > { %8712 = vmatpush3.bf16.msra.mxu1 %v8711_v28 }
 0x658   : > { %8713 = vmatprep.subr.bf16.mxu1 %v9211_v54 }
 0x65a   : > { %8398 = vmatmul.mubr.msk.f32.vlgmr.msra.gmra.mrb[74].mxu1 %vm3611_vm6, %v5610_v14 }
 0x65b   : > { %8715 = vmatpush3.bf16.msra.mxu1 %v8714_v60  ;;  %8408 = vmatprep.mubr.msk.f32.mxu1 %vm9212_vm4, %v9210_v52 }
 0x65c   : > { %8716 = vmatprep.subr.bf16.mxu1 %v9211_v54 }
 0x65f   : > { %8718 = vmatpush3.bf16.msra.mxu1 %v8717_v18 }
 0x660   : > { %8719 = vmatprep.subr.bf16.mxu1 %v9211_v54 }
 0x662   : > { %8409 = vmatmul.mubr.msk.f32.vlgmr.msra.gmra.mrb[76].mxu1 %vm3611_vm6, %v11176_v62  ;;  %v8762_v62 = vpack.c.bf16 %v6280_v46, %v6279_v42 }
 0x663   : > { %8721 = vmatpush3.bf16.msra.mxu1 %v8720_v2  ;;  %8419 = vmatprep.mubr.msk.f32.mxu1 %vm9212_vm4, %v9210_v52 }
 0x664   : > { %8722 = vmatprep.subr.bf16.mxu1 %v9211_v54 }
 0x667   : > { %8724 = vmatpush3.bf16.msra.mxu1 %v8723_v13 }
 0x668   : > { %8725 = vmatprep.subr.bf16.mxu1 %v9211_v54 }
 0x66a   : > { %8420 = vmatmul.mubr.msk.f32.vlgmr.msra.gmra.mrb[78].mxu1 %vm3611_vm6, %v5758_v22 }
 0x66b   : > { %8727 = vmatpush3.bf16.msra.mxu1 %v8726_v5  ;;  %8430 = vmatprep.mubr.msk.f32.mxu1 %vm9212_vm4, %v9210_v52 }
 0x66c   : > { %8728 = vmatprep.subr.bf16.mxu1 %v9211_v54 }
 0x66f   : > { %8730 = vmatpush3.bf16.msra.mxu1 %v8729_v38 }
 0x670   : > { %8731 = vmatprep.subr.bf16.mxu1 %v9211_v54 }
 0x672   : > { %8431 = vmatmul.mubr.msk.f32.vlgmr.msra.gmra.mrb[80].mxu1 %vm3611_vm6, %v5832_v21 }
 0x673   : > { %8733 = vmatpush3.bf16.msra.mxu1 %v8732_v26  ;;  %8441 = vmatprep.mubr.msk.f32.mxu1 %vm9212_vm4, %v9210_v52 }
 0x674   : > { %8734 = vmatprep.subr.bf16.mxu1 %v9211_v54 }
 0x677   : > { %8736 = vmatpush3.bf16.msra.mxu1 %v8735_v53 }
 0x678   : > { %8737 = vmatprep.subr.bf16.mxu1 %v9211_v54 }
 0x67a   : > { %8442 = vmatmul.mubr.msk.f32.vlgmr.msra.gmra.mrb[82].mxu1 %vm3611_vm6, %v5906_v19 }
 0x67b   : > { %8739 = vmatpush3.bf16.msra.mxu1 %v8738_v31  ;;  %8452 = vmatprep.mubr.msk.f32.mxu1 %vm9212_vm4, %v9210_v52 }
 0x67c   : > { %8740 = vmatprep.subr.bf16.mxu1 %v9211_v54 }
 0x67f   : > { %8742 = vmatpush3.bf16.msra.mxu1 %v8741_v40 }
 0x680   : > { %8743 = vmatprep.subr.bf16.mxu1 %v9211_v54 }
 0x682   : > { %8453 = vmatmul.mubr.msk.f32.vlgmr.msra.gmra.mrb[84].mxu1 %vm3611_vm6, %v5980_v9 }
 0x683   : > { %8745 = vmatpush3.bf16.msra.mxu1 %v8744_v16  ;;  %8463 = vmatprep.mubr.msk.f32.mxu1 %vm9212_vm4, %v9210_v52 }
 0x684   : > { %8746 = vmatprep.subr.bf16.mxu1 %v9211_v54 }
 0x687   : > { %8748 = vmatpush3.bf16.msra.mxu1 %v8747_v39 }
 0x688   : > { %8749 = vmatprep.subr.bf16.mxu1 %v9211_v54 }
 0x68a   : > { %8464 = vmatmul.mubr.msk.f32.vlgmr.msra.gmra.mrb[86].mxu1 %vm3611_vm6, %v6054_v23 }
 0x68b   : > { %8751 = vmatpush3.bf16.msra.mxu1 %v8750_v44  ;;  %8474 = vmatprep.mubr.msk.f32.mxu1 %vm9212_vm4, %v9210_v52 }
 0x68c   : > { %8752 = vmatprep.subr.bf16.mxu1 %v9211_v54 }
 0x68f   : > { %8754 = vmatpush3.bf16.msra.mxu1 %v8753_v30 }
 0x690   : > { %8755 = vmatprep.subr.bf16.mxu1 %v9211_v54 }
 0x692   : > { %8475 = vmatmul.mubr.msk.f32.vlgmr.msra.gmra.mrb[88].mxu1 %vm3611_vm6, %v6128_v3  ;;  %v6359_v3 = vld [vmem:[%s11548_s9 + $0x8] sm:$0xff] }
 0x693   : > { %8757 = vmatpush3.bf16.msra.mxu1 %v8756_v24  ;;  %8485 = vmatprep.mubr.msk.f32.mxu1 %vm9212_vm4, %v9210_v52  ;;  %v6358_v24 = vld [vmem:[%s11548_s9] sm:$0xff] }
 0x694   : > { %8758 = vmatprep.subr.bf16.mxu1 %v9211_v54  ;;  %v8768_v57 = vpack.c.bf16 %v6359_v3, %v6358_v24 }
 0x697   : > { %8760 = vmatpush3.bf16.msra.mxu1 %v8759_v4 }
 0x698   : > { %8761 = vmatprep.subr.bf16.mxu1 %v9211_v54 }
 0x69a   : > { %8486 = vmatmul.mubr.msk.f32.vlgmr.msra.gmra.mrb[90].mxu1 %vm3611_vm6, %v6202_v50 }
 0x69b   : > { %8496 = vmatprep.mubr.msk.f32.mxu1 %vm9212_vm4, %v9210_v52  ;;  %8763 = vmatpush3.bf16.msra.mxu1 %v8762_v62 }
 0x69c   : > { %8764 = vmatprep.subr.bf16.mxu1 %v9211_v54 }
 0x69f   : > { %8766 = vmatpush3.bf16.msra.mxu1 %v8765_v63 }
 0x6a0   : > { %8767 = vmatprep.subr.bf16.mxu1 %v9211_v54 }
 0x6f5   : > { %v5164_v28 = vpop.f32.mrb[60].mxu1 }
 0x6f6   : > { %v8322_v41 = vpop.f32.mrb[61].mxu1 }
 0x6fd   : > { %v5236_v60 = vpop.f32.mrb[62].mxu1 }
 0x6fe   : > { %v5237_v14 = vadd.f32 %v5236_v60, %v5164_v28  ;;  %v8333_v32 = vpop.f32.mrb[63].mxu1 }
 0x705   : > { %v5309_v51 = vpop.f32.mrb[64].mxu1 }
 0x706   : > { %v5313_v18 = vadd.f32 %v5309_v51, %v5237_v14  ;;  %v8344_v59 = vpop.f32.mrb[65].mxu1 }
 0x70d   : > { %v5383_v20 = vpop.f32.mrb[66].mxu1 }
 0x70e   : > { %v5387_v2 = vadd.f32 %v5383_v20, %v5313_v18  ;;  %v8355_v37 = vpop.f32.mrb[67].mxu1 }
 0x715   : > { %v5457_v11 = vpop.f32.mrb[68].mxu1 }
 0x716   : > { %v5461_v13 = vadd.f32 %v5457_v11, %v5387_v2  ;;  %v8366_v45 = vpop.f32.mrb[69].mxu1 }
 0x71d   : > { %v5531_v33 = vpop.f32.mrb[70].mxu1 }
 0x71e   : > { %v5535_v5 = vadd.f32 %v5531_v33, %v5461_v13  ;;  %v8377_v22 = vpop.f32.mrb[71].mxu1 }
 0x725   : > { %v5605_v48 = vpop.f32.mrb[72].mxu1 }
 0x726   : > { %v5609_v36 = vadd.f32 %v5605_v48, %v5535_v5  ;;  %v8388_v38 = vpop.f32.mrb[73].mxu1 }
 0x72d   : > { %v5679_v61 = vpop.f32.mrb[74].mxu1 }
 0x72e   : > { %v5683_v8 = vadd.f32 %v5679_v61, %v5609_v36  ;;  %v8399_v26 = vpop.f32.mrb[75].mxu1 }
 0x735   : > { %v5753_v21 = vpop.f32.mrb[76].mxu1 }
 0x736   : > { %v5757_v0 = vadd.f32 %v5753_v21, %v5683_v8  ;;  %v8410_v43 = vpop.f32.mrb[77].mxu1 }
 0x73d   : > { %v5827_v53 = vpop.f32.mrb[78].mxu1 }
 0x73e   : > { %v5831_v58 = vadd.f32 %v5827_v53, %v5757_v0  ;;  %v8421_v29 = vpop.f32.mrb[79].mxu1 }
 0x745   : > { %v5901_v31 = vpop.f32.mrb[80].mxu1 }
 0x746   : > { %v5905_v19 = vadd.f32 %v5901_v31, %v5831_v58  ;;  %v8432_v15 = vpop.f32.mrb[81].mxu1 }
 0x74d   : > { %v5975_v7 = vpop.f32.mrb[82].mxu1 }
 0x74e   : > { %v5979_v40 = vadd.f32 %v5975_v7, %v5905_v19  ;;  %v8443_v17 = vpop.f32.mrb[83].mxu1 }
 0x755   : > { %v6049_v27 = vpop.f32.mrb[84].mxu1 }
 0x756   : > { %v6053_v16 = vadd.f32 %v6049_v27, %v5979_v40  ;;  %v8454_v9 = vpop.f32.mrb[85].mxu1 }
 0x75d   : > { %v6123_v49 = vpop.f32.mrb[86].mxu1 }
 0x75e   : > { %v6127_v1 = vadd.f32 %v6123_v49, %v6053_v16  ;;  %v8465_v39 = vpop.f32.mrb[87].mxu1 }
 0x765   : > { %v6197_v6 = vpop.f32.mrb[88].mxu1 }
 0x766   : > { %v6201_v35 = vadd.f32 %v6197_v6, %v6127_v1  ;;  %v8476_v44 = vpop.f32.mrb[89].mxu1 }
 0x76d   : > { %v6271_v23 = vpop.f32.mrb[90].mxu1 }
 0x76e   : > { %v6275_v56 = vadd.f32 %v6271_v23, %v6201_v35  ;;  %v8487_v30 = vpop.f32.mrb[91].mxu1 }
 0x770   : > { %v6277_v25 = vadd.f32 %v6276_v55, %v6275_v56 }
 0x772   : > { %9139 = vtanh.f32 %v6277_v25 }
 0x77c   : > { %v9140_v10 = vpop.eup %9139 }
 0x77d   : > { %8497 = vmatmul.mubr.msk.f32.vlgmr.msra.gmra.mrb[92].mxu1 %vm3611_vm6, %v9140_v10 }
 0x77e   : > { %8503 = vmatprep.mubr.msk.f32.mxu1 %vm9212_vm4, %v9210_v52  ;;  %8769 = vmatpush3.bf16.msra.mxu1 %v8768_v57 }
 0x77f   : > { %8770 = vmatprep.subr.bf16.mxu1 %v9211_v54  ;;  %v6436_v54 = vld [vmem:[%s11550_s11] sm:$0xff] }
 0x780   : > { %v8771_v62 = vpack.c.bf16 %v6437_v12, %v6436_v54 }
 0x850   : > { %v6353_v4 = vpop.f32.mrb[92].mxu1 }
 0x851   : > { %v6354_v50 = vadd.f32 %v6353_v4, %v6283_v47  ;;  %v8498_v42 = vpop.f32.mrb[93].mxu1 }
 0x853   : > { %9141 = vtanh.f32 %v6354_v50 }
 0x85d   : > { %v9142_v46 = vpop.eup %9141 }
 0x85e   : > { %8504 = vmatmul.mubr.msk.f32.vlgmr.msra.gmra.mrb[94].mxu1 %vm6361_vm5, %v9142_v46 }
 0x85f   : > { %8510 = vmatprep.mubr.msk.f32.mxu1 %vm9212_vm4, %v9210_v52  ;;  %8772 = vmatpush3.bf16.msra.mxu1 %v8771_v62  ;;  %v6438_v52 = vld [vmem:[%s11551_s12] sm:$0x1] }
 0x931   : > { %v6431_v28 = vpop.f32.mrb[94].mxu1 }
 0x932   : > { %v6432_v63 = vadd.f32 %v6431_v28, %v6360_v34  ;;  %v8505_v41 = vpop.f32.mrb[95].mxu1 }
 0x934   : > { %9143 = vtanh.f32 %v6432_v63 }
 0x93e   : > { %v9144_v60 = vpop.eup %9143 }
 0x93f   : > { %8511 = vmatmul.mubr.msk.f32.vlgmr.msra.gmra.mrb[96].mxu1 %vm6361_vm5, %v9144_v60 }
 0xa12   : > { %v6508_v14 = vpop.f32.mrb[96].mxu1 }
 0xa13   : > { %v6509_v32 = vadd.f32 %v6508_v14, %v6438_v52  ;;  %v8512_v51 = vpop.f32.mrb[97].mxu1 }
 0xa15   : > { %6513 = vst.msk [vmem:[%s432_s15] sm:$0x1] %vm6512_vm12, %v6509_v32 }
 0xa16   : > { %9158 = shalt.err (!%p9155_p3)
}
 0xa17   : > { %s9159_s22 = scalar_lea.hbm %s11497_s0, 16  ;;  %s9163_s20 = scalar_lea.hbm %s11552_s13, 32 }
 0xa18   : > { %p9160_p4 = scmp.ne.s32.totalorder %s11497_s0, %s9159_s22  ;;  %p9164_p9 = scmp.lt.u32.totalorder %s11497_s0, %s11552_s13 }
 0xa19   : > { %p9165_p10 = scmp.lt.u32.totalorder %s9163_s20, %s9159_s22  ;;  %p9167_p12 = scmp.lt.u32.totalorder %s9159_s22, %s11497_s0 }
 0xa1a   : > { %p9161_p7 = pnand %p9160_p4, %p9322_p5 }
 0xa1b   : > { %p9166_p11 = por %p9165_p10, %p9164_p9 }
 0xa1c   : > { %p9162_p8 = pneg %p9161_p7 }
 0xa1d   : > { %p9168_p13 = por %p9167_p12, %p9166_p11 }
 0xa1f   : > { %p9169_p0 = pnand %p9168_p13, %p9162_p8 }
 0xa21   : > { %9172 = shalt.err (!%p9169_p0)
}
 0xa22   : > { %9096 = dma.vmem_to_hbm [thread:$0]  (%p9322_p5), %s11499_s16, 16, %s11497_s0, %s6515_s23  }
 0xa23 PF: > { %p9102_p1 = scmp.ge.s32.totalorder %s9207_s28, 2  ;;  %s6539_s2 = sand.u32 1, %s9195_s25  }
 0xa24   : > { %s6540_s24 = scalar_lea.sflag [#allocation4], %s6539_s2 }
 0xa25   : > { %p9099_p2 = pnand %p9102_p1, %p9326_p6 }
 0xa27   : > { %9190 = dma.done.wait (!%p9099_p2), %s6540_s24, 16  }
 0xa28   : > { %9192 = vsyncadd (!%p9099_p2), %s6540_s24, 4294967280  ;;  %p23_p3 = scmp.ge.s32.totalorder %s9309_s14, 4   ;;  %s11777_s25 = smov %s9199_s26 }
 0xa29   : > { %s11778_s26 = smov %s9203_s27  ;;  %s11779_s27 = smov %s9320_s17 }
 0xa2a   : > { %s11780_s28 = smov %s9309_s14  ;;  %25 = sbr.rel (!%p23_p3) target bundleno = 7 (0x7), region = 108 }
 0xa31   :  { %6544 = vsyncpa [#allocation4], 1 }
 0xa32   :  { %6546 = vsyncpa [#allocation4 + $0x1], 1 }

</bundles_post_ra>
